<compile_context>
chip_gen: v7x
topology: tpu7x:2x2x1
jax: 0.10.0
libtpu: 0.0.40
codegen_flags: <defaults>
</compile_context>

<pallas_src>
import jax
import jax.numpy as jnp
from jax import lax
from jax.experimental import pallas as pl
from jax.experimental.pallas import tpu as pltpu

COMPUTE_DTYPE = jnp.bfloat16
BN_EPS = 1e-5


# ----------------------------------------------------------------------------
# Pallas kernel: out = w @ p + bias  (BN already folded into w / bias),
# K-reduction accumulated in an f32 VMEM scratch.
# ----------------------------------------------------------------------------
def _gemm_bias_kernel(w_ref, p_ref, b_ref, o_ref, acc_ref):
    @pl.when(pl.program_id(1) == 0)
    def _():
        acc_ref[...] = jnp.zeros_like(acc_ref)

    acc_ref[...] += jnp.dot(w_ref[...], p_ref[...],
                            preferred_element_type=jnp.float32)

    @pl.when(pl.program_id(1) == pl.num_programs(1) - 1)
    def _():
        o_ref[...] = (acc_ref[...] + b_ref[...]).astype(o_ref.dtype)


def _largest_aligned_divisor(dim, cap, align=128):
    """Largest multiple of `align` that divides `dim` and is <= cap (None if none)."""
    c = (min(cap, dim) // align) * align
    while c >= align:
        if dim % c == 0:
            return c
        c -= align
    return None


def gemm_bias(w, p, bias, out_dtype):
    """w:(N,K)  p:(K,M)  bias:(N,1) f32  ->  (N,M) out_dtype.

    Transposed-GEMM orientation: the big batch*spatial axis M sits in the lane
    dimension of the output (lane-dense stores).  M is tiled ("parallel") when
    the operands get large; K is tiled ("arbitrary" reduction, innermost) when
    the weight alone is VMEM-heavy.  At the test shapes grid == (1, 1).
    """
    N, K = w.shape
    K2, M = p.shape
    assert K == K2
    ibytes = jnp.dtype(w.dtype).itemsize

    # Lane-tile M when the whole operand set would not sit comfortably in VMEM.
    tm = M
    total_bytes = (N * K + K * M + 2 * N * M) * ibytes
    if total_bytes > 4 * 1024 * 1024:
        cand = _largest_aligned_divisor(M, 1024)
        if cand is not None:
            tm = cand
    # Tile the reduction axis when the weight itself is VMEM-heavy.
    tk = K
    if N * K * ibytes > 6 * 1024 * 1024:
        cand = _largest_aligned_divisor(K, 2048)
        if cand is not None:
            tk = cand

    grid = (M // tm, K // tk)
    return pl.pallas_call(
        _gemm_bias_kernel,
        out_shape=jax.ShapeDtypeStruct((N, M), out_dtype),
        grid_spec=pltpu.PrefetchScalarGridSpec(
            num_scalar_prefetch=0,
            grid=grid,
            in_specs=[
                pl.BlockSpec((N, tk), lambda i, k: (0, k)),
                pl.BlockSpec((tk, tm), lambda i, k: (k, i)),
                pl.BlockSpec((N, 1), lambda i, k: (0, 0)),
            ],
            out_specs=pl.BlockSpec((N, tm), lambda i, k: (0, i)),
            scratch_shapes=[pltpu.VMEM((N, tm), jnp.float32)],
        ),
        compiler_params=pltpu.CompilerParams(
            dimension_semantics=("parallel", "arbitrary")),
    )(w, p, bias)


# ----------------------------------------------------------------------------
# Conv2d + BatchNorm2d (eval mode) via im2col + fused Pallas GEMM
# ----------------------------------------------------------------------------
def conv_bn(x, wb, kernel, stride, padding):
    """x: (Cin, B, H, W) channel-major activations (COMPUTE_DTYPE).
    wb: (w_mat (Cout, Kh*Kw*Cin) with BN scale folded in, bias (Cout,1) f32).
    Returns (Cout, B, Hout, Wout)."""
    w_mat, bias = wb
    cin, b, h, w = x.shape
    kh, kw = kernel
    sh, sw = stride
    ph, pw = padding
    xp = jnp.pad(x, ((0, 0), (0, 0), (ph, ph), (pw, pw)))
    ho = (h + 2 * ph - kh) // sh + 1
    wo = (w + 2 * pw - kw) // sw + 1
    # im2col, (kh, kw, cin)-ordered along K to match w_mat's row order.
    # TODO(synk): patches are still materialized by XLA glue; fusing the strided
    # gather into the Pallas GEMM would remove one HBM round trip per conv.
    cols = [
        xp[:, :, i:i + sh * (ho - 1) + 1:sh, j:j + sw * (wo - 1) + 1:sw]
        for i in range(kh) for j in range(kw)
    ]
    patches = cols[0] if len(cols) == 1 else jnp.concatenate(cols, axis=0)
    patches = patches.reshape(kh * kw * cin, b * ho * wo)
    out = gemm_bias(w_mat, patches, bias, out_dtype=x.dtype)
    return out.reshape(w_mat.shape[0], b, ho, wo)


# ----------------------------------------------------------------------------
# Raw (PyTorch-like) parameter construction — deterministic, synthetic
# ----------------------------------------------------------------------------
def _conv_bn_params(key, kh, kw, cin, cout):
    k_w, k_g, k_b = jax.random.split(key, 3)
    fan_in = cin * kh * kw
    std = (2.0 / fan_in) ** 0.5                      # kaiming_normal_(fan_in, relu)
    return {
        "w": std * jax.random.normal(k_w, (kh, kw, cin, cout), jnp.float32),
        "b": jnp.zeros((cout,), jnp.float32),        # conv bias zeroed in __init__
        "gamma": 1.0 + 0.1 * jax.random.normal(k_g, (cout,), jnp.float32),
        "beta": 0.05 * jax.random.normal(k_b, (cout,), jnp.float32),
        "mean": jnp.zeros((cout,), jnp.float32),     # BN running stats (eval mode)
        "var": jnp.ones((cout,), jnp.float32),
    }


def init_params(key, inplanes, planes, final_feat):
    keys = jax.random.split(key, 10)
    fcin = planes * final_feat[0] * final_feat[1]
    return {
        "conv1": _conv_bn_params(keys[0], 3, 3, inplanes, planes * 8),
        "conv2": _conv_bn_params(keys[1], 3, 3, planes * 8, planes * 8),
        "conv3": _conv_bn_params(keys[2], 2, 1, planes * 8, planes * 4),
        "conv4": _conv_bn_params(keys[3], 2, 1, planes * 4, planes * 2),
        "tr":    _conv_bn_params(keys[4], 1, 1, planes * 2, planes),
        "rot":   _conv_bn_params(keys[5], 1, 1, planes * 2, planes),
        "fc1_w": jax.random.normal(keys[6], (fcin, 3), jnp.float32) / jnp.sqrt(fcin),
        "fc1_b": 0.01 * jax.random.normal(keys[7], (3,), jnp.float32),
        "fc2_w": jax.random.normal(keys[8], (fcin, 3), jnp.float32) / jnp.sqrt(fcin),
        "fc2_b": 0.01 * jax.random.normal(keys[9], (3,), jnp.float32),
    }


# ----------------------------------------------------------------------------
# One-time parameter folding (outside the jitted forward)
# ----------------------------------------------------------------------------
def _stage_hw(h, w):
    h1, w1 = (h + 2 - 3) // 2 + 1, (w + 2 - 3) // 2 + 1   # conv1: 3x3 s2 p1
    h2, w2 = (h1 + 2 - 3) // 2 + 1, (w1 + 2 - 3) // 2 + 1  # conv2: 3x3 s2 p1
    h3, w3 = (h2 - 2) // 2 + 1, (w2 - 1) // 2 + 1           # conv3: (2,1) s2
    h4, w4 = (h3 - 2) // 2 + 1, (w3 - 1) // 2 + 1           # conv4: (2,1) s2
    return (h1, w1), (h2, w2), (h3, w3), (h4, w4)


def _fold_conv(q, eps=BN_EPS):
    """Fold eval-mode BN into the conv: ((Cout, K) weight, (Cout, 1) bias)."""
    kh, kw, cin, cout = q["w"].shape
    s = q["gamma"] / jnp.sqrt(q["var"] + eps)
    w = (q["w"] * s).reshape(kh * kw * cin, cout).T
    bias = (q["b"] - q["mean"]) * s + q["beta"]
    return w.astype(COMPUTE_DTYPE), bias[:, None].astype(jnp.float32)


def _build_tail(p, h2, w2, final_feat, eps=BN_EPS):
    """Fold everything from conv3 onward (conv3+bn3, conv4+bn4, tr/rot 1x1
    conv + BN, Dropout2d==identity in eval, AdaptiveAvgPool2d, PyTorch flatten,
    fc1/fc2) into one affine map on the conv2 output flattened per batch in
    (c, h, w) order:  out6 = M @ x + b  with out6 = [tr(3) | rot(3)]."""
    oh, ow = final_feat
    c2 = p["conv3"]["w"].shape[2]
    c4 = p["conv4"]["w"].shape[3]
    planes = p["tr"]["w"].shape[3]
    (h3, w3) = ((h2 - 2) // 2 + 1, (w2 - 1) // 2 + 1)
    (h4, w4) = ((h3 - 2) // 2 + 1, (w3 - 1) // 2 + 1)
    # TODO(synk): general non-divisible AdaptiveAvgPool2d (floor/ceil bins) not implemented.
    assert h4 % oh == 0 and w4 % ow == 0, "adaptive pool: only divisible grids supported"

    def conv_bn_eval(x_chw, q, stride):
        y = lax.conv_general_dilated(
            x_chw[None], q["w"], window_strides=stride, padding="VALID",
            dimension_numbers=("NCHW", "HWIO", "NCHW"))[0]
        s = q["gamma"] / jnp.sqrt(q["var"] + eps)
        y = y + q["b"][:, None, None]
        return (y - q["mean"][:, None, None]) * s[:, None, None] + q["beta"][:, None, None]

    def head(x4, q, fw, fb):
        s = q["gamma"] / jnp.sqrt(q["var"] + eps)
        wmat = q["w"].reshape(c4, planes) * s[None, :]         # 1x1 conv + BN
        bias = (q["b"] - q["mean"]) * s + q["beta"]
        h = jnp.einsum("chw,cd->dhw", x4, wmat) + bias[:, None, None]
        pooled = h.reshape(planes, oh, h4 // oh, ow, w4 // ow).mean(axis=(2, 4))
        return pooled.reshape(-1) @ fw + fb                    # PyTorch (C,H,W) flatten

    def tail_ref(x_flat):                                      # (c2*h2*w2,), (c,h,w) order
        x = x_flat.reshape(c2, h2, w2)
        x = conv_bn_eval(x, p["conv3"], (2, 2))
        x = conv_bn_eval(x, p["conv4"], (2, 2))
        x_tr = head(x, p["tr"], p["fc1_w"], p["fc1_b"])
        x_rot = head(x, p["rot"], p["fc2_w"], p["fc2_b"])
        return jnp.concatenate([x_tr, x_rot])                  # (6,) = [tr | rot]

    zero = jnp.zeros((c2 * h2 * w2,), jnp.float32)
    b_tail = tail_ref(zero)                                    # (6,)
    m_tail = jax.jacrev(tail_ref)(zero)                        # (6, c2*h2*w2); exact (affine)
    return m_tail.astype(COMPUTE_DTYPE), b_tail[:, None].astype(jnp.float32)


def prepare_params(p, input_hw, final_feat):
    (_h1, _w1), (h2, w2), _, _ = _stage_hw(*input_hw)
    return {
        "conv1": _fold_conv(p["conv1"]),
        "conv2": _fold_conv(p["conv2"]),
        "tail": _build_tail(p, h2, w2, final_feat),
    }


# ----------------------------------------------------------------------------
# Forward pass (matches Aggregation.forward, eval mode) — 3 Pallas launches
# ----------------------------------------------------------------------------
@jax.jit
def aggregation_forward(x_nchw, fp):
    x = jnp.transpose(x_nchw, (1, 0, 2, 3)).astype(COMPUTE_DTYPE)  # NCHW -> (C,B,H,W)
    x = conv_bn(x, fp["conv1"], kernel=(3, 3), stride=(2, 2), padding=(1, 1))
    x = conv_bn(x, fp["conv2"], kernel=(3, 3), stride=(2, 2), padding=(1, 1))
    c2, b, h2, w2 = x.shape
    # (C2,B,H2,W2) -> (C2*H2*W2, B): per-batch columns, rows in (c,h,w) order.
    x_t = jnp.transpose(x, (0, 2, 3, 1)).reshape(c2 * h2 * w2, b)
    m_tail, b_tail = fp["tail"]
    out = gemm_bias(m_tail, x_t, b_tail, out_dtype=jnp.float32).T  # (B, 6) = [tr | rot]
    x_tr, x_rot = out[:, :3], out[:, 3:]
    return x_rot, x_tr


# ----------------------------------------------------------------------------
# Pure-JAX f32 reference (eval mode) for a loose self-check
# ----------------------------------------------------------------------------
def reference_forward(x_nchw, p, final_feat, eps=BN_EPS):
    def conv(x, q, stride, padding):
        y = lax.conv_general_dilated(
            x, q["w"], window_strides=stride,
            padding=[(padding[0], padding[0]), (padding[1], padding[1])],
            dimension_numbers=("NHWC", "HWIO", "NHWC"))
        y = y + q["b"]
        s = q["gamma"] / jnp.sqrt(q["var"] + eps)
        return (y - q["mean"]) * s + q["beta"]

    x = jnp.transpose(x_nchw, (0, 2, 3, 1)).astype(jnp.float32)
    x = conv(x, p["conv1"], (2, 2), (1, 1))
    x = conv(x, p["conv2"], (2, 2), (1, 1))
    x = conv(x, p["conv3"], (2, 2), (0, 0))
    x = conv(x, p["conv4"], (2, 2), (0, 0))
    oh, ow = final_feat

    def head(q, fw, fb):
        h = conv(x, q, (1, 1), (0, 0))
        bsz, hh, ww, c = h.shape
        h = h.reshape(bsz, oh, hh // oh, ow, ww // ow, c).mean(axis=(2, 4))
        flat = jnp.transpose(h, (0, 3, 1, 2)).reshape(bsz, -1)
        return flat @ fw + fb

    return head(p["rot"], p["fc2_w"], p["fc2_b"]), head(p["tr"], p["fc1_w"], p["fc1_b"])


# ----------------------------------------------------------------------------
if __name__ == "__main__":
    # Small synthetic config consistent with the module structure:
    # inplanes=16, planes=8, final_feat=(5,2); 80x32 input so the conv4 output
    # is exactly (5,2) and the adaptive pool is the divisible uniform average.
    INPLANES, PLANES, FINAL = 16, 8, (5, 2)
    B, H, W = 2, 80, 32

    key = jax.random.PRNGKey(0)
    k_x, k_p = jax.random.split(key)
    x = jax.random.normal(k_x, (B, INPLANES, H, W), jnp.float32)   # NCHW like PyTorch
    raw = init_params(k_p, INPLANES, PLANES, FINAL)
    folded = prepare_params(raw, input_hw=(H, W), final_feat=FINAL)

    x_rot, x_tr = aggregation_forward(x, folded)
    jax.block_until_ready((x_rot, x_tr))

    assert x_rot.shape == (B, 3) and x_tr.shape == (B, 3)
    assert bool(jnp.all(jnp.isfinite(x_rot))) and bool(jnp.all(jnp.isfinite(x_tr)))

    # Loose self-check against the f32 reference (kernel math uses bf16 operands).
    r_rot, r_tr = reference_forward(x, raw, FINAL)
    scale = float(jnp.maximum(jnp.max(jnp.abs(r_rot)), jnp.max(jnp.abs(r_tr))))
    err = float(jnp.maximum(jnp.max(jnp.abs(x_rot - r_rot)),
                            jnp.max(jnp.abs(x_tr - r_tr))))
    assert err <= 0.3 + 0.08 * max(scale, 1.0), f"mismatch vs reference: err={err}, scale={scale}"

    print("KERNEL_OK")
</pallas_src>

<mosaic_0001>
module attributes {stable_mosaic.version = 11 : i64} {
  func.func @_gemm_bias_kernel(%arg0: i32, %arg1: i32, %arg2: memref<64x144xbf16, #tpu.memory_space<vmem>>, %arg3: memref<144x1280xbf16, #tpu.memory_space<vmem>>, %arg4: memref<64x1xf32, #tpu.memory_space<vmem>>, %arg5: memref<64x1280xbf16, #tpu.memory_space<vmem>>, %arg6: memref<64x1280xf32, #tpu.memory_space<vmem>>) attributes {dimension_semantics = [#tpu.dimension_semantics<parallel>, #tpu.dimension_semantics<arbitrary>], iteration_bounds = array<i64: 1, 1>, scalar_prefetch = 0 : i64, scratch_operands = 1 : i64, tpu.core_type = #tpu.core_type<tc>, window_params = [{transform_indices = @transform_0, window_bounds = array<i64: 64, 144>}, {transform_indices = @transform_1, window_bounds = array<i64: 144, 1280>}, {pipeline_mode = #tpu.pipeline_mode<synchronous>, transform_indices = @transform_2, window_bounds = array<i64: 64, 1>}, {transform_indices = @transform_3, window_bounds = array<i64: 64, 1280>}]} {
    %c0_i32 = arith.constant 0 : i32
    %0 = arith.cmpi eq, %arg1, %c0_i32 : i32
    %1 = arith.extui %0 : i1 to i32
    %c0_i32_0 = arith.constant 0 : i32
    %2 = arith.cmpi ne, %1, %c0_i32_0 : i32
    scf.if %2 {
      %cst_10 = arith.constant 0.000000e+00 : f32
      %12 = vector.broadcast %cst_10 : f32 to vector<64x1280xf32>
      %c0_11 = arith.constant 0 : index
      %c0_12 = arith.constant 0 : index
      %13 = vector.load %arg6[%c0_11, %c0_12] : memref<64x1280xf32, #tpu.memory_space<vmem>>, vector<64x1280xf32>
      tpu.vector_store %arg6[%c0_11, %c0_12], %12 {strides = array<i32>} : memref<64x1280xf32, #tpu.memory_space<vmem>>, vector<64x1280xf32>,
    } else {
    }
    %c0 = arith.constant 0 : index
    %c0_1 = arith.constant 0 : index
    %3 = vector.load %arg6[%c0, %c0_1] : memref<64x1280xf32, #tpu.memory_space<vmem>>, vector<64x1280xf32>
    %c0_2 = arith.constant 0 : index
    %c0_3 = arith.constant 0 : index
    %4 = vector.load %arg2[%c0_2, %c0_3] : memref<64x144xbf16, #tpu.memory_space<vmem>>, vector<64x144xbf16>
    %c0_4 = arith.constant 0 : index
    %c0_5 = arith.constant 0 : index
    %5 = vector.load %arg3[%c0_4, %c0_5] : memref<144x1280xbf16, #tpu.memory_space<vmem>>, vector<144x1280xbf16>
    %cst = arith.constant dense<0.000000e+00> : vector<64x1280xf32>
    %6 = tpu.matmul %4, %5, %cst {dimension_numbers = #tpu.dot_dimension_numbers<[1], [0], [0], [1], [0, 0, 1, 1], [], []>} : vector<64x144xbf16>, vector<144x1280xbf16>, vector<64x1280xf32> -> vector<64x1280xf32>
    %7 = arith.addf %3, %6 : vector<64x1280xf32>
    %c0_6 = arith.constant 0 : index
    %c0_7 = arith.constant 0 : index
    %8 = vector.load %arg6[%c0_6, %c0_7] : memref<64x1280xf32, #tpu.memory_space<vmem>>, vector<64x1280xf32>
    tpu.vector_store %arg6[%c0_6, %c0_7], %7 {strides = array<i32>} : memref<64x1280xf32, #tpu.memory_space<vmem>>, vector<64x1280xf32>,
    %c0_i32_8 = arith.constant 0 : i32
    %9 = arith.cmpi eq, %arg1, %c0_i32_8 : i32
    %10 = arith.extui %9 : i1 to i32
    %c0_i32_9 = arith.constant 0 : i32
    %11 = arith.cmpi ne, %10, %c0_i32_9 : i32
    scf.if %11 {
      %c0_10 = arith.constant 0 : index
      %c0_11 = arith.constant 0 : index
      %12 = vector.load %arg6[%c0_10, %c0_11] : memref<64x1280xf32, #tpu.memory_space<vmem>>, vector<64x1280xf32>
      %c0_12 = arith.constant 0 : index
      %c0_13 = arith.constant 0 : index
      %13 = vector.load %arg4[%c0_12, %c0_13] : memref<64x1xf32, #tpu.memory_space<vmem>>, vector<64x1xf32>
      %14 = vector.broadcast %13 : vector<64x1xf32> to vector<64x1280xf32>
      %15 = arith.addf %12, %14 : vector<64x1280xf32>
      %16 = arith.truncf %15 : vector<64x1280xf32> to vector<64x1280xbf16>
      %c0_14 = arith.constant 0 : index
      %c0_15 = arith.constant 0 : index
      %17 = vector.load %arg5[%c0_14, %c0_15] : memref<64x1280xbf16, #tpu.memory_space<vmem>>, vector<64x1280xbf16>
      tpu.vector_store %arg5[%c0_14, %c0_15], %16 {strides = array<i32>} : memref<64x1280xbf16, #tpu.memory_space<vmem>>, vector<64x1280xbf16>,
    } else {
    }
    return
  }
  func.func @transform_0(%arg0: i32, %arg1: i32) -> (i32, i32) {
    %c0_i32 = arith.constant 0 : i32
    %c0_i32_0 = arith.constant 0 : i32
    return %c0_i32, %arg1 : i32, i32
  }
  func.func @transform_1(%arg0: i32, %arg1: i32) -> (i32, i32) {
    %c0_i32 = arith.constant 0 : i32
    return %arg1, %arg0 : i32, i32
  }
  func.func @transform_2(%arg0: i32, %arg1: i32) -> (i32, i32) {
    %c0_i32 = arith.constant 0 : i32
    %c0_i32_0 = arith.constant 0 : i32
    %c0_i32_1 = arith.constant 0 : i32
    return %c0_i32, %c0_i32_0 : i32, i32
  }
  func.func @transform_3(%arg0: i32, %arg1: i32) -> (i32, i32) {
    %c0_i32 = arith.constant 0 : i32
    %c0_i32_0 = arith.constant 0 : i32
    return %c0_i32, %arg0 : i32, i32
  }
}

module attributes {stable_mosaic.version = 11 : i64} {
  func.func @_gemm_bias_kernel(%arg0: i32, %arg1: i32, %arg2: memref<64x576xbf16, #tpu.memory_space<vmem>>, %arg3: memref<576x320xbf16, #tpu.memory_space<vmem>>, %arg4: memref<64x1xf32, #tpu.memory_space<vmem>>, %arg5: memref<64x320xbf16, #tpu.memory_space<vmem>>, %arg6: memref<64x320xf32, #tpu.memory_space<vmem>>) attributes {dimension_semantics = [#tpu.dimension_semantics<parallel>, #tpu.dimension_semantics<arbitrary>], iteration_bounds = array<i64: 1, 1>, scalar_prefetch = 0 : i64, scratch_operands = 1 : i64, tpu.core_type = #tpu.core_type<tc>, window_params = [{transform_indices = @transform_0, window_bounds = array<i64: 64, 576>}, {transform_indices = @transform_1, window_bounds = array<i64: 576, 320>}, {pipeline_mode = #tpu.pipeline_mode<synchronous>, transform_indices = @transform_2, window_bounds = array<i64: 64, 1>}, {transform_indices = @transform_3, window_bounds = array<i64: 64, 320>}]} {
    %c0_i32 = arith.constant 0 : i32
    %0 = arith.cmpi eq, %arg1, %c0_i32 : i32
    %1 = arith.extui %0 : i1 to i32
    %c0_i32_0 = arith.constant 0 : i32
    %2 = arith.cmpi ne, %1, %c0_i32_0 : i32
    scf.if %2 {
      %cst_10 = arith.constant 0.000000e+00 : f32
      %12 = vector.broadcast %cst_10 : f32 to vector<64x320xf32>
      %c0_11 = arith.constant 0 : index
      %c0_12 = arith.constant 0 : index
      %13 = vector.load %arg6[%c0_11, %c0_12] : memref<64x320xf32, #tpu.memory_space<vmem>>, vector<64x320xf32>
      tpu.vector_store %arg6[%c0_11, %c0_12], %12 {strides = array<i32>} : memref<64x320xf32, #tpu.memory_space<vmem>>, vector<64x320xf32>,
    } else {
    }
    %c0 = arith.constant 0 : index
    %c0_1 = arith.constant 0 : index
    %3 = vector.load %arg6[%c0, %c0_1] : memref<64x320xf32, #tpu.memory_space<vmem>>, vector<64x320xf32>
    %c0_2 = arith.constant 0 : index
    %c0_3 = arith.constant 0 : index
    %4 = vector.load %arg2[%c0_2, %c0_3] : memref<64x576xbf16, #tpu.memory_space<vmem>>, vector<64x576xbf16>
    %c0_4 = arith.constant 0 : index
    %c0_5 = arith.constant 0 : index
    %5 = vector.load %arg3[%c0_4, %c0_5] : memref<576x320xbf16, #tpu.memory_space<vmem>>, vector<576x320xbf16>
    %cst = arith.constant dense<0.000000e+00> : vector<64x320xf32>
    %6 = tpu.matmul %4, %5, %cst {dimension_numbers = #tpu.dot_dimension_numbers<[1], [0], [0], [1], [0, 0, 1, 1], [], []>} : vector<64x576xbf16>, vector<576x320xbf16>, vector<64x320xf32> -> vector<64x320xf32>
    %7 = arith.addf %3, %6 : vector<64x320xf32>
    %c0_6 = arith.constant 0 : index
    %c0_7 = arith.constant 0 : index
    %8 = vector.load %arg6[%c0_6, %c0_7] : memref<64x320xf32, #tpu.memory_space<vmem>>, vector<64x320xf32>
    tpu.vector_store %arg6[%c0_6, %c0_7], %7 {strides = array<i32>} : memref<64x320xf32, #tpu.memory_space<vmem>>, vector<64x320xf32>,
    %c0_i32_8 = arith.constant 0 : i32
    %9 = arith.cmpi eq, %arg1, %c0_i32_8 : i32
    %10 = arith.extui %9 : i1 to i32
    %c0_i32_9 = arith.constant 0 : i32
    %11 = arith.cmpi ne, %10, %c0_i32_9 : i32
    scf.if %11 {
      %c0_10 = arith.constant 0 : index
      %c0_11 = arith.constant 0 : index
      %12 = vector.load %arg6[%c0_10, %c0_11] : memref<64x320xf32, #tpu.memory_space<vmem>>, vector<64x320xf32>
      %c0_12 = arith.constant 0 : index
      %c0_13 = arith.constant 0 : index
      %13 = vector.load %arg4[%c0_12, %c0_13] : memref<64x1xf32, #tpu.memory_space<vmem>>, vector<64x1xf32>
      %14 = vector.broadcast %13 : vector<64x1xf32> to vector<64x320xf32>
      %15 = arith.addf %12, %14 : vector<64x320xf32>
      %16 = arith.truncf %15 : vector<64x320xf32> to vector<64x320xbf16>
      %c0_14 = arith.constant 0 : index
      %c0_15 = arith.constant 0 : index
      %17 = vector.load %arg5[%c0_14, %c0_15] : memref<64x320xbf16, #tpu.memory_space<vmem>>, vector<64x320xbf16>
      tpu.vector_store %arg5[%c0_14, %c0_15], %16 {strides = array<i32>} : memref<64x320xbf16, #tpu.memory_space<vmem>>, vector<64x320xbf16>,
    } else {
    }
    return
  }
  func.func @transform_0(%arg0: i32, %arg1: i32) -> (i32, i32) {
    %c0_i32 = arith.constant 0 : i32
    %c0_i32_0 = arith.constant 0 : i32
    return %c0_i32, %arg1 : i32, i32
  }
  func.func @transform_1(%arg0: i32, %arg1: i32) -> (i32, i32) {
    %c0_i32 = arith.constant 0 : i32
    return %arg1, %arg0 : i32, i32
  }
  func.func @transform_2(%arg0: i32, %arg1: i32) -> (i32, i32) {
    %c0_i32 = arith.constant 0 : i32
    %c0_i32_0 = arith.constant 0 : i32
    %c0_i32_1 = arith.constant 0 : i32
    return %c0_i32, %c0_i32_0 : i32, i32
  }
  func.func @transform_3(%arg0: i32, %arg1: i32) -> (i32, i32) {
    %c0_i32 = arith.constant 0 : i32
    %c0_i32_0 = arith.constant 0 : i32
    return %c0_i32, %arg0 : i32, i32
  }
}

module attributes {stable_mosaic.version = 11 : i64} {
  func.func @_gemm_bias_kernel(%arg0: i32, %arg1: i32, %arg2: memref<6x10240xbf16, #tpu.memory_space<vmem>>, %arg3: memref<10240x2xbf16, #tpu.memory_space<vmem>>, %arg4: memref<6x1xf32, #tpu.memory_space<vmem>>, %arg5: memref<6x2xf32, #tpu.memory_space<vmem>>, %arg6: memref<6x2xf32, #tpu.memory_space<vmem>>) attributes {dimension_semantics = [#tpu.dimension_semantics<parallel>, #tpu.dimension_semantics<arbitrary>], iteration_bounds = array<i64: 1, 1>, scalar_prefetch = 0 : i64, scratch_operands = 1 : i64, tpu.core_type = #tpu.core_type<tc>, window_params = [{transform_indices = @transform_0, window_bounds = array<i64: 6, 10240>}, {transform_indices = @transform_1, window_bounds = array<i64: 10240, 2>}, {pipeline_mode = #tpu.pipeline_mode<synchronous>, transform_indices = @transform_2, window_bounds = array<i64: 6, 1>}, {transform_indices = @transform_3, window_bounds = array<i64: 6, 2>}]} {
    %c0_i32 = arith.constant 0 : i32
    %0 = arith.cmpi eq, %arg1, %c0_i32 : i32
    %1 = arith.extui %0 : i1 to i32
    %c0_i32_0 = arith.constant 0 : i32
    %2 = arith.cmpi ne, %1, %c0_i32_0 : i32
    scf.if %2 {
      %cst_10 = arith.constant 0.000000e+00 : f32
      %12 = vector.broadcast %cst_10 : f32 to vector<6x2xf32>
      %c0_11 = arith.constant 0 : index
      %c0_12 = arith.constant 0 : index
      %13 = vector.load %arg6[%c0_11, %c0_12] : memref<6x2xf32, #tpu.memory_space<vmem>>, vector<6x2xf32>
      tpu.vector_store %arg6[%c0_11, %c0_12], %12 {strides = array<i32>} : memref<6x2xf32, #tpu.memory_space<vmem>>, vector<6x2xf32>,
    } else {
    }
    %c0 = arith.constant 0 : index
    %c0_1 = arith.constant 0 : index
    %3 = vector.load %arg6[%c0, %c0_1] : memref<6x2xf32, #tpu.memory_space<vmem>>, vector<6x2xf32>
    %c0_2 = arith.constant 0 : index
    %c0_3 = arith.constant 0 : index
    %4 = vector.load %arg2[%c0_2, %c0_3] : memref<6x10240xbf16, #tpu.memory_space<vmem>>, vector<6x10240xbf16>
    %c0_4 = arith.constant 0 : index
    %c0_5 = arith.constant 0 : index
    %5 = vector.load %arg3[%c0_4, %c0_5] : memref<10240x2xbf16, #tpu.memory_space<vmem>>, vector<10240x2xbf16>
    %cst = arith.constant dense<0.000000e+00> : vector<6x2xf32>
    %6 = tpu.matmul %4, %5, %cst {dimension_numbers = #tpu.dot_dimension_numbers<[1], [0], [0], [1], [0, 0, 1, 1], [], []>} : vector<6x10240xbf16>, vector<10240x2xbf16>, vector<6x2xf32> -> vector<6x2xf32>
    %7 = arith.addf %3, %6 : vector<6x2xf32>
    %c0_6 = arith.constant 0 : index
    %c0_7 = arith.constant 0 : index
    %8 = vector.load %arg6[%c0_6, %c0_7] : memref<6x2xf32, #tpu.memory_space<vmem>>, vector<6x2xf32>
    tpu.vector_store %arg6[%c0_6, %c0_7], %7 {strides = array<i32>} : memref<6x2xf32, #tpu.memory_space<vmem>>, vector<6x2xf32>,
    %c0_i32_8 = arith.constant 0 : i32
    %9 = arith.cmpi eq, %arg1, %c0_i32_8 : i32
    %10 = arith.extui %9 : i1 to i32
    %c0_i32_9 = arith.constant 0 : i32
    %11 = arith.cmpi ne, %10, %c0_i32_9 : i32
    scf.if %11 {
      %c0_10 = arith.constant 0 : index
      %c0_11 = arith.constant 0 : index
      %12 = vector.load %arg6[%c0_10, %c0_11] : memref<6x2xf32, #tpu.memory_space<vmem>>, vector<6x2xf32>
      %c0_12 = arith.constant 0 : index
      %c0_13 = arith.constant 0 : index
      %13 = vector.load %arg4[%c0_12, %c0_13] : memref<6x1xf32, #tpu.memory_space<vmem>>, vector<6x1xf32>
      %14 = vector.broadcast %13 : vector<6x1xf32> to vector<6x2xf32>
      %15 = arith.addf %12, %14 : vector<6x2xf32>
      %c0_14 = arith.constant 0 : index
      %c0_15 = arith.constant 0 : index
      %16 = vector.load %arg5[%c0_14, %c0_15] : memref<6x2xf32, #tpu.memory_space<vmem>>, vector<6x2xf32>
      tpu.vector_store %arg5[%c0_14, %c0_15], %15 {strides = array<i32>} : memref<6x2xf32, #tpu.memory_space<vmem>>, vector<6x2xf32>,
    } else {
    }
    return
  }
  func.func @transform_0(%arg0: i32, %arg1: i32) -> (i32, i32) {
    %c0_i32 = arith.constant 0 : i32
    %c0_i32_0 = arith.constant 0 : i32
    return %c0_i32, %arg1 : i32, i32
  }
  func.func @transform_1(%arg0: i32, %arg1: i32) -> (i32, i32) {
    %c0_i32 = arith.constant 0 : i32
    return %arg1, %arg0 : i32, i32
  }
  func.func @transform_2(%arg0: i32, %arg1: i32) -> (i32, i32) {
    %c0_i32 = arith.constant 0 : i32
    %c0_i32_0 = arith.constant 0 : i32
    %c0_i32_1 = arith.constant 0 : i32
    return %c0_i32, %c0_i32_0 : i32, i32
  }
  func.func @transform_3(%arg0: i32, %arg1: i32) -> (i32, i32) {
    %c0_i32 = arith.constant 0 : i32
    %c0_i32_0 = arith.constant 0 : i32
    return %c0_i32, %arg0 : i32, i32
  }
}

</mosaic_0001>

<bundles_post_ra>
// kernel: aggregation_forward.3
= control target key start
LH: loop header
LB: loop body
LE: loop exit
PB: predicated region body
PF: predicated region fallthrough
CT: control target
= control target key end

     0   :  { %v2162_v1 = vmov 0   ;;  %vm763_vm0 = vcmask 130048   ;;  %s2793_s1 = inlined_call_operand.vmem [shape: bf16[144,1280], index: 1, kind: input, shape index: {}]   ;;  %s2794_s0 = inlined_call_operand.vmem [shape: bf16[64,144], index: 0, kind: input, shape index: {}]   ;;  %s2795_s2 = inlined_call_operand.vmem [shape: f32[64,1], index: 2, kind: input, shape index: {}]   ;;  %s2796_s3 = inlined_call_operand.vmem [shape: bf16[64,1280], index: 3, kind: output, shape index: {}]  }
   0x1   :  { %v2015_v0 = vld [vmem:[%s2793_s1 + $0x4] ss:$40 sps:$4 sm:$0xff]   ;;  %2013 = vset.pattern.permute.xlu0 %v2162_v1  ;;  %2014 = vset.pattern.permute.xlu1 %v2162_v1  ;;  %v2019_v3 = vld [vmem:[%s2793_s1] ss:$40 sps:$4 sm:$0xff]   ;;  %v2021_v5 = vld [vmem:[%s2793_s1 + $0x54] ss:$40 sps:$4 sm:$0xff]  }
   0x2   :  { %v2017_v2 = vld [vmem:[%s2793_s1 + $0xc] ss:$40 sps:$4 sm:$0xff]   ;;  %776 = vmatprep.subr.bf16.mxu0 %v2015_v0  ;;  %v2020_v4 = vld [vmem:[%s2793_s1 + $0x8] ss:$40 sps:$4 sm:$0xff]   ;;  %v2023_v6 = vld [vmem:[%s2793_s1 + $0x5c] ss:$40 sps:$4 sm:$0xff]  }
   0x3   :  { %849 = vmatprep.subr.bf16.mxu1 %v2017_v2  ;;  %777 = vmatpush1.bf16.msra.mxu0 %v2019_v3  ;;  %v2025_v7 = vld [vmem:[%s2793_s1 + $0x50] ss:$40 sps:$4 sm:$0xff]   ;;  %v2027_v9 = vld [vmem:[%s2793_s1 + $0xa4] ss:$40 sps:$4 sm:$0xff]   ;;  %v2031_v11 = vld [vmem:[%s2793_s1 + $0xa0] ss:$40 sps:$4 sm:$0xff]  }
   0x4   :  { %850 = vmatpush1.bf16.msra.mxu1 %v2020_v4  ;;  %778 = vmatprep.subr.bf16.mxu0 %v2021_v5  ;;  %v2026_v8 = vld [vmem:[%s2793_s1 + $0x58] ss:$40 sps:$4 sm:$0xff]   ;;  %v2029_v10 = vld [vmem:[%s2793_s1 + $0xac] ss:$40 sps:$4 sm:$0xff]   ;;  %v2032_v12 = vld [vmem:[%s2793_s1 + $0xa8] ss:$40 sps:$4 sm:$0xff]  }
   0x5   :  { %851 = vmatprep.subr.bf16.mxu1 %v2023_v6  ;;  %v2033_v13 = vld [vmem:[%s2793_s1 + $0xf4] ss:$40 sps:$4 sm:$0xff]   ;;  %v2037_v15 = vld [vmem:[%s2793_s1 + $0xf0] ss:$40 sps:$4 sm:$0xff]   ;;  %v2039_v17 = vld [vmem:[%s2793_s1 + $0x144] ss:$40 sps:$4 sm:$0xff]  }
   0x6   :  { %v2035_v14 = vld [vmem:[%s2793_s1 + $0xfc] ss:$40 sps:$4 sm:$0xff]   ;;  %v2038_v16 = vld [vmem:[%s2793_s1 + $0xf8] ss:$40 sps:$4 sm:$0xff]   ;;  %v2041_v18 = vld [vmem:[%s2793_s1 + $0x14c] ss:$40 sps:$4 sm:$0xff]  }
   0x7   :  { %779 = vmatpush1.bf16.msra.mxu0 %v2025_v7  ;;  %v2043_v19 = vld [vmem:[%s2793_s1 + $0x140] ss:$40 sps:$4 sm:$0xff]   ;;  %v2045_v21 = vld [vmem:[%s2793_s1 + $0x194] ss:$40 sps:$4 sm:$0xff]   ;;  %v2049_v23 = vld [vmem:[%s2793_s1 + $0x190] ss:$40 sps:$4 sm:$0xff]  }
   0x8   :  { %852 = vmatpush1.bf16.msra.mxu1 %v2026_v8  ;;  %780 = vmatprep.subr.bf16.mxu0 %v2027_v9  ;;  %v2044_v20 = vld [vmem:[%s2793_s1 + $0x148] ss:$40 sps:$4 sm:$0xff]   ;;  %v2047_v22 = vld [vmem:[%s2793_s1 + $0x19c] ss:$40 sps:$4 sm:$0xff]   ;;  %v2050_v24 = vld [vmem:[%s2793_s1 + $0x198] ss:$40 sps:$4 sm:$0xff]  }
   0x9   :  { %853 = vmatprep.subr.bf16.mxu1 %v2029_v10  ;;  %v2051_v25 = vld [vmem:[%s2793_s1 + $0x1e4] ss:$40 sps:$4 sm:$0xff]   ;;  %v2055_v27 = vld [vmem:[%s2793_s1 + $0x1e0] ss:$40 sps:$4 sm:$0xff]   ;;  %v2057_v29 = vld [vmem:[%s2793_s1 + $0x234] ss:$40 sps:$4 sm:$0xff]  }
   0xa   :  { %v2053_v26 = vld [vmem:[%s2793_s1 + $0x1ec] ss:$40 sps:$4 sm:$0xff]   ;;  %v2056_v28 = vld [vmem:[%s2793_s1 + $0x1e8] ss:$40 sps:$4 sm:$0xff]   ;;  %v2059_v31 = vld [vmem:[%s2793_s1 + $0x23c] ss:$40 sps:$4 sm:$0xff]  }
   0xb   :  { %781 = vmatpush1.bf16.msra.mxu0 %v2031_v11  ;;  %v2273_v30 = vld [vmem:[%s2794_s0 + $0x4] ss:$8 sps:$4 sm:$0xff]   ;;  %v2061_v32 = vld [vmem:[%s2793_s1 + $0x230] ss:$40 sps:$4 sm:$0xff]   ;;  %v2067_v36 = vld [vmem:[%s2793_s1 + $0x280] ss:$40 sps:$4 sm:$0xff]  }
   0xc   :  { %854 = vmatpush1.bf16.msra.mxu1 %v2032_v12  ;;  %782 = vmatprep.subr.bf16.mxu0 %v2033_v13  ;;  %v2062_v33 = vld [vmem:[%s2793_s1 + $0x238] ss:$40 sps:$4 sm:$0xff]   ;;  %v2063_v34 = vld [vmem:[%s2793_s1 + $0x284] ss:$40 sps:$4 sm:$0xff]   ;;  %v2068_v37 = vld [vmem:[%s2793_s1 + $0x288] ss:$40 sps:$4 sm:$0xff]  }
   0xd   :  { %855 = vmatprep.subr.bf16.mxu1 %v2035_v14  ;;  %1894 = vmatprep.mubr.msk.bf16.mxu0 %vm763_vm0, %v2273_v30  ;;  %v2065_v35 = vld [vmem:[%s2793_s1 + $0x28c] ss:$40 sps:$4 sm:$0xff]   ;;  %v2077_v39 = vld [vmem:[%s2793_s1 + $0x1c] ss:$40 sps:$4 sm:$0xff]   ;;  %v2309_v40 = vld [vmem:[%s2794_s0] ss:$8 sps:$4 sm:$0xff]  }
   0xe   :  { %1898 = vmatprep.mubr.msk.bf16.mxu1 %vm763_vm0, %v2273_v30  ;;  %v2074_v38 = vld [vmem:[%s2793_s1 + $0x14] ss:$40 sps:$4 sm:$0xff]   ;;  %v2072_v41 = vld [vmem:[%s2793_s1 + $0x10] ss:$40 sps:$4 sm:$0xff]   ;;  %v2080_v43 = vld [vmem:[%s2793_s1 + $0x64] ss:$40 sps:$4 sm:$0xff]  }
   0xf   :  { %783 = vmatpush1.bf16.msra.mxu0 %v2037_v15  ;;  %v2075_v42 = vld [vmem:[%s2793_s1 + $0x18] ss:$40 sps:$4 sm:$0xff]   ;;  %v2083_v44 = vld [vmem:[%s2793_s1 + $0x6c] ss:$40 sps:$4 sm:$0xff]   ;;  %v2081_v47 = vld [vmem:[%s2793_s1 + $0x68] ss:$40 sps:$4 sm:$0xff]  }
  0x10   :  { %856 = vmatpush1.bf16.msra.mxu1 %v2038_v16  ;;  %784 = vmatprep.subr.bf16.mxu0 %v2039_v17  ;;  %v2326_v45 = vld [vmem:[%s2794_s0 + $0x14] ss:$8 sps:$4 sm:$0xff]   ;;  %v2078_v46 = vld [vmem:[%s2793_s1 + $0x60] ss:$40 sps:$4 sm:$0xff]   ;;  %v2084_v50 = vld [vmem:[%s2793_s1 + $0xb0] ss:$40 sps:$4 sm:$0xff]  }
  0x11   :  { %857 = vmatprep.subr.bf16.mxu1 %v2041_v18  ;;  %v2086_v48 = vld [vmem:[%s2793_s1 + $0xb4] ss:$40 sps:$4 sm:$0xff]   ;;  %v2087_v51 = vld [vmem:[%s2793_s1 + $0xb8] ss:$40 sps:$4 sm:$0xff]   ;;  %v2095_v53 = vld [vmem:[%s2793_s1 + $0x104] ss:$40 sps:$4 sm:$0xff]  }
  0x12   :  { %v2089_v49 = vld [vmem:[%s2793_s1 + $0xbc] ss:$40 sps:$4 sm:$0xff]   ;;  %v2355_v52 = vld [vmem:[%s2794_s0 + $0x10] ss:$8 sps:$4 sm:$0xff]   ;;  %v2098_v54 = vld [vmem:[%s2793_s1 + $0x10c] ss:$40 sps:$4 sm:$0xff]  }
  0x13   :  { %785 = vmatpush1.bf16.msra.mxu0 %v2043_v19  ;;  %v2366_v55 = vld [vmem:[%s2794_s0 + $0x24] ss:$8 sps:$4 sm:$0xff]   ;;  %v2093_v56 = vld [vmem:[%s2793_s1 + $0x100] ss:$40 sps:$4 sm:$0xff]   ;;  %v2101_v58 = vld [vmem:[%s2793_s1 + $0x154] ss:$40 sps:$4 sm:$0xff]  }
  0x14   :  { %858 = vmatpush1.bf16.msra.mxu1 %v2044_v20  ;;  %786 = vmatprep.subr.bf16.mxu0 %v2045_v21  ;;  %v2096_v57 = vld [vmem:[%s2793_s1 + $0x108] ss:$40 sps:$4 sm:$0xff]   ;;  %v2104_v59 = vld [vmem:[%s2793_s1 + $0x15c] ss:$40 sps:$4 sm:$0xff]   ;;  %v2102_v61 = vld [vmem:[%s2793_s1 + $0x158] ss:$40 sps:$4 sm:$0xff]  }
  0x15   :  { %859 = vmatprep.subr.bf16.mxu1 %v2047_v22  ;;  %v2099_v60 = vld [vmem:[%s2793_s1 + $0x150] ss:$40 sps:$4 sm:$0xff]   ;;  %v2395_v62 = vld [vmem:[%s2794_s0 + $0x20] ss:$8 sps:$4 sm:$0xff]   ;;  %v2110_v63 = vld [vmem:[%s2793_s1 + $0x1a4] ss:$40 sps:$4 sm:$0xff]  }
  0x16   :  { %v2113_v0 = vld [vmem:[%s2793_s1 + $0x1ac] ss:$40 sps:$4 sm:$0xff]   ;;  %v2108_v2 = vld [vmem:[%s2793_s1 + $0x1a0] ss:$40 sps:$4 sm:$0xff]   ;;  %v2119_v5 = vld [vmem:[%s2793_s1 + $0x1fc] ss:$40 sps:$4 sm:$0xff]  }
  0x17   :  { %787 = vmatpush1.bf16.msra.mxu0 %v2049_v23  ;;  %v2406_v1 = vld [vmem:[%s2794_s0 + $0x34] ss:$8 sps:$4 sm:$0xff]   ;;  %v2111_v3 = vld [vmem:[%s2793_s1 + $0x1a8] ss:$40 sps:$4 sm:$0xff]   ;;  %v2117_v7 = vld [vmem:[%s2793_s1 + $0x1f8] ss:$40 sps:$4 sm:$0xff]  }
  0x18   :  { %860 = vmatpush1.bf16.msra.mxu1 %v2050_v24  ;;  %788 = vmatprep.subr.bf16.mxu0 %v2051_v25  ;;  %v2116_v4 = vld [vmem:[%s2793_s1 + $0x1f4] ss:$40 sps:$4 sm:$0xff]   ;;  %v2114_v6 = vld [vmem:[%s2793_s1 + $0x1f0] ss:$40 sps:$4 sm:$0xff]   ;;  %v2125_v9 = vld [vmem:[%s2793_s1 + $0x244] ss:$40 sps:$4 sm:$0xff]  }
  0x19   :  { %861 = vmatprep.subr.bf16.mxu1 %v2053_v26  ;;  %v2435_v8 = vld [vmem:[%s2794_s0 + $0x30] ss:$8 sps:$4 sm:$0xff]   ;;  %v2128_v10 = vld [vmem:[%s2793_s1 + $0x24c] ss:$40 sps:$4 sm:$0xff]   ;;  %v2123_v11 = vld [vmem:[%s2793_s1 + $0x240] ss:$40 sps:$4 sm:$0xff]  }
  0x1a   :  { %v2126_v12 = vld [vmem:[%s2793_s1 + $0x248] ss:$40 sps:$4 sm:$0xff]   ;;  %v2131_v13 = vld [vmem:[%s2793_s1 + $0x294] ss:$40 sps:$4 sm:$0xff]   ;;  %v1384_v15 = vld [vmem:[%s2795_s2] sm:$0xff] }
  0x1b   :  { %789 = vmatpush1.bf16.msra.mxu0 %v2055_v27  ;;  %v2134_v14 = vld [vmem:[%s2793_s1 + $0x29c] ss:$40 sps:$4 sm:$0xff]   ;;  %v1386_v16 = vld [vmem:[%s2795_s2 + $0x10] sm:$0xff]  ;;  %1394 = vperm.xlu0 %2013, %v1384_v15   ;;  %v2132_v18 = vld [vmem:[%s2793_s1 + $0x298] ss:$40 sps:$4 sm:$0xff]  }
  0x1c   :  { %862 = vmatpush1.bf16.msra.mxu1 %v2056_v28  ;;  %790 = vmatprep.subr.bf16.mxu0 %v2057_v29  ;;  %v2129_v17 = vld [vmem:[%s2793_s1 + $0x290] ss:$40 sps:$4 sm:$0xff]   ;;  %v1385_v19 = vld [vmem:[%s2795_s2 + $0x8] sm:$0xff]  ;;  %v2140_v23 = vld [vmem:[%s2793_s1 + $0x74] ss:$40 sps:$4 sm:$0xff]  }
  0x1d   :  { %863 = vmatprep.subr.bf16.mxu1 %v2059_v31  ;;  %1404 = vperm.xlu1 %2014, %v1386_v16   ;;  %v1387_v20 = vld [vmem:[%s2795_s2 + $0x18] sm:$0xff]  ;;  %v2137_v21 = vld [vmem:[%s2793_s1 + $0x24] ss:$40 sps:$4 sm:$0xff]   ;;  %v2135_v22 = vld [vmem:[%s2793_s1 + $0x20] ss:$40 sps:$4 sm:$0xff]  }
  0x1e   :  { %v2138_v24 = vld [vmem:[%s2793_s1 + $0x70] ss:$40 sps:$4 sm:$0xff]   ;;  %v1389_v25 = vld [vmem:[%s2795_s2 + $0x28] sm:$0xff]  ;;  %v1388_v26 = vld [vmem:[%s2795_s2 + $0x20] sm:$0xff] }
  0x1f   :  { %791 = vmatpush1.bf16.msra.mxu0 %v2061_v32  ;;  %1399 = vperm.xlu0 %2013, %v1385_v19   ;;  %v2143_v27 = vld [vmem:[%s2793_s1 + $0xc4] ss:$40 sps:$4 sm:$0xff]   ;;  %v2141_v28 = vld [vmem:[%s2793_s1 + $0xc0] ss:$40 sps:$4 sm:$0xff]   ;;  %v2146_v29 = vld [vmem:[%s2793_s1 + $0x114] ss:$40 sps:$4 sm:$0xff]  }
  0x20   :  { %864 = vmatpush1.bf16.msra.mxu1 %v2062_v33  ;;  %792 = vmatprep.subr.bf16.mxu0 %v2063_v34  ;;  %v2144_v31 = vld [vmem:[%s2793_s1 + $0x110] ss:$40 sps:$4 sm:$0xff]   ;;  %v2149_v34 = vld [vmem:[%s2793_s1 + $0x164] ss:$40 sps:$4 sm:$0xff]  }
  0x21   :  { %865 = vmatprep.subr.bf16.mxu1 %v2065_v35  ;;  %1409 = vperm.xlu1 %2014, %v1387_v20   ;;  %v1391_v32 = vld [vmem:[%s2795_s2 + $0x38] sm:$0xff]  ;;  %v1390_v33 = vld [vmem:[%s2795_s2 + $0x30] sm:$0xff]  ;;  %v2147_v35 = vld [vmem:[%s2793_s1 + $0x160] ss:$40 sps:$4 sm:$0xff]  }
  0x23   :  { %793 = vmatpush1.bf16.msra.mxu0 %v2067_v36  ;;  %1414 = vperm.xlu0 %2013, %v1388_v26   ;;  %v2152_v36 = vld [vmem:[%s2793_s1 + $0x1b4] ss:$40 sps:$4 sm:$0xff]  }
  0x24   :  { %866 = vmatpush1.bf16.msra.mxu1 %v2068_v37  ;;  %922 = vmatprep.subr.bf16.mxu0 %v2074_v38  ;;  %v2150_v37 = vld [vmem:[%s2793_s1 + $0x1b0] ss:$40 sps:$4 sm:$0xff]   ;;  %v2155_v38 = vld [vmem:[%s2793_s1 + $0x204] ss:$40 sps:$4 sm:$0xff]  }
  0x25   :  { %995 = vmatprep.subr.bf16.mxu1 %v2077_v39  ;;  %1419 = vperm.xlu1 %2014, %v1389_v25   ;;  %v2153_v39 = vld [vmem:[%s2793_s1 + $0x200] ss:$40 sps:$4 sm:$0xff]  }
  0x26   :  { %809 = vmatmul.mubr.bf16.vlgmr.msra.gmra.mrb[0].mxu0 %v2309_v40 }
  0x27   :  { %882 = vmatmul.mubr.bf16.vlgmr.msra.gmra.mrb[0].mxu1 %v2309_v40  ;;  %923 = vmatpush1.bf16.msra.mxu0 %v2072_v41  ;;  %v2158_v41 = vld [vmem:[%s2793_s1 + $0x254] ss:$40 sps:$4 sm:$0xff]  }
  0x28   :  { %996 = vmatpush1.bf16.msra.mxu1 %v2075_v42  ;;  %924 = vmatprep.subr.bf16.mxu0 %v2080_v43  ;;  %v2156_v42 = vld [vmem:[%s2793_s1 + $0x250] ss:$40 sps:$4 sm:$0xff]   ;;  %v2161_v43 = vld [vmem:[%s2793_s1 + $0x2a4] ss:$40 sps:$4 sm:$0xff]  }
  0x29   :  { %997 = vmatprep.subr.bf16.mxu1 %v2083_v44  ;;  %1895 = vmatprep.mubr.msk.bf16.mxu0 %vm763_vm0, %v2326_v45  ;;  %v2159_v44 = vld [vmem:[%s2793_s1 + $0x2a0] ss:$40 sps:$4 sm:$0xff]  }
  0x2a   :  { %1899 = vmatprep.mubr.msk.bf16.mxu1 %vm763_vm0, %v2326_v45  ;;  %1429 = vperm.xlu1 %2014, %v1391_v32  }
  0x2b   :  { %925 = vmatpush1.bf16.msra.mxu0 %v2078_v46  ;;  %1424 = vperm.xlu0 %2013, %v1390_v33  }
  0x2c   :  { %998 = vmatpush1.bf16.msra.mxu1 %v2081_v47  ;;  %926 = vmatprep.subr.bf16.mxu0 %v2086_v48 }
  0x2d   :  { %999 = vmatprep.subr.bf16.mxu1 %v2089_v49 }
  0x2e   :  { %819 = vmatmul.mubr.bf16.gmra.mrb[4].mxu0 %v2355_v52 }
  0x2f   :  { %892 = vmatmul.mubr.bf16.gmra.mrb[4].mxu1 %v2355_v52  ;;  %927 = vmatpush1.bf16.msra.mxu0 %v2084_v50 }
  0x30   :  { %1000 = vmatpush1.bf16.msra.mxu1 %v2087_v51  ;;  %928 = vmatprep.subr.bf16.mxu0 %v2095_v53 }
  0x31   :  { %1001 = vmatprep.subr.bf16.mxu1 %v2098_v54  ;;  %1896 = vmatprep.mubr.msk.bf16.mxu0 %vm763_vm0, %v2366_v55 }
  0x32   :  { %1900 = vmatprep.mubr.msk.bf16.mxu1 %vm763_vm0, %v2366_v55 }
  0x33   :  { %929 = vmatpush1.bf16.msra.mxu0 %v2093_v56 }
  0x34   :  { %1002 = vmatpush1.bf16.msra.mxu1 %v2096_v57  ;;  %930 = vmatprep.subr.bf16.mxu0 %v2101_v58 }
  0x35   :  { %1003 = vmatprep.subr.bf16.mxu1 %v2104_v59 }
  0x36   :  { %829 = vmatmul.mubr.bf16.gmra.mrb[8].mxu0 %v2395_v62 }
  0x37   :  { %902 = vmatmul.mubr.bf16.gmra.mrb[8].mxu1 %v2395_v62  ;;  %931 = vmatpush1.bf16.msra.mxu0 %v2099_v60 }
  0x38   :  { %1004 = vmatpush1.bf16.msra.mxu1 %v2102_v61  ;;  %932 = vmatprep.subr.bf16.mxu0 %v2110_v63 }
  0x39   :  { %1005 = vmatprep.subr.bf16.mxu1 %v2113_v0  ;;  %1897 = vmatprep.mubr.msk.bf16.mxu0 %vm763_vm0, %v2406_v1 }
  0x3a   :  { %1901 = vmatprep.mubr.msk.bf16.mxu1 %vm763_vm0, %v2406_v1 }
  0x3b   :  { %933 = vmatpush1.bf16.msra.mxu0 %v2108_v2 }
  0x3c   :  { %1006 = vmatpush1.bf16.msra.mxu1 %v2111_v3  ;;  %934 = vmatprep.subr.bf16.mxu0 %v2116_v4 }
  0x3d   :  { %1007 = vmatprep.subr.bf16.mxu1 %v2119_v5 }
  0x3e   :  { %839 = vmatmul.mubr.bf16.gmra.mrb[12].mxu0 %v2435_v8 }
  0x3f   :  { %912 = vmatmul.mubr.bf16.gmra.mrb[12].mxu1 %v2435_v8  ;;  %935 = vmatpush1.bf16.msra.mxu0 %v2114_v6 }
  0x40   :  { %1008 = vmatpush1.bf16.msra.mxu1 %v2117_v7  ;;  %936 = vmatprep.subr.bf16.mxu0 %v2125_v9 }
  0x41   :  { %1009 = vmatprep.subr.bf16.mxu1 %v2128_v10  ;;  %1902 = vmatprep.mubr.msk.bf16.mxu0 %vm763_vm0, %v2273_v30 }
  0x42   :  { %1906 = vmatprep.mubr.msk.bf16.mxu1 %vm763_vm0, %v2273_v30 }
  0x43   :  { %937 = vmatpush1.bf16.msra.mxu0 %v2123_v11 }
  0x44   :  { %1010 = vmatpush1.bf16.msra.mxu1 %v2126_v12  ;;  %938 = vmatprep.subr.bf16.mxu0 %v2131_v13 }
  0x45   :  { %1011 = vmatprep.subr.bf16.mxu1 %v2134_v14 }
  0x47   :  { %939 = vmatpush1.bf16.msra.mxu0 %v2129_v17 }
  0x48   :  { %1012 = vmatpush1.bf16.msra.mxu1 %v2132_v18  ;;  %1068 = vmatprep.subr.bf16.mxu0 %v2137_v21 }
  0x49   :  { %1994 = vmatprep.subr.bf16.mxu1 %v2137_v21 }
  0x4a   :  { %955 = vmatmul.mubr.bf16.vlgmr.msra.gmra.mrb[16].mxu0 %v2309_v40 }
  0x4b   :  { %1028 = vmatmul.mubr.bf16.vlgmr.msra.gmra.mrb[16].mxu1 %v2309_v40  ;;  %1069 = vmatpush1.bf16.msra.mxu0 %v2135_v22 }
  0x4c   :  { %2003 = vmatpush1.bf16.msra.mxu1 %v2135_v22  ;;  %1070 = vmatprep.subr.bf16.mxu0 %v2140_v23 }
  0x4d   :  { %1995 = vmatprep.subr.bf16.mxu1 %v2140_v23  ;;  %1903 = vmatprep.mubr.msk.bf16.mxu0 %vm763_vm0, %v2326_v45 }
  0x4e   :  { %1907 = vmatprep.mubr.msk.bf16.mxu1 %vm763_vm0, %v2326_v45 }
  0x4f   :  { %1071 = vmatpush1.bf16.msra.mxu0 %v2138_v24 }
  0x50   :  { %2004 = vmatpush1.bf16.msra.mxu1 %v2138_v24  ;;  %1072 = vmatprep.subr.bf16.mxu0 %v2143_v27 }
  0x51   :  { %1996 = vmatprep.subr.bf16.mxu1 %v2143_v27 }
  0x52   :  { %965 = vmatmul.mubr.bf16.gmra.mrb[20].mxu0 %v2355_v52 }
  0x53   :  { %1038 = vmatmul.mubr.bf16.gmra.mrb[20].mxu1 %v2355_v52  ;;  %1073 = vmatpush1.bf16.msra.mxu0 %v2141_v28 }
  0x54   :  { %2005 = vmatpush1.bf16.msra.mxu1 %v2141_v28  ;;  %1074 = vmatprep.subr.bf16.mxu0 %v2146_v29 }
  0x55   :  { %1997 = vmatprep.subr.bf16.mxu1 %v2146_v29  ;;  %1904 = vmatprep.mubr.msk.bf16.mxu0 %vm763_vm0, %v2366_v55 }
  0x56   :  { %1908 = vmatprep.mubr.msk.bf16.mxu1 %vm763_vm0, %v2366_v55 }
  0x57   :  { %1075 = vmatpush1.bf16.msra.mxu0 %v2144_v31 }
  0x58   :  { %2006 = vmatpush1.bf16.msra.mxu1 %v2144_v31  ;;  %1076 = vmatprep.subr.bf16.mxu0 %v2149_v34 }
  0x59   :  { %1998 = vmatprep.subr.bf16.mxu1 %v2149_v34 }
  0x5a   :  { %975 = vmatmul.mubr.bf16.gmra.mrb[24].mxu0 %v2395_v62 }
  0x5b   :  { %1048 = vmatmul.mubr.bf16.gmra.mrb[24].mxu1 %v2395_v62  ;;  %1077 = vmatpush1.bf16.msra.mxu0 %v2147_v35 }
  0x5c   :  { %2007 = vmatpush1.bf16.msra.mxu1 %v2147_v35  ;;  %1078 = vmatprep.subr.bf16.mxu0 %v2152_v36 }
  0x5d   :  { %1999 = vmatprep.subr.bf16.mxu1 %v2152_v36  ;;  %1905 = vmatprep.mubr.msk.bf16.mxu0 %vm763_vm0, %v2406_v1 }
  0x5e   :  { %1909 = vmatprep.mubr.msk.bf16.mxu1 %vm763_vm0, %v2406_v1 }
  0x5f   :  { %1079 = vmatpush1.bf16.msra.mxu0 %v2150_v37 }
  0x60   :  { %2008 = vmatpush1.bf16.msra.mxu1 %v2150_v37  ;;  %1080 = vmatprep.subr.bf16.mxu0 %v2155_v38 }
  0x61   :  { %2000 = vmatprep.subr.bf16.mxu1 %v2155_v38 }
  0x62   :  { %985 = vmatmul.mubr.bf16.gmra.mrb[28].mxu0 %v2435_v8 }
  0x63   :  { %1058 = vmatmul.mubr.bf16.gmra.mrb[28].mxu1 %v2435_v8  ;;  %1081 = vmatpush1.bf16.msra.mxu0 %v2153_v39 }
  0x64   :  { %2009 = vmatpush1.bf16.msra.mxu1 %v2153_v39  ;;  %1082 = vmatprep.subr.bf16.mxu0 %v2158_v41 }
  0x65   :  { %2001 = vmatprep.subr.bf16.mxu1 %v2158_v41  ;;  %1910 = vmatprep.mubr.msk.bf16.mxu0 %vm763_vm0, %v2273_v30 }
  0x66   :  { %1912 = vmatprep.mubr.msk.bf16.mxu1 %vm763_vm0, %v2366_v55 }
  0x67   :  { %1083 = vmatpush1.bf16.msra.mxu0 %v2156_v42 }
  0x68   :  { %2010 = vmatpush1.bf16.msra.mxu1 %v2156_v42  ;;  %1084 = vmatprep.subr.bf16.mxu0 %v2161_v43 }
  0x69   :  { %2002 = vmatprep.subr.bf16.mxu1 %v2161_v43 }
  0x6b   :  { %1085 = vmatpush1.bf16.msra.mxu0 %v2159_v44 }
  0x6c   :  { %2011 = vmatpush1.bf16.msra.mxu1 %v2159_v44 }
  0x6e   :  { %1101 = vmatmul.mubr.bf16.vlgmr.msra.gmra.mrb[32].mxu0 %v2309_v40 }
  0x6f   :  { %1121 = vmatmul.mubr.bf16.vlgmr.msra.gmra.mrb[32].mxu1 %v2395_v62  ;;  %1911 = vmatprep.mubr.msk.bf16.mxu0 %vm763_vm0, %v2326_v45 }
  0x70   :  { %1913 = vmatprep.mubr.msk.bf16.mxu1 %vm763_vm0, %v2406_v1 }
  0x76   :  { %1111 = vmatmul.mubr.bf16.gmra.mrb[36].mxu0 %v2355_v52 }
  0x77   :  { %1131 = vmatmul.mubr.bf16.gmra.mrb[36].mxu1 %v2435_v8 }
  0x9a   :  { %v2577_v30 = vpop.permute.xlu0 %1394 }
  0x9c   :  { %v2581_v47 = vpop.permute.xlu1 %1404 }
  0x9e   :  { %v2579_v46 = vpop.permute.xlu0 %1399 }
  0xa0   :  { %v2597_v2 = vpop.permute.xlu1 %1409 }
  0xa2   :  { %v2619_v23 = vpop.permute.xlu0 %1414 }
  0xa4   :  { %v2621_v24 = vpop.permute.xlu1 %1419 }
  0xf9   :  { %v810_v48 = vpop.f32.mrb[0].mxu0 }
  0xfa   :  { %v883_v40 = vpop.f32.mrb[0].mxu1  ;;  %v1432_v49 = vadd.f32 %v2577_v30, %v810_v48  ;;  %v812_v45 = vpop.f32.mrb[1].mxu0 }
  0xfb   :  { %v1434_v50 = vadd.f32 %v2577_v30, %v883_v40  ;;  %v885_v51 = vpop.f32.mrb[1].mxu1  ;;  %v1433_v53 = vadd.f32 %v2577_v30, %v812_v45  ;;  %v814_v54 = vpop.f32.mrb[2].mxu0 }
  0xfc   :  { %v1435_v52 = vadd.f32 %v2577_v30, %v885_v51  ;;  %v887_v55 = vpop.f32.mrb[2].mxu1  ;;  %v1442_v56 = vadd.f32 %v2579_v46, %v814_v54  ;;  %v816_v58 = vpop.f32.mrb[3].mxu0 }
  0xfd   :  { %v1444_v57 = vadd.f32 %v2579_v46, %v887_v55  ;;  %v889_v59 = vpop.f32.mrb[3].mxu1  ;;  %v1954_v60 = vpack.c.bf16 %v1433_v53, %v1432_v49  ;;  %v1443_v62 = vadd.f32 %v2579_v46, %v816_v58  ;;  %v2643_v49 = vpop.permute.xlu0 %1424 }
  0xfe   :  { %v1955_v61 = vpack.c.bf16 %v1435_v52, %v1434_v50  ;;  %v1445_v63 = vadd.f32 %v2579_v46, %v889_v59  ;;  %v2645_v50 = vpop.permute.xlu1 %1429 }
  0xff   :  { %1752 = vst [vmem:[%s2796_s3] sm:$0xff] %v1954_v60  ;;  %v1959_v0 = vpack.c.bf16 %v1443_v62, %v1442_v56 }
 0x100   :  { %1753 = vst [vmem:[%s2796_s3 + $0x8] sm:$0xff] %v1955_v61  ;;  %v1960_v1 = vpack.c.bf16 %v1445_v63, %v1444_v57 }
 0x101   :  { %1757 = vst [vmem:[%s2796_s3 + $0x28] sm:$0xff] %v1959_v0  ;;  %v820_v3 = vpop.f32.mrb[4].mxu0 }
 0x102   :  { %1758 = vst [vmem:[%s2796_s3 + $0x30] sm:$0xff] %v1960_v1  ;;  %v893_v4 = vpop.f32.mrb[4].mxu1  ;;  %v1452_v5 = vadd.f32 %v2581_v47, %v820_v3  ;;  %v822_v7 = vpop.f32.mrb[5].mxu0 }
 0x103   :  { %v1454_v6 = vadd.f32 %v2581_v47, %v893_v4  ;;  %v895_v8 = vpop.f32.mrb[5].mxu1  ;;  %v1453_v9 = vadd.f32 %v2581_v47, %v822_v7  ;;  %v824_v11 = vpop.f32.mrb[6].mxu0 }
 0x104   :  { %v1455_v10 = vadd.f32 %v2581_v47, %v895_v8  ;;  %v897_v12 = vpop.f32.mrb[6].mxu1  ;;  %v826_v13 = vpop.f32.mrb[7].mxu0  ;;  %v1462_v14 = vadd.f32 %v2597_v2, %v824_v11 }
 0x105   :  { %v899_v15 = vpop.f32.mrb[7].mxu1  ;;  %v1464_v16 = vadd.f32 %v2597_v2, %v897_v12  ;;  %v1964_v17 = vpack.c.bf16 %v1453_v9, %v1452_v5  ;;  %v1463_v19 = vadd.f32 %v2597_v2, %v826_v13 }
 0x106   :  { %v1965_v18 = vpack.c.bf16 %v1455_v10, %v1454_v6  ;;  %v1465_v20 = vadd.f32 %v2597_v2, %v899_v15 }
 0x107   :  { %1762 = vst [vmem:[%s2796_s3 + $0x50] sm:$0xff] %v1964_v17  ;;  %v1969_v21 = vpack.c.bf16 %v1463_v19, %v1462_v14 }
 0x108   :  { %1763 = vst [vmem:[%s2796_s3 + $0x58] sm:$0xff] %v1965_v18  ;;  %v1970_v22 = vpack.c.bf16 %v1465_v20, %v1464_v16 }
 0x109   :  { %1767 = vst [vmem:[%s2796_s3 + $0x78] sm:$0xff] %v1969_v21  ;;  %v830_v25 = vpop.f32.mrb[8].mxu0 }
 0x10a   :  { %1768 = vst [vmem:[%s2796_s3 + $0x80] sm:$0xff] %v1970_v22  ;;  %v903_v26 = vpop.f32.mrb[8].mxu1  ;;  %v832_v27 = vpop.f32.mrb[9].mxu0  ;;  %v1472_v29 = vadd.f32 %v2619_v23, %v830_v25 }
 0x10b   :  { %v905_v28 = vpop.f32.mrb[9].mxu1  ;;  %v1474_v31 = vadd.f32 %v2619_v23, %v903_v26  ;;  %v834_v32 = vpop.f32.mrb[10].mxu0  ;;  %v1473_v34 = vadd.f32 %v2619_v23, %v832_v27 }
 0x10c   :  { %v907_v33 = vpop.f32.mrb[10].mxu1  ;;  %v1475_v35 = vadd.f32 %v2619_v23, %v905_v28  ;;  %v836_v36 = vpop.f32.mrb[11].mxu0  ;;  %v1482_v37 = vadd.f32 %v2621_v24, %v834_v32 }
 0x10d   :  { %v909_v38 = vpop.f32.mrb[11].mxu1  ;;  %v1484_v39 = vadd.f32 %v2621_v24, %v907_v33  ;;  %v1974_v41 = vpack.c.bf16 %v1473_v34, %v1472_v29  ;;  %v1483_v43 = vadd.f32 %v2621_v24, %v836_v36 }
 0x10e   :  { %v1975_v42 = vpack.c.bf16 %v1475_v35, %v1474_v31  ;;  %v1485_v44 = vadd.f32 %v2621_v24, %v909_v38 }
 0x10f   :  { %1772 = vst [vmem:[%s2796_s3 + $0xa0] sm:$0xff] %v1974_v41  ;;  %v1979_v48 = vpack.c.bf16 %v1483_v43, %v1482_v37 }
 0x110   :  { %1773 = vst [vmem:[%s2796_s3 + $0xa8] sm:$0xff] %v1975_v42  ;;  %v1980_v40 = vpack.c.bf16 %v1485_v44, %v1484_v39 }
 0x111   :  { %1777 = vst [vmem:[%s2796_s3 + $0xc8] sm:$0xff] %v1979_v48  ;;  %v840_v45 = vpop.f32.mrb[12].mxu0 }
 0x112   :  { %1778 = vst [vmem:[%s2796_s3 + $0xd0] sm:$0xff] %v1980_v40  ;;  %v913_v51 = vpop.f32.mrb[12].mxu1  ;;  %v842_v53 = vpop.f32.mrb[13].mxu0  ;;  %v1492_v54 = vadd.f32 %v2643_v49, %v840_v45 }
 0x113   :  { %v915_v52 = vpop.f32.mrb[13].mxu1  ;;  %v1494_v55 = vadd.f32 %v2643_v49, %v913_v51  ;;  %v844_v56 = vpop.f32.mrb[14].mxu0  ;;  %v1493_v58 = vadd.f32 %v2643_v49, %v842_v53 }
 0x114   :  { %v917_v57 = vpop.f32.mrb[14].mxu1  ;;  %v1495_v59 = vadd.f32 %v2643_v49, %v915_v52  ;;  %v846_v60 = vpop.f32.mrb[15].mxu0  ;;  %v1502_v61 = vadd.f32 %v2645_v50, %v844_v56 }
 0x115   :  { %v919_v62 = vpop.f32.mrb[15].mxu1  ;;  %v1504_v63 = vadd.f32 %v2645_v50, %v917_v57  ;;  %v1984_v0 = vpack.c.bf16 %v1493_v58, %v1492_v54  ;;  %v1503_v3 = vadd.f32 %v2645_v50, %v846_v60 }
 0x116   :  { %v1985_v1 = vpack.c.bf16 %v1495_v59, %v1494_v55  ;;  %v1505_v4 = vadd.f32 %v2645_v50, %v919_v62 }
 0x117   :  { %1782 = vst [vmem:[%s2796_s3 + $0xf0] sm:$0xff] %v1984_v0  ;;  %v1989_v5 = vpack.c.bf16 %v1503_v3, %v1502_v61 }
 0x118   :  { %1783 = vst [vmem:[%s2796_s3 + $0xf8] sm:$0xff] %v1985_v1  ;;  %v1990_v6 = vpack.c.bf16 %v1505_v4, %v1504_v63 }
 0x119   :  { %1787 = vst [vmem:[%s2796_s3 + $0x118] sm:$0xff] %v1989_v5 }
 0x11a   :  { %1788 = vst [vmem:[%s2796_s3 + $0x120] sm:$0xff] %v1990_v6 }
 0x11d   :  { %v956_v7 = vpop.f32.mrb[16].mxu0 }
 0x11e   :  { %v1029_v8 = vpop.f32.mrb[16].mxu1  ;;  %v1436_v9 = vadd.f32 %v2577_v30, %v956_v7  ;;  %v958_v11 = vpop.f32.mrb[17].mxu0 }
 0x11f   :  { %v1438_v10 = vadd.f32 %v2577_v30, %v1029_v8  ;;  %v1031_v12 = vpop.f32.mrb[17].mxu1  ;;  %v1437_v13 = vadd.f32 %v2577_v30, %v958_v11  ;;  %v960_v15 = vpop.f32.mrb[18].mxu0 }
 0x120   :  { %v1439_v14 = vadd.f32 %v2577_v30, %v1031_v12  ;;  %v1033_v16 = vpop.f32.mrb[18].mxu1  ;;  %v1446_v17 = vadd.f32 %v2579_v46, %v960_v15  ;;  %v962_v19 = vpop.f32.mrb[19].mxu0 }
 0x121   :  { %v1448_v18 = vadd.f32 %v2579_v46, %v1033_v16  ;;  %v1035_v20 = vpop.f32.mrb[19].mxu1  ;;  %v1956_v21 = vpack.c.bf16 %v1437_v13, %v1436_v9  ;;  %v1447_v25 = vadd.f32 %v2579_v46, %v962_v19 }
 0x122   :  { %v1957_v22 = vpack.c.bf16 %v1439_v14, %v1438_v10  ;;  %v1449_v26 = vadd.f32 %v2579_v46, %v1035_v20 }
 0x123   :  { %1754 = vst [vmem:[%s2796_s3 + $0x10] sm:$0xff] %v1956_v21  ;;  %v1961_v27 = vpack.c.bf16 %v1447_v25, %v1446_v17 }
 0x124   :  { %1755 = vst [vmem:[%s2796_s3 + $0x18] sm:$0xff] %v1957_v22  ;;  %v1962_v28 = vpack.c.bf16 %v1449_v26, %v1448_v18 }
 0x125   :  { %1759 = vst [vmem:[%s2796_s3 + $0x38] sm:$0xff] %v1961_v27  ;;  %v966_v29 = vpop.f32.mrb[20].mxu0 }
 0x126   :  { %1760 = vst [vmem:[%s2796_s3 + $0x40] sm:$0xff] %v1962_v28  ;;  %v1039_v31 = vpop.f32.mrb[20].mxu1  ;;  %v1456_v32 = vadd.f32 %v2581_v47, %v966_v29  ;;  %v968_v34 = vpop.f32.mrb[21].mxu0 }
 0x127   :  { %v1458_v33 = vadd.f32 %v2581_v47, %v1039_v31  ;;  %v1041_v35 = vpop.f32.mrb[21].mxu1  ;;  %v1457_v36 = vadd.f32 %v2581_v47, %v968_v34  ;;  %v970_v38 = vpop.f32.mrb[22].mxu0 }
 0x128   :  { %v1459_v37 = vadd.f32 %v2581_v47, %v1041_v35  ;;  %v1043_v39 = vpop.f32.mrb[22].mxu1  ;;  %v1466_v41 = vadd.f32 %v2597_v2, %v970_v38  ;;  %v972_v43 = vpop.f32.mrb[23].mxu0 }
 0x129   :  { %v1468_v42 = vadd.f32 %v2597_v2, %v1043_v39  ;;  %v1045_v44 = vpop.f32.mrb[23].mxu1  ;;  %v1966_v48 = vpack.c.bf16 %v1457_v36, %v1456_v32  ;;  %v1467_v45 = vadd.f32 %v2597_v2, %v972_v43 }
 0x12a   :  { %v1967_v40 = vpack.c.bf16 %v1459_v37, %v1458_v33  ;;  %v1469_v51 = vadd.f32 %v2597_v2, %v1045_v44 }
 0x12b   :  { %1764 = vst [vmem:[%s2796_s3 + $0x60] sm:$0xff] %v1966_v48  ;;  %v1971_v53 = vpack.c.bf16 %v1467_v45, %v1466_v41 }
 0x12c   :  { %1765 = vst [vmem:[%s2796_s3 + $0x68] sm:$0xff] %v1967_v40  ;;  %v1972_v52 = vpack.c.bf16 %v1469_v51, %v1468_v42 }
 0x12d   :  { %1769 = vst [vmem:[%s2796_s3 + $0x88] sm:$0xff] %v1971_v53  ;;  %v976_v54 = vpop.f32.mrb[24].mxu0 }
 0x12e   :  { %1770 = vst [vmem:[%s2796_s3 + $0x90] sm:$0xff] %v1972_v52  ;;  %v1049_v55 = vpop.f32.mrb[24].mxu1  ;;  %v1476_v56 = vadd.f32 %v2619_v23, %v976_v54  ;;  %v978_v58 = vpop.f32.mrb[25].mxu0 }
 0x12f   :  { %v1478_v57 = vadd.f32 %v2619_v23, %v1049_v55  ;;  %v1051_v59 = vpop.f32.mrb[25].mxu1  ;;  %v1477_v60 = vadd.f32 %v2619_v23, %v978_v58  ;;  %v980_v62 = vpop.f32.mrb[26].mxu0 }
 0x130   :  { %v1479_v61 = vadd.f32 %v2619_v23, %v1051_v59  ;;  %v1053_v63 = vpop.f32.mrb[26].mxu1  ;;  %v1486_v0 = vadd.f32 %v2621_v24, %v980_v62  ;;  %v982_v3 = vpop.f32.mrb[27].mxu0 }
 0x131   :  { %v1488_v1 = vadd.f32 %v2621_v24, %v1053_v63  ;;  %v1055_v4 = vpop.f32.mrb[27].mxu1  ;;  %v1976_v5 = vpack.c.bf16 %v1477_v60, %v1476_v56  ;;  %v1487_v7 = vadd.f32 %v2621_v24, %v982_v3 }
 0x132   :  { %v1977_v6 = vpack.c.bf16 %v1479_v61, %v1478_v57  ;;  %v1489_v8 = vadd.f32 %v2621_v24, %v1055_v4 }
 0x133   :  { %1774 = vst [vmem:[%s2796_s3 + $0xb0] sm:$0xff] %v1976_v5  ;;  %v1981_v9 = vpack.c.bf16 %v1487_v7, %v1486_v0 }
 0x134   :  { %1775 = vst [vmem:[%s2796_s3 + $0xb8] sm:$0xff] %v1977_v6  ;;  %v1982_v10 = vpack.c.bf16 %v1489_v8, %v1488_v1 }
 0x135   :  { %1779 = vst [vmem:[%s2796_s3 + $0xd8] sm:$0xff] %v1981_v9  ;;  %v986_v11 = vpop.f32.mrb[28].mxu0 }
 0x136   :  { %1780 = vst [vmem:[%s2796_s3 + $0xe0] sm:$0xff] %v1982_v10  ;;  %v1059_v12 = vpop.f32.mrb[28].mxu1  ;;  %v1496_v13 = vadd.f32 %v2643_v49, %v986_v11  ;;  %v988_v15 = vpop.f32.mrb[29].mxu0 }
 0x137   :  { %v1498_v14 = vadd.f32 %v2643_v49, %v1059_v12  ;;  %v1061_v16 = vpop.f32.mrb[29].mxu1  ;;  %v1497_v17 = vadd.f32 %v2643_v49, %v988_v15  ;;  %v990_v19 = vpop.f32.mrb[30].mxu0 }
 0x138   :  { %v1499_v18 = vadd.f32 %v2643_v49, %v1061_v16  ;;  %v1063_v20 = vpop.f32.mrb[30].mxu1  ;;  %v1506_v21 = vadd.f32 %v2645_v50, %v990_v19  ;;  %v992_v25 = vpop.f32.mrb[31].mxu0 }
 0x139   :  { %v1508_v22 = vadd.f32 %v2645_v50, %v1063_v20  ;;  %v1065_v26 = vpop.f32.mrb[31].mxu1  ;;  %v1986_v27 = vpack.c.bf16 %v1497_v17, %v1496_v13  ;;  %v1507_v29 = vadd.f32 %v2645_v50, %v992_v25 }
 0x13a   :  { %v1987_v28 = vpack.c.bf16 %v1499_v18, %v1498_v14  ;;  %v1509_v31 = vadd.f32 %v2645_v50, %v1065_v26 }
 0x13b   :  { %1784 = vst [vmem:[%s2796_s3 + $0x100] sm:$0xff] %v1986_v27  ;;  %v1991_v32 = vpack.c.bf16 %v1507_v29, %v1506_v21 }
 0x13c   :  { %1785 = vst [vmem:[%s2796_s3 + $0x108] sm:$0xff] %v1987_v28  ;;  %v1992_v33 = vpack.c.bf16 %v1509_v31, %v1508_v22 }
 0x13d   :  { %1789 = vst [vmem:[%s2796_s3 + $0x128] sm:$0xff] %v1991_v32 }
 0x13e   :  { %1790 = vst [vmem:[%s2796_s3 + $0x130] sm:$0xff] %v1992_v33 }
 0x141   :  { %v1102_v34 = vpop.f32.mrb[32].mxu0 }
 0x142   :  { %v1122_v35 = vpop.f32.mrb[32].mxu1  ;;  %v1440_v36 = vadd.f32 %v2577_v30, %v1102_v34  ;;  %v1104_v38 = vpop.f32.mrb[33].mxu0 }
 0x143   :  { %v1480_v37 = vadd.f32 %v2619_v23, %v1122_v35  ;;  %v1124_v39 = vpop.f32.mrb[33].mxu1  ;;  %v1441_v41 = vadd.f32 %v2577_v30, %v1104_v38  ;;  %v1106_v43 = vpop.f32.mrb[34].mxu0 }
 0x144   :  { %v1481_v42 = vadd.f32 %v2619_v23, %v1124_v39  ;;  %v1126_v44 = vpop.f32.mrb[34].mxu1  ;;  %v1450_v48 = vadd.f32 %v2579_v46, %v1106_v43  ;;  %v1108_v45 = vpop.f32.mrb[35].mxu0 }
 0x145   :  { %v1490_v40 = vadd.f32 %v2621_v24, %v1126_v44  ;;  %v1128_v51 = vpop.f32.mrb[35].mxu1  ;;  %v1958_v53 = vpack.c.bf16 %v1441_v41, %v1440_v36  ;;  %v1451_v54 = vadd.f32 %v2579_v46, %v1108_v45 }
 0x146   :  { %v1978_v52 = vpack.c.bf16 %v1481_v42, %v1480_v37  ;;  %v1491_v55 = vadd.f32 %v2621_v24, %v1128_v51 }
 0x147   :  { %1756 = vst [vmem:[%s2796_s3 + $0x20] sm:$0xff] %v1958_v53  ;;  %v1963_v30 = vpack.c.bf16 %v1451_v54, %v1450_v48 }
 0x148   :  { %1776 = vst [vmem:[%s2796_s3 + $0xc0] sm:$0xff] %v1978_v52  ;;  %v1983_v23 = vpack.c.bf16 %v1491_v55, %v1490_v40 }
 0x149   :  { %1761 = vst [vmem:[%s2796_s3 + $0x48] sm:$0xff] %v1963_v30  ;;  %v1112_v46 = vpop.f32.mrb[36].mxu0 }
 0x14a   :  { %1781 = vst [vmem:[%s2796_s3 + $0xe8] sm:$0xff] %v1983_v23  ;;  %v1132_v24 = vpop.f32.mrb[36].mxu1  ;;  %v1460_v56 = vadd.f32 %v2581_v47, %v1112_v46  ;;  %v1114_v58 = vpop.f32.mrb[37].mxu0 }
 0x14b   :  { %v1500_v57 = vadd.f32 %v2643_v49, %v1132_v24  ;;  %v1134_v59 = vpop.f32.mrb[37].mxu1  ;;  %v1461_v60 = vadd.f32 %v2581_v47, %v1114_v58  ;;  %v1116_v62 = vpop.f32.mrb[38].mxu0 }
 0x14c   :  { %v1501_v61 = vadd.f32 %v2643_v49, %v1134_v59  ;;  %v1136_v63 = vpop.f32.mrb[38].mxu1  ;;  %v1470_v0 = vadd.f32 %v2597_v2, %v1116_v62  ;;  %v1118_v3 = vpop.f32.mrb[39].mxu0 }
 0x14d   :  { %v1510_v1 = vadd.f32 %v2645_v50, %v1136_v63  ;;  %v1138_v4 = vpop.f32.mrb[39].mxu1  ;;  %v1968_v5 = vpack.c.bf16 %v1461_v60, %v1460_v56  ;;  %v1471_v7 = vadd.f32 %v2597_v2, %v1118_v3 }
 0x14e   :  { %v1988_v6 = vpack.c.bf16 %v1501_v61, %v1500_v57  ;;  %v1511_v8 = vadd.f32 %v2645_v50, %v1138_v4 }
 0x14f   :  { %1766 = vst [vmem:[%s2796_s3 + $0x70] sm:$0xff] %v1968_v5  ;;  %v1973_v47 = vpack.c.bf16 %v1471_v7, %v1470_v0 }
 0x150   :  { %1786 = vst [vmem:[%s2796_s3 + $0x110] sm:$0xff] %v1988_v6  ;;  %v1993_v49 = vpack.c.bf16 %v1511_v8, %v1510_v1 }
 0x151   :  { %1771 = vst [vmem:[%s2796_s3 + $0x98] sm:$0xff] %v1973_v47 }
 0x152   :  { %1791 = vst [vmem:[%s2796_s3 + $0x138] sm:$0xff] %v1993_v49 }

// kernel: aggregation_forward.4
= control target key start
LH: loop header
LB: loop body
LE: loop exit
PB: predicated region body
PF: predicated region fallthrough
CT: control target
= control target key end

     0   :  { %v2067_v1 = vmov 0   ;;  %vm21_vm0 = vcmask 523264   ;;  %vm1567_vm1 = vcmask 519168   ;;  %s2707_s1 = inlined_call_operand.vmem [shape: bf16[576,320], index: 1, kind: input, shape index: {}]   ;;  %s2708_s0 = inlined_call_operand.vmem [shape: bf16[64,576], index: 0, kind: input, shape index: {}]   ;;  %s2709_s2 = inlined_call_operand.vmem [shape: f32[64,1], index: 2, kind: input, shape index: {}]   ;;  %s2710_s3 = inlined_call_operand.vmem [shape: bf16[64,320], index: 3, kind: output, shape index: {}]  }
   0x1   :  { %v1895_v0 = vld [vmem:[%s2707_s1 + $0x4] ss:$12 sps:$4 sm:$0xff]   ;;  %1103 = vmatprep.mubr.bf16.mxu1 %v2067_v1  ;;  %1893 = vset.pattern.permute.xlu0 %v2067_v1  ;;  %v1899_v3 = vld [vmem:[%s2707_s1] ss:$12 sps:$4 sm:$0xff]   ;;  %v1901_v5 = vld [vmem:[%s2707_s1 + $0x1c] ss:$12 sps:$4 sm:$0xff]  }
   0x2   :  { %v1897_v2 = vld [vmem:[%s2707_s1 + $0x304] ss:$12 sps:$4 sm:$0xff]   ;;  %1894 = vset.pattern.permute.xlu1 %v2067_v1  ;;  %925 = vmatprep.subr.bf16.mxu0 %v1895_v0  ;;  %v1900_v4 = vld [vmem:[%s2707_s1 + $0x300] ss:$12 sps:$4 sm:$0xff]   ;;  %v1903_v6 = vld [vmem:[%s2707_s1 + $0x31c] ss:$12 sps:$4 sm:$0xff]  }
   0x3   :  { %1071 = vmatprep.subr.bf16.mxu1 %v1897_v2  ;;  %926 = vmatpush1.bf16.msra.mxu0 %v1899_v3  ;;  %v1905_v7 = vld [vmem:[%s2707_s1 + $0x18] ss:$12 sps:$4 sm:$0xff]   ;;  %v1907_v9 = vld [vmem:[%s2707_s1 + $0x34] ss:$12 sps:$4 sm:$0xff]   ;;  %v1911_v11 = vld [vmem:[%s2707_s1 + $0x30] ss:$12 sps:$4 sm:$0xff]  }
   0x4   :  { %1072 = vmatpush1.bf16.msra.mxu1 %v1900_v4  ;;  %927 = vmatprep.subr.bf16.mxu0 %v1901_v5  ;;  %v1906_v8 = vld [vmem:[%s2707_s1 + $0x318] ss:$12 sps:$4 sm:$0xff]   ;;  %v1909_v10 = vld [vmem:[%s2707_s1 + $0x334] ss:$12 sps:$4 sm:$0xff]   ;;  %v1912_v12 = vld [vmem:[%s2707_s1 + $0x330] ss:$12 sps:$4 sm:$0xff]  }
   0x5   :  { %1073 = vmatprep.subr.bf16.mxu1 %v1903_v6  ;;  %v1913_v13 = vld [vmem:[%s2707_s1 + $0x4c] ss:$12 sps:$4 sm:$0xff]   ;;  %v1917_v15 = vld [vmem:[%s2707_s1 + $0x48] ss:$12 sps:$4 sm:$0xff]   ;;  %v1919_v17 = vld [vmem:[%s2707_s1 + $0x64] ss:$12 sps:$4 sm:$0xff]  }
   0x6   :  { %v1915_v14 = vld [vmem:[%s2707_s1 + $0x34c] ss:$12 sps:$4 sm:$0xff]   ;;  %v1918_v16 = vld [vmem:[%s2707_s1 + $0x348] ss:$12 sps:$4 sm:$0xff]   ;;  %v2146_v18 = vld [vmem:[%s2708_s0 + $0x10] ss:$20 sps:$4 sm:$0xff]  }
   0x7   :  { %928 = vmatpush1.bf16.msra.mxu0 %v1905_v7  ;;  %v1922_v19 = vld [vmem:[%s2707_s1 + $0xc8] ss:$12 sps:$4 sm:$0xff]   ;;  %v1923_v20 = vld [vmem:[%s2707_s1 + $0x60] ss:$12 sps:$4 sm:$0xff]   ;;  %v1928_v24 = vld [vmem:[%s2707_s1 + $0x78] ss:$12 sps:$4 sm:$0xff]  }
   0x8   :  { %1074 = vmatpush1.bf16.msra.mxu1 %v1906_v8  ;;  %929 = vmatprep.subr.bf16.mxu0 %v1907_v9  ;;  %v1924_v21 = vld [vmem:[%s2707_s1 + $0x8] ss:$12 sps:$4 sm:$0xff]   ;;  %v1927_v23 = vld [vmem:[%s2707_s1 + $0xe0] ss:$12 sps:$4 sm:$0xff]   ;;  %v1933_v27 = vld [vmem:[%s2707_s1 + $0xf8] ss:$12 sps:$4 sm:$0xff]  }
   0x9   :  { %1075 = vmatprep.subr.bf16.mxu1 %v1909_v10  ;;  %v1925_v22 = vld [vmem:[%s2707_s1 + $0x7c] ss:$12 sps:$4 sm:$0xff]   ;;  %v1929_v25 = vld [vmem:[%s2707_s1 + $0x20] ss:$12 sps:$4 sm:$0xff]   ;;  %v1935_v30 = vld [vmem:[%s2707_s1 + $0x38] ss:$12 sps:$4 sm:$0xff]  }
   0xa   :  { %v1930_v26 = vld [vmem:[%s2707_s1 + $0x94] ss:$12 sps:$4 sm:$0xff]   ;;  %v2181_v28 = vld [vmem:[%s2708_s0 + $0x38] ss:$20 sps:$4 sm:$0xff]   ;;  %v1934_v29 = vld [vmem:[%s2707_s1 + $0x90] ss:$12 sps:$4 sm:$0xff]  }
   0xb   :  { %930 = vmatpush1.bf16.msra.mxu0 %v1911_v11  ;;  %v1936_v31 = vld [vmem:[%s2707_s1 + $0xac] ss:$12 sps:$4 sm:$0xff]   ;;  %v1938_v32 = vld [vmem:[%s2707_s1 + $0x110] ss:$12 sps:$4 sm:$0xff]   ;;  %v1939_v33 = vld [vmem:[%s2707_s1 + $0xa8] ss:$12 sps:$4 sm:$0xff]  }
   0xc   :  { %1076 = vmatpush1.bf16.msra.mxu1 %v1912_v12  ;;  %931 = vmatprep.subr.bf16.mxu0 %v1913_v13  ;;  %v1940_v34 = vld [vmem:[%s2707_s1 + $0x50] ss:$12 sps:$4 sm:$0xff]   ;;  %v1944_v36 = vld [vmem:[%s2707_s1 + $0x128] ss:$12 sps:$4 sm:$0xff]   ;;  %v1945_v38 = vld [vmem:[%s2707_s1 + $0xc0] ss:$12 sps:$4 sm:$0xff]  }
   0xd   :  { %1077 = vmatprep.subr.bf16.mxu1 %v1915_v14  ;;  %v1941_v35 = vld [vmem:[%s2707_s1 + $0xc4] ss:$12 sps:$4 sm:$0xff]   ;;  %v2213_v37 = vld [vmem:[%s2708_s0 + $0x60] ss:$20 sps:$4 sm:$0xff]   ;;  %v1947_v40 = vld [vmem:[%s2707_s1 + $0xdc] ss:$12 sps:$4 sm:$0xff]  }
   0xe   :  { %v1946_v39 = vld [vmem:[%s2707_s1 + $0x68] ss:$12 sps:$4 sm:$0xff]   ;;  %v1949_v41 = vld [vmem:[%s2707_s1 + $0x140] ss:$12 sps:$4 sm:$0xff]   ;;  %v1950_v42 = vld [vmem:[%s2707_s1 + $0xd8] ss:$12 sps:$4 sm:$0xff]  }
   0xf   :  { %932 = vmatpush1.bf16.msra.mxu0 %v1917_v15  ;;  %v1951_v43 = vld [vmem:[%s2707_s1 + $0x80] ss:$12 sps:$4 sm:$0xff]   ;;  %v2241_v45 = vld [vmem:[%s2708_s0 + $0x88] ss:$20 sps:$4 sm:$0xff]   ;;  %v1955_v46 = vld [vmem:[%s2707_s1 + $0x158] ss:$12 sps:$4 sm:$0xff]  }
  0x10   :  { %1078 = vmatpush1.bf16.msra.mxu1 %v1918_v16  ;;  %933 = vmatprep.subr.bf16.mxu0 %v1919_v17  ;;  %v1952_v44 = vld [vmem:[%s2707_s1 + $0xf4] ss:$12 sps:$4 sm:$0xff]   ;;  %v1956_v47 = vld [vmem:[%s2707_s1 + $0xf0] ss:$12 sps:$4 sm:$0xff]   ;;  %v1957_v48 = vld [vmem:[%s2707_s1 + $0x98] ss:$12 sps:$4 sm:$0xff]  }
  0x11   :  { %1755 = vmatprep.subr.bf16.mxu1 %v1922_v19  ;;  %v1958_v49 = vld [vmem:[%s2707_s1 + $0x10c] ss:$12 sps:$4 sm:$0xff]   ;;  %v1960_v50 = vld [vmem:[%s2707_s1 + $0x170] ss:$12 sps:$4 sm:$0xff]   ;;  %v1961_v52 = vld [vmem:[%s2707_s1 + $0x108] ss:$12 sps:$4 sm:$0xff]  }
  0x12   :  { %v1965_v51 = vld [vmem:[%s2708_s0 + $0x4] ss:$20 sps:$4 sm:$0xff]   ;;  %v1962_v53 = vld [vmem:[%s2707_s1 + $0xb0] ss:$12 sps:$4 sm:$0xff]   ;;  %v1963_v55 = vld [vmem:[%s2708_s0] ss:$20 sps:$4 sm:$0xff]  }
  0x13   :  { %1715 = vmatmul.mubr.msk.bf16.vlgmr.msra.gmra.mrb[0].mxu1 %vm21_vm0, %v2146_v18  ;;  %934 = vmatpush1.bf16.msra.mxu0 %v1923_v20  ;;  %v1966_v54 = vld [vmem:[%s2707_s1 + $0x124] ss:$12 sps:$4 sm:$0xff]   ;;  %v1968_v56 = vld [vmem:[%s2707_s1 + $0x248] ss:$12 sps:$4 sm:$0xff]   ;;  %v1969_v57 = vld [vmem:[%s2707_s1 + $0x120] ss:$12 sps:$4 sm:$0xff]  }
  0x14   :  { %1756 = vmatpush3.bf16.msra.mxu1 %v1924_v21  ;;  %935 = vmatprep.subr.bf16.mxu0 %v1925_v22  ;;  %v1970_v58 = vld [vmem:[%s2707_s1 + $0x188] ss:$12 sps:$4 sm:$0xff]   ;;  %v1973_v60 = vld [vmem:[%s2707_s1 + $0x260] ss:$12 sps:$4 sm:$0xff]   ;;  %v1974_v62 = vld [vmem:[%s2707_s1 + $0x138] ss:$12 sps:$4 sm:$0xff]  }
  0x15   :  { %1757 = vmatprep.subr.bf16.mxu1 %v1927_v23  ;;  %1113 = vmatprep.mubr.bf16.mxu1 %v2067_v1  ;;  %v1971_v59 = vld [vmem:[%s2707_s1 + $0x13c] ss:$12 sps:$4 sm:$0xff]   ;;  %v1976_v61 = vld [vmem:[%s2708_s0 + $0x2c] ss:$20 sps:$4 sm:$0xff]   ;;  %v1981_v2 = vld [vmem:[%s2707_s1 + $0x278] ss:$12 sps:$4 sm:$0xff]  }
  0x16   :  { %957 = vmatprep.mubr.bf16.mxu0 %v1965_v51  ;;  %v1975_v63 = vld [vmem:[%s2707_s1 + $0x1a0] ss:$12 sps:$4 sm:$0xff]   ;;  %v1982_v3 = vld [vmem:[%s2707_s1 + $0x150] ss:$12 sps:$4 sm:$0xff]   ;;  %v1983_v4 = vld [vmem:[%s2707_s1 + $0x1b8] ss:$12 sps:$4 sm:$0xff]  }
  0x17   :  { %936 = vmatpush1.bf16.msra.mxu0 %v1928_v24  ;;  %v1978_v0 = vld [vmem:[%s2707_s1 + $0x154] ss:$12 sps:$4 sm:$0xff]   ;;  %v1984_v5 = vld [vmem:[%s2707_s1 + $0x16c] ss:$12 sps:$4 sm:$0xff]   ;;  %v1986_v6 = vld [vmem:[%s2707_s1 + $0x290] ss:$12 sps:$4 sm:$0xff]  }
  0x18   :  { %1758 = vmatpush3.bf16.msra.mxu1 %v1929_v25  ;;  %937 = vmatprep.subr.bf16.mxu0 %v1930_v26  ;;  %v1989_v7 = vld [vmem:[%s2708_s0 + $0x54] ss:$20 sps:$4 sm:$0xff]   ;;  %v1988_v9 = vld [vmem:[%s2707_s1 + $0x1d0] ss:$12 sps:$4 sm:$0xff]   ;;  %v1991_v12 = vld [vmem:[%s2707_s1 + $0x180] ss:$12 sps:$4 sm:$0xff]  }
  0x19   :  { %1759 = vmatprep.subr.bf16.mxu1 %v1933_v27  ;;  %v1987_v8 = vld [vmem:[%s2707_s1 + $0x168] ss:$12 sps:$4 sm:$0xff]   ;;  %v1993_v10 = vld [vmem:[%s2707_s1 + $0x184] ss:$12 sps:$4 sm:$0xff]   ;;  %v2000_v16 = vld [vmem:[%s2707_s1 + $0x2c0] ss:$12 sps:$4 sm:$0xff]  }
  0x1a   :  { %v1995_v11 = vld [vmem:[%s2707_s1 + $0x2a8] ss:$12 sps:$4 sm:$0xff]   ;;  %v1994_v13 = vld [vmem:[%s2708_s0 + $0x50] ss:$20 sps:$4 sm:$0xff]   ;;  %v2001_v20 = vld [vmem:[%s2707_s1 + $0x200] ss:$12 sps:$4 sm:$0xff]  }
  0x1b   :  { %1716 = vmatmul.mubr.msk.bf16.gmra.mrb[4].mxu1 %vm21_vm0, %v2181_v28  ;;  %938 = vmatpush1.bf16.msra.mxu0 %v1934_v29  ;;  %v1996_v14 = vld [vmem:[%s2707_s1 + $0x1e8] ss:$12 sps:$4 sm:$0xff]   ;;  %v2002_v17 = vld [vmem:[%s2708_s0 + $0x7c] ss:$20 sps:$4 sm:$0xff]   ;;  %v1997_v19 = vld [vmem:[%s2707_s1 + $0x198] ss:$12 sps:$4 sm:$0xff]  }
  0x1c   :  { %1760 = vmatpush3.bf16.msra.mxu1 %v1935_v30  ;;  %939 = vmatprep.subr.bf16.mxu0 %v1936_v31  ;;  %v1999_v15 = vld [vmem:[%s2707_s1 + $0x19c] ss:$12 sps:$4 sm:$0xff]   ;;  %v2006_v21 = vld [vmem:[%s2707_s1 + $0x1b4] ss:$12 sps:$4 sm:$0xff]   ;;  %v2008_v22 = vld [vmem:[%s2707_s1 + $0x2d8] ss:$12 sps:$4 sm:$0xff]  }
  0x1d   :  { %1761 = vmatprep.subr.bf16.mxu1 %v1938_v32  ;;  %1123 = vmatprep.mubr.bf16.mxu1 %v2067_v1  ;;  %v2004_v23 = vld [vmem:[%s2707_s1 + $0x1b0] ss:$12 sps:$4 sm:$0xff]   ;;  %v2007_v24 = vld [vmem:[%s2708_s0 + $0x78] ss:$20 sps:$4 sm:$0xff]   ;;  %v2010_v30 = vld [vmem:[%s2707_s1 + $0x1c8] ss:$12 sps:$4 sm:$0xff]  }
  0x1e   :  { %v2009_v25 = vld [vmem:[%s2707_s1 + $0x218] ss:$12 sps:$4 sm:$0xff]   ;;  %v2013_v27 = vld [vmem:[%s2707_s1 + $0x2f0] ss:$12 sps:$4 sm:$0xff]   ;;  %v2017_v29 = vld [vmem:[%s2708_s0 + $0xc] ss:$20 sps:$4 sm:$0xff]  }
  0x1f   :  { %940 = vmatpush1.bf16.msra.mxu0 %v1939_v33  ;;  %v2012_v26 = vld [vmem:[%s2707_s1 + $0x1cc] ss:$12 sps:$4 sm:$0xff]   ;;  %v2014_v31 = vld [vmem:[%s2707_s1 + $0x230] ss:$12 sps:$4 sm:$0xff]  }
  0x20   :  { %1762 = vmatpush3.bf16.msra.mxu1 %v1940_v34  ;;  %941 = vmatprep.subr.bf16.mxu0 %v1941_v35  ;;  %v2020_v32 = vld [vmem:[%s2707_s1 + $0x1e4] ss:$12 sps:$4 sm:$0xff]   ;;  %v2396_v33 = vld [vmem:[%s2708_s0 + $0x8] ss:$20 sps:$4 sm:$0xff]   ;;  %v2018_v34 = vld [vmem:[%s2707_s1 + $0x1e0] ss:$12 sps:$4 sm:$0xff]  }
  0x21   :  { %1763 = vmatprep.subr.bf16.mxu1 %v1944_v36  ;;  %v2404_v35 = vld [vmem:[%s2708_s0 + $0x34] ss:$20 sps:$4 sm:$0xff]  }
  0x22   :  { %v2023_v36 = vld [vmem:[%s2707_s1 + $0x1fc] ss:$12 sps:$4 sm:$0xff]  }
  0x23   :  { %1717 = vmatmul.mubr.msk.bf16.gmra.mrb[8].mxu1 %vm21_vm0, %v2213_v37  ;;  %942 = vmatpush1.bf16.msra.mxu0 %v1945_v38  ;;  %v2021_v38 = vld [vmem:[%s2707_s1 + $0x1f8] ss:$12 sps:$4 sm:$0xff]  }
  0x24   :  { %1764 = vmatpush3.bf16.msra.mxu1 %v1946_v39  ;;  %943 = vmatprep.subr.bf16.mxu0 %v1947_v40  ;;  %v2039_v39 = vld [vmem:[%s2707_s1 + $0x308] ss:$12 sps:$4 sm:$0xff]  }
  0x25   :  { %1765 = vmatprep.subr.bf16.mxu1 %v1949_v41  ;;  %1133 = vmatprep.mubr.bf16.mxu1 %v2067_v1  ;;  %v1980_v1 = vld [vmem:[%s2708_s0 + $0x28] ss:$20 sps:$4 sm:$0xff]   ;;  %v2028_v40 = vld [vmem:[%s2707_s1 + $0x214] ss:$12 sps:$4 sm:$0xff]  }
  0x26   :  { %v2026_v41 = vld [vmem:[%s2707_s1 + $0x210] ss:$12 sps:$4 sm:$0xff]  }
  0x27   :  { %944 = vmatpush1.bf16.msra.mxu0 %v1950_v42  ;;  %v2426_v42 = vld [vmem:[%s2708_s0 + $0x30] ss:$20 sps:$4 sm:$0xff]  }
  0x28   :  { %1766 = vmatpush3.bf16.msra.mxu1 %v1951_v43  ;;  %945 = vmatprep.subr.bf16.mxu0 %v1952_v44  ;;  %v2043_v43 = vld [vmem:[%s2707_s1 + $0x320] ss:$12 sps:$4 sm:$0xff]   ;;  %v2434_v44 = vld [vmem:[%s2708_s0 + $0x5c] ss:$20 sps:$4 sm:$0xff]  }
  0x29   :  { %1767 = vmatprep.subr.bf16.mxu1 %v1955_v46  ;;  %v2032_v46 = vld [vmem:[%s2707_s1 + $0x22c] ss:$12 sps:$4 sm:$0xff]  }
  0x2b   :  { %1718 = vmatmul.mubr.msk.bf16.gmra.mrb[12].mxu1 %vm21_vm0, %v2241_v45  ;;  %946 = vmatpush1.bf16.msra.mxu0 %v1956_v47  ;;  %v2050_v47 = vld [vmem:[%s2707_s1 + $0x338] ss:$12 sps:$4 sm:$0xff]  }
  0x2c   :  { %1768 = vmatpush3.bf16.msra.mxu1 %v1957_v48  ;;  %947 = vmatprep.subr.bf16.mxu0 %v1958_v49  ;;  %v2030_v48 = vld [vmem:[%s2707_s1 + $0x228] ss:$12 sps:$4 sm:$0xff]   ;;  %v2037_v49 = vld [vmem:[%s2707_s1 + $0x244] ss:$12 sps:$4 sm:$0xff]  }
  0x2d   :  { %1769 = vmatprep.subr.bf16.mxu1 %v1960_v50  ;;  %1176 = vmatprep.mubr.bf16.mxu1 %v1965_v51  ;;  %v2054_v50 = vld [vmem:[%s2707_s1 + $0x350] ss:$12 sps:$4 sm:$0xff]   ;;  %v2035_v51 = vld [vmem:[%s2707_s1 + $0x240] ss:$12 sps:$4 sm:$0xff]  }
  0x2f   :  { %948 = vmatpush1.bf16.msra.mxu0 %v1961_v52  ;;  %v2459_v52 = vld [vmem:[%s2708_s0 + $0x58] ss:$20 sps:$4 sm:$0xff]  }
  0x30   :  { %1770 = vmatpush3.bf16.msra.mxu1 %v1962_v53  ;;  %949 = vmatprep.subr.bf16.mxu0 %v1966_v54  ;;  %v2044_v53 = vld [vmem:[%s2708_s0 + $0x84] ss:$20 sps:$4 sm:$0xff]   ;;  %v2042_v54 = vld [vmem:[%s2707_s1 + $0x25c] ss:$12 sps:$4 sm:$0xff]  }
  0x31   :  { %1795 = vmatprep.subr.bf16.mxu1 %v1968_v56  ;;  %v1416_v56 = vld [vmem:[%s2709_s2 + $0x10] sm:$0xff] }
  0x32   :  { %1434 = vperm.xlu1 %1894, %v1416_v56  }
  0x33   :  { %1177 = vmatmul.mubr.bf16.vlgmr.msra.gmra.mrb[16].mxu1 %v1963_v55  ;;  %950 = vmatpush1.bf16.msra.mxu0 %v1969_v57  ;;  %v2040_v57 = vld [vmem:[%s2707_s1 + $0x258] ss:$12 sps:$4 sm:$0xff]  }
  0x34   :  { %1796 = vmatpush3.bf16.msra.mxu1 %v1970_v58  ;;  %951 = vmatprep.subr.bf16.mxu0 %v1971_v59  ;;  %v1415_v58 = vld [vmem:[%s2709_s2 + $0x8] sm:$0xff]  ;;  %v2048_v59 = vld [vmem:[%s2707_s1 + $0x274] ss:$12 sps:$4 sm:$0xff]  }
  0x35   :  { %1797 = vmatprep.subr.bf16.mxu1 %v1973_v60  ;;  %1184 = vmatprep.mubr.bf16.mxu1 %v1976_v61  ;;  %v2049_v60 = vld [vmem:[%s2708_s0 + $0x80] ss:$20 sps:$4 sm:$0xff]  }
  0x37   :  { %952 = vmatpush1.bf16.msra.mxu0 %v1974_v62  ;;  %v2046_v62 = vld [vmem:[%s2707_s1 + $0x270] ss:$12 sps:$4 sm:$0xff]  }
  0x38   :  { %1798 = vmatpush3.bf16.msra.mxu1 %v1975_v63  ;;  %953 = vmatprep.subr.bf16.mxu0 %v1978_v0  ;;  %v1418_v63 = vld [vmem:[%s2709_s2 + $0x20] sm:$0xff]  ;;  %v2053_v0 = vld [vmem:[%s2707_s1 + $0x28c] ss:$12 sps:$4 sm:$0xff]  }
  0x39   :  { %1799 = vmatprep.subr.bf16.mxu1 %v1981_v2  ;;  %v2051_v2 = vld [vmem:[%s2707_s1 + $0x288] ss:$12 sps:$4 sm:$0xff]  }
  0x3b   :  { %1185 = vmatmul.mubr.bf16.gmra.mrb[20].mxu1 %v1980_v1  ;;  %954 = vmatpush1.bf16.msra.mxu0 %v1982_v3  ;;  %v1420_v3 = vld [vmem:[%s2709_s2 + $0x30] sm:$0xff] }
  0x3c   :  { %1800 = vmatpush3.bf16.msra.mxu1 %v1983_v4  ;;  %955 = vmatprep.subr.bf16.mxu0 %v1984_v5  ;;  %v2057_v4 = vld [vmem:[%s2707_s1 + $0x2a4] ss:$12 sps:$4 sm:$0xff]   ;;  %v1421_v5 = vld [vmem:[%s2709_s2 + $0x38] sm:$0xff] }
  0x3d   :  { %1801 = vmatprep.subr.bf16.mxu1 %v1986_v6  ;;  %1192 = vmatprep.mubr.bf16.mxu1 %v1989_v7  ;;  %v2060_v6 = vld [vmem:[%s2707_s1 + $0x2bc] ss:$12 sps:$4 sm:$0xff]  }
  0x3f   :  { %956 = vmatpush1.bf16.msra.mxu0 %v1987_v8  ;;  %v2063_v8 = vld [vmem:[%s2707_s1 + $0x2d4] ss:$12 sps:$4 sm:$0xff]  }
  0x40   :  { %1802 = vmatpush3.bf16.msra.mxu1 %v1988_v9  ;;  %998 = vmatprep.subr.bf16.mxu0 %v1993_v10  ;;  %v2061_v9 = vld [vmem:[%s2707_s1 + $0x2d0] ss:$12 sps:$4 sm:$0xff]  }
  0x41   :  { %1803 = vmatprep.subr.bf16.mxu1 %v1995_v11 }
  0x42   :  { %958 = vmatmul.mubr.bf16.vlgmr.msra.gmra.mrb[0].mxu0 %v1963_v55  ;;  %v1414_v55 = vld [vmem:[%s2709_s2] sm:$0xff] }
  0x43   :  { %1193 = vmatmul.mubr.bf16.gmra.mrb[24].mxu1 %v1994_v13  ;;  %999 = vmatpush1.bf16.msra.mxu0 %v1991_v12 }
  0x44   :  { %1804 = vmatpush3.bf16.msra.mxu1 %v1996_v14  ;;  %1000 = vmatprep.subr.bf16.mxu0 %v1999_v15 }
  0x45   :  { %1805 = vmatprep.subr.bf16.mxu1 %v2000_v16  ;;  %1200 = vmatprep.mubr.bf16.mxu1 %v2002_v17 }
  0x46   :  { %967 = vmatprep.mubr.bf16.mxu0 %v1976_v61  ;;  %1424 = vperm.xlu0 %1893, %v1414_v55   ;;  %v1417_v61 = vld [vmem:[%s2709_s2 + $0x18] sm:$0xff] }
  0x47   :  { %1001 = vmatpush1.bf16.msra.mxu0 %v1997_v19  ;;  %1439 = vperm.xlu1 %1894, %v1417_v61  }
  0x48   :  { %1806 = vmatpush3.bf16.msra.mxu1 %v2001_v20  ;;  %1002 = vmatprep.subr.bf16.mxu0 %v2006_v21 }
  0x49   :  { %1807 = vmatprep.subr.bf16.mxu1 %v2008_v22 }
  0x4a   :  { %968 = vmatmul.mubr.bf16.gmra.mrb[4].mxu0 %v1980_v1  ;;  %1429 = vperm.xlu0 %1893, %v1415_v58   ;;  %v1419_v1 = vld [vmem:[%s2709_s2 + $0x28] sm:$0xff] }
  0x4b   :  { %1201 = vmatmul.mubr.bf16.gmra.mrb[28].mxu1 %v2007_v24  ;;  %1003 = vmatpush1.bf16.msra.mxu0 %v2004_v23 }
  0x4c   :  { %1808 = vmatpush3.bf16.msra.mxu1 %v2009_v25  ;;  %1004 = vmatprep.subr.bf16.mxu0 %v2012_v26 }
  0x4d   :  { %1809 = vmatprep.subr.bf16.mxu1 %v2013_v27  ;;  %1241 = vmatprep.mubr.bf16.mxu1 %v2017_v29 }
  0x4e   :  { %977 = vmatprep.mubr.bf16.mxu0 %v1989_v7  ;;  %1444 = vperm.xlu0 %1893, %v1418_v63   ;;  %v2058_v7 = vld [vmem:[%s2707_s1 + $0x2b8] ss:$12 sps:$4 sm:$0xff]  }
  0x4f   :  { %1005 = vmatpush1.bf16.msra.mxu0 %v2010_v30  ;;  %1449 = vperm.xlu1 %1894, %v1419_v1  }
  0x50   :  { %1810 = vmatpush3.bf16.msra.mxu1 %v2014_v31  ;;  %1006 = vmatprep.subr.bf16.mxu0 %v2020_v32 }
  0x51   :  { %1843 = vmatprep.subr.bf16.mxu1 %v2039_v39 }
  0x52   :  { %978 = vmatmul.mubr.bf16.gmra.mrb[8].mxu0 %v1994_v13  ;;  %1454 = vperm.xlu0 %1893, %v1420_v3  }
  0x53   :  { %1242 = vmatmul.mubr.bf16.vlgmr.msra.gmra.mrb[32].mxu1 %v2396_v33  ;;  %1007 = vmatpush1.bf16.msra.mxu0 %v2018_v34 }
  0x54   :  { %1249 = vmatprep.mubr.bf16.mxu1 %v2404_v35  ;;  %1008 = vmatprep.subr.bf16.mxu0 %v2023_v36 }
  0x55   :  { %987 = vmatprep.mubr.bf16.mxu0 %v2002_v17  ;;  %1844 = vmatpush3.bf16.msra.mxu1 %v2039_v39 }
  0x56   :  { %1845 = vmatprep.subr.bf16.mxu1 %v2043_v43  ;;  %1459 = vperm.xlu1 %1894, %v1421_v5  }
  0x57   :  { %1009 = vmatpush1.bf16.msra.mxu0 %v2021_v38 }
  0x58   :  { %1010 = vmatprep.subr.bf16.mxu0 %v2028_v40 }
  0x59   :  { %1846 = vmatpush3.bf16.msra.mxu1 %v2043_v43 }
  0x5a   :  { %988 = vmatmul.mubr.bf16.gmra.mrb[12].mxu0 %v2007_v24  ;;  %1847 = vmatprep.subr.bf16.mxu1 %v2050_v47 }
  0x5b   :  { %1250 = vmatmul.mubr.bf16.gmra.mrb[36].mxu1 %v2426_v42  ;;  %1011 = vmatpush1.bf16.msra.mxu0 %v2026_v41 }
  0x5c   :  { %1257 = vmatprep.mubr.bf16.mxu1 %v2434_v44  ;;  %1012 = vmatprep.subr.bf16.mxu0 %v2032_v46 }
  0x5d   :  { %1030 = vmatprep.mubr.bf16.mxu0 %v2017_v29  ;;  %1848 = vmatpush3.bf16.msra.mxu1 %v2050_v47 }
  0x5e   :  { %1849 = vmatprep.subr.bf16.mxu1 %v2054_v50 }
  0x5f   :  { %1013 = vmatpush1.bf16.msra.mxu0 %v2030_v48 }
  0x60   :  { %1014 = vmatprep.subr.bf16.mxu0 %v2037_v49 }
  0x61   :  { %1850 = vmatpush3.bf16.msra.mxu1 %v2054_v50 }
  0x63   :  { %1258 = vmatmul.mubr.bf16.gmra.mrb[40].mxu1 %v2459_v52  ;;  %1015 = vmatpush1.bf16.msra.mxu0 %v2035_v51 }
  0x64   :  { %1265 = vmatprep.mubr.bf16.mxu1 %v2044_v53  ;;  %1016 = vmatprep.subr.bf16.mxu0 %v2042_v54 }
  0x67   :  { %1017 = vmatpush1.bf16.msra.mxu0 %v2040_v57 }
  0x68   :  { %1018 = vmatprep.subr.bf16.mxu0 %v2048_v59 }
  0x6b   :  { %1266 = vmatmul.mubr.bf16.gmra.mrb[44].mxu1 %v2049_v60  ;;  %1019 = vmatpush1.bf16.msra.mxu0 %v2046_v62 }
  0x6c   :  { %1851 = vmatprep.mubr.msk.bf16.mxu1 %vm21_vm0, %v2146_v18  ;;  %1020 = vmatprep.subr.bf16.mxu0 %v2053_v0  ;;  %v2055_v18 = vld [vmem:[%s2707_s1 + $0x2a0] ss:$12 sps:$4 sm:$0xff]  }
  0x6f   :  { %1021 = vmatpush1.bf16.msra.mxu0 %v2051_v2 }
  0x70   :  { %1022 = vmatprep.subr.bf16.mxu0 %v2057_v4 }
  0x73   :  { %1852 = vmatmul.mubr.msk.bf16.vlgmr.msra.gmra.mrb[48].mxu1 %vm21_vm0, %v2181_v28  ;;  %1023 = vmatpush1.bf16.msra.mxu0 %v2055_v18  ;;  %v2066_v28 = vld [vmem:[%s2707_s1 + $0x2ec] ss:$12 sps:$4 sm:$0xff]  }
  0x74   :  { %1855 = vmatprep.mubr.msk.bf16.mxu1 %vm21_vm0, %v2213_v37  ;;  %1024 = vmatprep.subr.bf16.mxu0 %v2060_v6  ;;  %v2064_v37 = vld [vmem:[%s2707_s1 + $0x2e8] ss:$12 sps:$4 sm:$0xff]  }
  0x77   :  { %1025 = vmatpush1.bf16.msra.mxu0 %v2058_v7 }
  0x78   :  { %1026 = vmatprep.subr.bf16.mxu0 %v2063_v8 }
  0x7b   :  { %1856 = vmatmul.mubr.msk.bf16.gmra.mrb[52].mxu1 %vm21_vm0, %v2241_v45  ;;  %1027 = vmatpush1.bf16.msra.mxu0 %v2061_v9  ;;  %v2068_v45 = vmov 0.0  }
  0x7c   :  { %1028 = vmatprep.subr.bf16.mxu0 %v2066_v28  ;;  %28 = vst.msk [vmem:[#allocation2 + $0x40] sm:$0xff] %vm21_vm0, %v2068_v45  ;;  %22 = vst.msk [vmem:[#allocation2 + $0x10] sm:$0xff] %vm21_vm0, %v2068_v45 }
  0x7d   :  { %25 = vst.msk [vmem:[#allocation2 + $0x28] sm:$0xff] %vm21_vm0, %v2068_v45  ;;  %31 = vst.msk [vmem:[#allocation2 + $0x58] sm:$0xff] %vm21_vm0, %v2068_v45 }
  0x7e   :  { %34 = vst.msk [vmem:[#allocation2 + $0x70] sm:$0xff] %vm21_vm0, %v2068_v45  ;;  %37 = vst.msk [vmem:[#allocation2 + $0x88] sm:$0xff] %vm21_vm0, %v2068_v45 }
  0x7f   :  { %1029 = vmatpush1.bf16.msra.mxu0 %v2064_v37  ;;  %40 = vst.msk [vmem:[#allocation2 + $0xa0] sm:$0xff] %vm21_vm0, %v2068_v45  ;;  %43 = vst.msk [vmem:[#allocation2 + $0xb8] sm:$0xff] %vm21_vm0, %v2068_v45 }
  0x82   :  { %1031 = vmatmul.mubr.bf16.vlgmr.msra.gmra.mrb[0].mxu0 %v2396_v33 }
  0x83   :  { %1040 = vmatprep.mubr.bf16.mxu0 %v2404_v35 }
  0x8a   :  { %1041 = vmatmul.mubr.bf16.gmra.mrb[4].mxu0 %v2426_v42 }
  0x8b   :  { %1050 = vmatprep.mubr.bf16.mxu0 %v2434_v44 }
  0x92   :  { %1051 = vmatmul.mubr.bf16.gmra.mrb[8].mxu0 %v2459_v52 }
  0x93   :  { %1060 = vmatprep.mubr.bf16.mxu0 %v2044_v53 }
  0x9a   :  { %1061 = vmatmul.mubr.bf16.gmra.mrb[12].mxu0 %v2049_v60 }
  0xe6   :  { %v2555_v10 = vpop.f32.mrb[0].mxu1 }
  0xe7   :  { %v2557_v11 = vpop.f32.mrb[1].mxu1 }
  0xe8   :  { %v2559_v12 = vpop.f32.mrb[2].mxu1 }
  0xe9   :  { %v2561_v13 = vpop.f32.mrb[3].mxu1 }
  0xee   :  { %v2563_v14 = vpop.f32.mrb[4].mxu1 }
  0xef   :  { %v2565_v15 = vpop.f32.mrb[5].mxu1 }
  0xf0   :  { %v2567_v16 = vpop.f32.mrb[6].mxu1 }
  0xf1   :  { %v2569_v17 = vpop.f32.mrb[7].mxu1 }
  0xf6   :  { %v2571_v19 = vpop.f32.mrb[8].mxu1 }
  0xf7   :  { %v2573_v20 = vpop.f32.mrb[9].mxu1 }
  0xf8   :  { %v2575_v21 = vpop.f32.mrb[10].mxu1 }
  0xf9   :  { %v2577_v22 = vpop.f32.mrb[11].mxu1 }
  0xfe   :  { %v2579_v23 = vpop.f32.mrb[12].mxu1 }
  0xff   :  { %v2581_v24 = vpop.f32.mrb[13].mxu1 }
 0x100   :  { %v2583_v25 = vpop.f32.mrb[14].mxu1 }
 0x101   :  { %v2585_v26 = vpop.f32.mrb[15].mxu1 }
 0x106   :  { %v1771_v27 = vpop.f32.mrb[16].mxu1 }
 0x107   :  { %v1772_v29 = vpop.f32.mrb[17].mxu1 }
 0x108   :  { %v1773_v30 = vadd.f32 %v1772_v29, %v1771_v27  ;;  %v1774_v31 = vpop.f32.mrb[18].mxu1 }
 0x109   :  { %v1775_v32 = vpop.f32.mrb[19].mxu1 }
 0x10a   :  { %v1776_v33 = vadd.f32 %v1775_v32, %v1774_v31 }
 0x10e   :  { %v1777_v34 = vpop.f32.mrb[20].mxu1 }
 0x10f   :  { %v1778_v35 = vpop.f32.mrb[21].mxu1 }
 0x110   :  { %v1779_v36 = vadd.f32 %v1778_v35, %v1777_v34  ;;  %v1780_v38 = vpop.f32.mrb[22].mxu1 }
 0x111   :  { %v1781_v39 = vpop.f32.mrb[23].mxu1 }
 0x112   :  { %v1782_v40 = vadd.f32 %v1781_v39, %v1780_v38  ;;  %v52_v38 = vld [vmem:[#allocation2 + $0x40] sm:$0xff] }
 0x116   :  { %v1783_v41 = vpop.f32.mrb[24].mxu1 }
 0x117   :  { %v1784_v42 = vpop.f32.mrb[25].mxu1 }
 0x118   :  { %v1785_v43 = vadd.f32 %v1784_v42, %v1783_v41  ;;  %v1786_v44 = vpop.f32.mrb[26].mxu1  ;;  %v46_v41 = vld [vmem:[#allocation2 + $0x10] sm:$0xff] }
 0x119   :  { %v1787_v46 = vpop.f32.mrb[27].mxu1 }
 0x11a   :  { %v1788_v47 = vadd.f32 %v1787_v46, %v1786_v44  ;;  %v55_v46 = vld [vmem:[#allocation2 + $0x58] sm:$0xff] }
 0x11e   :  { %v1789_v48 = vpop.f32.mrb[28].mxu1 }
 0x11f   :  { %v1790_v49 = vpop.f32.mrb[29].mxu1 }
 0x120   :  { %v1791_v50 = vadd.f32 %v1790_v49, %v1789_v48  ;;  %v1792_v51 = vpop.f32.mrb[30].mxu1 }
 0x121   :  { %v1793_v52 = vpop.f32.mrb[31].mxu1 }
 0x122   :  { %v1794_v53 = vadd.f32 %v1793_v52, %v1792_v51  ;;  %v49_v51 = vld [vmem:[#allocation2 + $0x28] sm:$0xff] }
 0x126   :  { %v1811_v54 = vpop.f32.mrb[32].mxu1 }
 0x127   :  { %v1812_v55 = vpop.f32.mrb[33].mxu1 }
 0x128   :  { %v1813_v56 = vadd.f32 %v1812_v55, %v1811_v54  ;;  %v1814_v57 = vpop.f32.mrb[34].mxu1 }
 0x129   :  { %v1815_v58 = vpop.f32.mrb[35].mxu1 }
 0x12a   :  { %v1816_v59 = vadd.f32 %v1815_v58, %v1814_v57  ;;  %v1244_v60 = vadd.f32 %v1813_v56, %v1773_v30  ;;  %v64_v57 = vld [vmem:[#allocation2 + $0xa0] sm:$0xff] }
 0x12c   :  { %v1247_v61 = vadd.f32 %v1816_v59, %v1776_v33 }
 0x12e   :  { %v1817_v62 = vpop.f32.mrb[36].mxu1 }
 0x12f   :  { %v1818_v63 = vpop.f32.mrb[37].mxu1 }
 0x130   :  { %v1819_v0 = vadd.f32 %v1818_v63, %v1817_v62  ;;  %v1820_v1 = vpop.f32.mrb[38].mxu1  ;;  %v58_v62 = vld [vmem:[#allocation2 + $0x70] sm:$0xff] }
 0x131   :  { %v1821_v2 = vpop.f32.mrb[39].mxu1 }
 0x132   :  { %v1822_v3 = vadd.f32 %v1821_v2, %v1820_v1  ;;  %v1252_v4 = vadd.f32 %v1819_v0, %v1779_v36  ;;  %v2587_v36 = vpop.permute.xlu0 %1424  ;;  %v67_v0 = vld [vmem:[#allocation2 + $0xb8] sm:$0xff] }
 0x134   :  { %v1255_v5 = vadd.f32 %v1822_v3, %v1782_v40 }
 0x136   :  { %v1823_v18 = vpop.f32.mrb[40].mxu1  ;;  %v2593_v56 = vpop.permute.xlu0 %1429 }
 0x137   :  { %v1824_v6 = vpop.f32.mrb[41].mxu1 }
 0x138   :  { %v1825_v7 = vadd.f32 %v1824_v6, %v1823_v18  ;;  %v1826_v8 = vpop.f32.mrb[42].mxu1 }
 0x139   :  { %v1827_v9 = vpop.f32.mrb[43].mxu1 }
 0x13a   :  { %v1828_v28 = vadd.f32 %v1827_v9, %v1826_v8  ;;  %v1260_v37 = vadd.f32 %v1825_v7, %v1785_v43  ;;  %v2589_v43 = vpop.permute.xlu1 %1434  ;;  %v2599_v8 = vpop.permute.xlu0 %1444 }
 0x13c   :  { %v1263_v45 = vadd.f32 %v1828_v28, %v1788_v47 }
 0x13e   :  { %v1829_v27 = vpop.f32.mrb[44].mxu1  ;;  %v2597_v59 = vpop.permute.xlu1 %1439 }
 0x13f   :  { %v1830_v29 = vpop.f32.mrb[45].mxu1 }
 0x140   :  { %v1831_v30 = vadd.f32 %v1830_v29, %v1829_v27  ;;  %v1832_v31 = vpop.f32.mrb[46].mxu1 }
 0x141   :  { %v1833_v32 = vpop.f32.mrb[47].mxu1 }
 0x142   :  { %v1834_v33 = vadd.f32 %v1833_v32, %v1832_v31  ;;  %v1268_v34 = vadd.f32 %v1831_v30, %v1791_v50  ;;  %v2605_v31 = vpop.permute.xlu1 %1449 }
 0x144   :  { %v1271_v35 = vadd.f32 %v1834_v33, %v1794_v53 }
 0x146   :  { %v1853_v39 = vpop.f32.mrb[48].mxu1 }
 0x147   :  { %v1317_v40 = vadd.f32 %v1853_v39, %v1252_v4  ;;  %v1308_v42 = vpop.f32.mrb[49].mxu1  ;;  %v61_v4 = vld [vmem:[#allocation2 + $0x88] sm:$0xff] }
 0x148   :  { %v1309_v44 = vadd.f32 %v1308_v42, %v1244_v60  ;;  %v1854_v48 = vpop.f32.mrb[50].mxu1 }
 0x149   :  { %v1347_v47 = vadd.f32 %v1317_v40, %v52_v38  ;;  %v1320_v49 = vadd.f32 %v1854_v48, %v1255_v5  ;;  %v1311_v52 = vpop.f32.mrb[51].mxu1  ;;  %v2621_v48 = vpop.permute.xlu0 %1454 }
 0x14a   :  { %v1341_v54 = vadd.f32 %v1309_v44, %v46_v41  ;;  %v1312_v55 = vadd.f32 %v1311_v52, %v1247_v61 }
 0x14b   :  { %1371 = vst.msk [vmem:[#allocation2 + $0x40] sm:$0xff] %vm21_vm0, %v1347_v47  ;;  %v1350_v50 = vadd.f32 %v1320_v49, %v55_v46 }
 0x14c   :  { %1365 = vst.msk [vmem:[#allocation2 + $0x10] sm:$0xff] %vm21_vm0, %v1341_v54  ;;  %v1344_v53 = vadd.f32 %v1312_v55, %v49_v51 }
 0x14d   :  { %1374 = vst.msk [vmem:[#allocation2 + $0x58] sm:$0xff] %vm21_vm0, %v1350_v50 }
 0x14e   :  { %1368 = vst.msk [vmem:[#allocation2 + $0x28] sm:$0xff] %vm21_vm0, %v1344_v53  ;;  %v1857_v58 = vpop.f32.mrb[52].mxu1 }
 0x14f   :  { %v1333_v60 = vadd.f32 %v1857_v58, %v1268_v34  ;;  %v1324_v63 = vpop.f32.mrb[53].mxu1 }
 0x150   :  { %v1325_v61 = vadd.f32 %v1324_v63, %v1260_v37  ;;  %v1858_v1 = vpop.f32.mrb[54].mxu1 }
 0x151   :  { %v1359_v2 = vadd.f32 %v1333_v60, %v64_v57  ;;  %v1336_v3 = vadd.f32 %v1858_v1, %v1271_v35  ;;  %v1327_v5 = vpop.f32.mrb[55].mxu1 }
 0x152   :  { %v1353_v18 = vadd.f32 %v1325_v61, %v58_v62  ;;  %v1398_v6 = vld [vmem:[#allocation2 + $0x40] sm:$0xff]  ;;  %v1328_v7 = vadd.f32 %v1327_v5, %v1263_v45 }
 0x153   :  { %v1392_v9 = vld [vmem:[#allocation2 + $0x10] sm:$0xff]  ;;  %1383 = vst.msk [vmem:[#allocation2 + $0xa0] sm:$0xff] %vm21_vm0, %v1359_v2  ;;  %v1470_v28 = vadd.f32 %v2589_v43, %v1398_v6  ;;  %v1362_v27 = vadd.f32 %v1336_v3, %v67_v0 }
 0x154   :  { %v1464_v37 = vadd.f32 %v2587_v36, %v1392_v9  ;;  %1377 = vst.msk [vmem:[#allocation2 + $0x70] sm:$0xff] %vm21_vm0, %v1353_v18  ;;  %v1356_v29 = vadd.f32 %v1328_v7, %v61_v4  ;;  %v1401_v30 = vld [vmem:[#allocation2 + $0x58] sm:$0xff] }
 0x155   :  { %v1744_v32 = vpack.c.bf16 %v1470_v28, %v1470_v28  ;;  %1386 = vst.msk [vmem:[#allocation2 + $0xb8] sm:$0xff] %vm21_vm0, %v1362_v27  ;;  %v1395_v45 = vld [vmem:[#allocation2 + $0x28] sm:$0xff]  ;;  %v1473_v33 = vadd.f32 %v2597_v59, %v1401_v30  ;;  %v1032_v38 = vpop.f32.mrb[0].mxu0 }
 0x156   :  { %v1740_v34 = vpack.c.bf16 %v1464_v37, %v1464_v37  ;;  %1380 = vst.msk [vmem:[#allocation2 + $0x88] sm:$0xff] %vm21_vm0, %v1356_v29  ;;  %v1467_v35 = vadd.f32 %v2593_v56, %v1395_v45  ;;  %v1859_v40 = vadd.f32 %v2555_v10, %v1032_v38  ;;  %v1034_v41 = vpop.f32.mrb[1].mxu0 }
 0x157   :  { %1572 = vst.msk [vmem:[%s2710_s3 + $0x20] sm:$0xf] %vm1567_vm1, %v1744_v32  ;;  %v1746_v39 = vpack.c.bf16 %v1473_v33, %v1473_v33  ;;  %v1860_v44 = vadd.f32 %v2557_v11, %v1034_v41  ;;  %v1036_v46 = vpop.f32.mrb[2].mxu0  ;;  %v2633_v11 = vpop.permute.xlu1 %1459 }
 0x158   :  { %1568 = vst.msk [vmem:[%s2710_s3 + $0x8] sm:$0xf] %vm1567_vm1, %v1740_v34  ;;  %v1742_v42 = vpack.c.bf16 %v1467_v35, %v1467_v35  ;;  %v1861_v47 = vadd.f32 %v2559_v12, %v1036_v46  ;;  %v1038_v10 = vpop.f32.mrb[3].mxu0  ;;  %v1462_v54 = vadd.f32 %v1859_v40, %v2587_v36 }
 0x159   :  { %1574 = vst.msk [vmem:[%s2710_s3 + $0x2c] sm:$0xf] %vm1567_vm1, %v1746_v39  ;;  %v1862_v49 = vadd.f32 %v2561_v13, %v1038_v10  ;;  %v1463_v12 = vadd.f32 %v1860_v44, %v2587_v36 }
 0x15a   :  { %1570 = vst.msk [vmem:[%s2710_s3 + $0x14] sm:$0xf] %vm1567_vm1, %v1742_v42  ;;  %v1410_v51 = vld [vmem:[#allocation2 + $0xa0] sm:$0xff]  ;;  %v1465_v58 = vadd.f32 %v1861_v47, %v2593_v56 }
 0x15b   :  { %v1404_v52 = vld [vmem:[#allocation2 + $0x70] sm:$0xff]  ;;  %v1482_v55 = vadd.f32 %v2621_v48, %v1410_v51  ;;  %v1739_v63 = vpack.c.bf16 %v1463_v12, %v1462_v54  ;;  %v1466_v0 = vadd.f32 %v1862_v49, %v2593_v56 }
 0x15c   :  { %v1476_v50 = vadd.f32 %v2599_v8, %v1404_v52  ;;  %v1413_v53 = vld [vmem:[#allocation2 + $0xb8] sm:$0xff] }
 0x15d   :  { %v1407_v57 = vld [vmem:[#allocation2 + $0x88] sm:$0xff]  ;;  %v1752_v60 = vpack.c.bf16 %v1482_v55, %v1482_v55  ;;  %v1485_v62 = vadd.f32 %v2633_v11, %v1413_v53  ;;  %v1042_v1 = vpop.f32.mrb[4].mxu0  ;;  %1566 = vst [vmem:[%s2710_s3] sm:$0xff] %v1739_v63  ;;  %v1741_v4 = vpack.c.bf16 %v1466_v0, %v1465_v58 }
 0x15e   :  { %v1748_v13 = vpack.c.bf16 %v1476_v50, %v1476_v50  ;;  %v1479_v61 = vadd.f32 %v2605_v31, %v1407_v57  ;;  %v1863_v2 = vadd.f32 %v2563_v14, %v1042_v1  ;;  %v1044_v3 = vpop.f32.mrb[5].mxu0 }
 0x15f   :  { %1580 = vst.msk [vmem:[%s2710_s3 + $0x50] sm:$0xf] %vm1567_vm1, %v1752_v60  ;;  %v1754_v36 = vpack.c.bf16 %v1485_v62, %v1485_v62  ;;  %v1864_v5 = vadd.f32 %v2565_v15, %v1044_v3  ;;  %v1046_v18 = vpop.f32.mrb[6].mxu0  ;;  %1569 = vst [vmem:[%s2710_s3 + $0xc] sm:$0xff] %v1741_v4 }
 0x160   :  { %1576 = vst.msk [vmem:[%s2710_s3 + $0x38] sm:$0xf] %vm1567_vm1, %v1748_v13  ;;  %v1750_v56 = vpack.c.bf16 %v1479_v61, %v1479_v61  ;;  %v1865_v14 = vadd.f32 %v2567_v16, %v1046_v18  ;;  %v1048_v6 = vpop.f32.mrb[7].mxu0  ;;  %v1468_v7 = vadd.f32 %v1863_v2, %v2589_v43 }
 0x161   :  { %1582 = vst.msk [vmem:[%s2710_s3 + $0x5c] sm:$0xf] %vm1567_vm1, %v1754_v36  ;;  %v1866_v15 = vadd.f32 %v2569_v17, %v1048_v6  ;;  %v1469_v9 = vadd.f32 %v1864_v5, %v2589_v43 }
 0x162   :  { %1578 = vst.msk [vmem:[%s2710_s3 + $0x44] sm:$0xf] %vm1567_vm1, %v1750_v56  ;;  %v1471_v28 = vadd.f32 %v1865_v14, %v2597_v59 }
 0x163   :  { %v1743_v27 = vpack.c.bf16 %v1469_v9, %v1468_v7  ;;  %v1472_v16 = vadd.f32 %v1866_v15, %v2597_v59 }
 0x165   :  { %v1052_v37 = vpop.f32.mrb[8].mxu0  ;;  %1571 = vst [vmem:[%s2710_s3 + $0x18] sm:$0xff] %v1743_v27  ;;  %v1745_v32 = vpack.c.bf16 %v1472_v16, %v1471_v28 }
 0x166   :  { %v1867_v29 = vadd.f32 %v2571_v19, %v1052_v37  ;;  %v1054_v30 = vpop.f32.mrb[9].mxu0 }
 0x167   :  { %v1868_v17 = vadd.f32 %v2573_v20, %v1054_v30  ;;  %v1056_v45 = vpop.f32.mrb[10].mxu0  ;;  %1573 = vst [vmem:[%s2710_s3 + $0x24] sm:$0xff] %v1745_v32 }
 0x168   :  { %v1869_v33 = vadd.f32 %v2575_v21, %v1056_v45  ;;  %v1058_v43 = vpop.f32.mrb[11].mxu0  ;;  %v1474_v19 = vadd.f32 %v1867_v29, %v2599_v8 }
 0x169   :  { %v1870_v59 = vadd.f32 %v2577_v22, %v1058_v43  ;;  %v1475_v34 = vadd.f32 %v1868_v17, %v2599_v8 }
 0x16a   :  { %v1477_v35 = vadd.f32 %v1869_v33, %v2605_v31 }
 0x16b   :  { %v1747_v38 = vpack.c.bf16 %v1475_v34, %v1474_v19  ;;  %v1478_v39 = vadd.f32 %v1870_v59, %v2605_v31 }
 0x16d   :  { %v1062_v20 = vpop.f32.mrb[12].mxu0  ;;  %1575 = vst [vmem:[%s2710_s3 + $0x30] sm:$0xff] %v1747_v38  ;;  %v1749_v41 = vpack.c.bf16 %v1478_v39, %v1477_v35 }
 0x16e   :  { %v1871_v40 = vadd.f32 %v2579_v23, %v1062_v20  ;;  %v1064_v21 = vpop.f32.mrb[13].mxu0 }
 0x16f   :  { %v1872_v22 = vadd.f32 %v2581_v24, %v1064_v21  ;;  %v1066_v42 = vpop.f32.mrb[14].mxu0  ;;  %1577 = vst [vmem:[%s2710_s3 + $0x3c] sm:$0xff] %v1749_v41 }
 0x170   :  { %v1873_v44 = vadd.f32 %v2583_v25, %v1066_v42  ;;  %v1068_v8 = vpop.f32.mrb[15].mxu0  ;;  %v1480_v23 = vadd.f32 %v1871_v40, %v2621_v48 }
 0x171   :  { %v1874_v31 = vadd.f32 %v2585_v26, %v1068_v8  ;;  %v1481_v46 = vadd.f32 %v1872_v22, %v2621_v48 }
 0x172   :  { %v1483_v47 = vadd.f32 %v1873_v44, %v2633_v11 }
 0x173   :  { %v1751_v10 = vpack.c.bf16 %v1481_v46, %v1480_v23  ;;  %v1484_v49 = vadd.f32 %v1874_v31, %v2633_v11 }
 0x175   :  { %1579 = vst [vmem:[%s2710_s3 + $0x48] sm:$0xff] %v1751_v10  ;;  %v1753_v24 = vpack.c.bf16 %v1484_v49, %v1483_v47 }
 0x177   :  { %1581 = vst [vmem:[%s2710_s3 + $0x54] sm:$0xff] %v1753_v24 }

// kernel: aggregation_forward.5
= control target key start
LH: loop header
LB: loop body
LE: loop exit
PB: predicated region body
PF: predicated region fallthrough
CT: control target
= control target key end

     0   :  { %vm19_vm0 = vcmask 13312   ;;  %s11511_s1 = inlined_call_operand.vmem [shape: bf16[10240,2], index: 1, kind: input, shape index: {}]   ;;  %s11512_s0 = inlined_call_operand.vmem [shape: bf16[6,10240], index: 0, kind: input, shape index: {}]   ;;  %s11513_s2 = inlined_call_operand.vmem [shape: f32[6,1], index: 2, kind: input, shape index: {}]   ;;  %s11514_s3 = inlined_call_operand.vmem [shape: f32[6,2], index: 3, kind: output, shape index: {}]  }
   0x1   :  { %v8684_v0 = vld [vmem:[%s11511_s1 + $0x40] sm:$0xff]   ;;  %v8688_v4 = vld [vmem:[%s11511_s1 + $0x48] sm:$0xff]   ;;  %v8692_v8 = vld [vmem:[%s11511_s1 + $0x50] sm:$0xff]  }
   0x2   :  { %v8685_v1 = vld [vmem:[%s11511_s1 + $0xc0] sm:$0xff]   ;;  %7801 = vmatprep.subr.bf16.mxu0 %v8684_v0  ;;  %v8689_v5 = vld [vmem:[%s11511_s1 + $0xc8] sm:$0xff]   ;;  %v8693_v9 = vld [vmem:[%s11511_s1 + $0xd0] sm:$0xff]  }
   0x3   :  { %v8686_v2 = vld [vmem:[%s11511_s1] sm:$0xff]   ;;  %7823 = vmatprep.subr.bf16.mxu1 %v8685_v1  ;;  %v8690_v6 = vld [vmem:[%s11511_s1 + $0x8] sm:$0xff]   ;;  %v8694_v10 = vld [vmem:[%s11511_s1 + $0x10] sm:$0xff]  }
   0x4   :  { %v8687_v3 = vld [vmem:[%s11511_s1 + $0x80] sm:$0xff]   ;;  %7802 = vmatpush3.bf16.msra.mxu0 %v8686_v2  ;;  %v8691_v7 = vld [vmem:[%s11511_s1 + $0x88] sm:$0xff]   ;;  %v8695_v11 = vld [vmem:[%s11511_s1 + $0x90] sm:$0xff]  }
   0x5   :  { %7824 = vmatpush3.bf16.msra.mxu1 %v8687_v3  ;;  %7803 = vmatprep.subr.bf16.mxu0 %v8688_v4  ;;  %v8696_v12 = vld [vmem:[%s11511_s1 + $0x58] sm:$0xff]   ;;  %v8700_v16 = vld [vmem:[%s11511_s1 + $0x60] sm:$0xff]   ;;  %v8704_v20 = vld [vmem:[%s11511_s1 + $0x68] sm:$0xff]  }
   0x6   :  { %7825 = vmatprep.subr.bf16.mxu1 %v8689_v5  ;;  %v8697_v13 = vld [vmem:[%s11511_s1 + $0xd8] sm:$0xff]   ;;  %v8701_v17 = vld [vmem:[%s11511_s1 + $0xe0] sm:$0xff]   ;;  %v8705_v21 = vld [vmem:[%s11511_s1 + $0xe8] sm:$0xff]  }
   0x7   :  { %v8698_v14 = vld [vmem:[%s11511_s1 + $0x18] sm:$0xff]   ;;  %v8702_v18 = vld [vmem:[%s11511_s1 + $0x20] sm:$0xff]   ;;  %v8706_v22 = vld [vmem:[%s11511_s1 + $0x28] sm:$0xff]  }
   0x8   :  { %7804 = vmatpush3.bf16.msra.mxu0 %v8690_v6  ;;  %v8699_v15 = vld [vmem:[%s11511_s1 + $0x98] sm:$0xff]   ;;  %v8703_v19 = vld [vmem:[%s11511_s1 + $0xa0] sm:$0xff]   ;;  %v8707_v23 = vld [vmem:[%s11511_s1 + $0xa8] sm:$0xff]  }
   0x9   :  { %7826 = vmatpush3.bf16.msra.mxu1 %v8691_v7  ;;  %7805 = vmatprep.subr.bf16.mxu0 %v8692_v8  ;;  %v8708_v24 = vld [vmem:[%s11511_s1 + $0x70] sm:$0xff]   ;;  %v8712_v28 = vld [vmem:[%s11511_s1 + $0x78] sm:$0xff]   ;;  %v22_v32 = vld [vmem:[%s11512_s0] sm:$0x77] }
   0xa   :  { %7827 = vmatprep.subr.bf16.mxu1 %v8693_v9  ;;  %v8709_v25 = vld [vmem:[%s11511_s1 + $0xf0] sm:$0xff]   ;;  %v8713_v29 = vld [vmem:[%s11511_s1 + $0xf8] sm:$0xff]   ;;  %v23_v33 = vld [vmem:[%s11512_s0 + $0x8] sm:$0x77]  ;;  %v7081_v34 = vcombine.low %v22_v32, %v22_v32  ;;  %v7082_v35 = vcombine.high %v22_v32, %v22_v32 }
   0xb   :  { %v8710_v26 = vld [vmem:[%s11511_s1 + $0x30] sm:$0xff]   ;;  %v8714_v30 = vld [vmem:[%s11511_s1 + $0x38] sm:$0xff]   ;;  %v7083_v36 = vcombine.low %v23_v33, %v23_v33  ;;  %v7084_v37 = vcombine.high %v23_v33, %v23_v33  ;;  %v8720_v38 = vld [vmem:[%s11511_s1 + $0x140] sm:$0xff]  }
   0xc   :  { %7806 = vmatpush3.bf16.msra.mxu0 %v8694_v10  ;;  %v8711_v27 = vld [vmem:[%s11511_s1 + $0xb0] sm:$0xff]   ;;  %v8715_v31 = vld [vmem:[%s11511_s1 + $0xb8] sm:$0xff]   ;;  %v8721_v39 = vld [vmem:[%s11511_s1 + $0x1c0] sm:$0xff]   ;;  %5494 = vmatprep.mubr.bf16.mxu0 %v7082_v35 }
   0xd   :  { %7828 = vmatpush3.bf16.msra.mxu1 %v8695_v11  ;;  %7807 = vmatprep.subr.bf16.mxu0 %v8696_v12  ;;  %v8722_v40 = vld [vmem:[%s11511_s1 + $0x100] sm:$0xff]   ;;  %v8724_v42 = vld [vmem:[%s11511_s1 + $0x148] sm:$0xff]   ;;  %v8728_v46 = vld [vmem:[%s11511_s1 + $0x150] sm:$0xff]  }
   0xe   :  { %7829 = vmatprep.subr.bf16.mxu1 %v8697_v13  ;;  %5534 = vmatprep.mubr.bf16.mxu1 %v7084_v37  ;;  %v8723_v41 = vld [vmem:[%s11511_s1 + $0x180] sm:$0xff]   ;;  %v8725_v43 = vld [vmem:[%s11511_s1 + $0x1c8] sm:$0xff]   ;;  %v8729_v47 = vld [vmem:[%s11511_s1 + $0x1d0] sm:$0xff]  }
   0xf   :  { %v8726_v44 = vld [vmem:[%s11511_s1 + $0x108] sm:$0xff]   ;;  %v8730_v48 = vld [vmem:[%s11511_s1 + $0x110] sm:$0xff]   ;;  %v8732_v50 = vld [vmem:[%s11511_s1 + $0x158] sm:$0xff]  }
  0x10   :  { %7808 = vmatpush3.bf16.msra.mxu0 %v8698_v14  ;;  %v8727_v45 = vld [vmem:[%s11511_s1 + $0x188] sm:$0xff]   ;;  %v8731_v49 = vld [vmem:[%s11511_s1 + $0x190] sm:$0xff]   ;;  %v8733_v51 = vld [vmem:[%s11511_s1 + $0x1d8] sm:$0xff]  }
  0x11   :  { %7830 = vmatpush3.bf16.msra.mxu1 %v8699_v15  ;;  %7809 = vmatprep.subr.bf16.mxu0 %v8700_v16  ;;  %v8734_v52 = vld [vmem:[%s11511_s1 + $0x118] sm:$0xff]   ;;  %v8736_v54 = vld [vmem:[%s11511_s1 + $0x160] sm:$0xff]   ;;  %v8740_v58 = vld [vmem:[%s11511_s1 + $0x168] sm:$0xff]  }
  0x12   :  { %7831 = vmatprep.subr.bf16.mxu1 %v8701_v17  ;;  %v8735_v53 = vld [vmem:[%s11511_s1 + $0x198] sm:$0xff]   ;;  %v8737_v55 = vld [vmem:[%s11511_s1 + $0x1e0] sm:$0xff]   ;;  %v8741_v59 = vld [vmem:[%s11511_s1 + $0x1e8] sm:$0xff]  }
  0x13   :  { %v8738_v56 = vld [vmem:[%s11511_s1 + $0x120] sm:$0xff]   ;;  %v8742_v60 = vld [vmem:[%s11511_s1 + $0x128] sm:$0xff]   ;;  %v8744_v62 = vld [vmem:[%s11511_s1 + $0x170] sm:$0xff]  }
  0x14   :  { %7810 = vmatpush3.bf16.msra.mxu0 %v8702_v18  ;;  %v8739_v57 = vld [vmem:[%s11511_s1 + $0x1a0] sm:$0xff]   ;;  %v8743_v61 = vld [vmem:[%s11511_s1 + $0x1a8] sm:$0xff]   ;;  %v8745_v63 = vld [vmem:[%s11511_s1 + $0x1f0] sm:$0xff]  }
  0x15   :  { %7832 = vmatpush3.bf16.msra.mxu1 %v8703_v19  ;;  %7811 = vmatprep.subr.bf16.mxu0 %v8704_v20  ;;  %v8746_v0 = vld [vmem:[%s11511_s1 + $0x130] sm:$0xff]   ;;  %v8748_v2 = vld [vmem:[%s11511_s1 + $0x178] sm:$0xff]   ;;  %v8756_v12 = vld [vmem:[%s11511_s1 + $0x240] sm:$0xff]  }
  0x16   :  { %7833 = vmatprep.subr.bf16.mxu1 %v8705_v21  ;;  %v8747_v1 = vld [vmem:[%s11511_s1 + $0x1b0] sm:$0xff]   ;;  %v8749_v3 = vld [vmem:[%s11511_s1 + $0x1f8] sm:$0xff]   ;;  %v8757_v13 = vld [vmem:[%s11511_s1 + $0x2c0] sm:$0xff]  }
  0x17   :  { %v8750_v4 = vld [vmem:[%s11511_s1 + $0x138] sm:$0xff]   ;;  %v24_v6 = vld [vmem:[%s11512_s0 + $0x10] sm:$0x77]  ;;  %v8758_v14 = vld [vmem:[%s11511_s1 + $0x200] sm:$0xff]  }
  0x18   :  { %7812 = vmatpush3.bf16.msra.mxu0 %v8706_v22  ;;  %v8751_v5 = vld [vmem:[%s11511_s1 + $0x1b8] sm:$0xff]   ;;  %v7085_v7 = vcombine.low %v24_v6, %v24_v6  ;;  %v7086_v8 = vcombine.high %v24_v6, %v24_v6  ;;  %v8759_v15 = vld [vmem:[%s11511_s1 + $0x280] sm:$0xff]   ;;  %v8760_v16 = vld [vmem:[%s11511_s1 + $0x248] sm:$0xff]  }
  0x19   :  { %7834 = vmatpush3.bf16.msra.mxu1 %v8707_v23  ;;  %7813 = vmatprep.subr.bf16.mxu0 %v8708_v24  ;;  %v25_v9 = vld [vmem:[%s11512_s0 + $0x18] sm:$0x77]  ;;  %v8761_v17 = vld [vmem:[%s11511_s1 + $0x2c8] sm:$0xff]   ;;  %v8764_v20 = vld [vmem:[%s11511_s1 + $0x250] sm:$0xff]  }
  0x1a   :  { %7835 = vmatprep.subr.bf16.mxu1 %v8709_v25  ;;  %v7087_v10 = vcombine.low %v25_v9, %v25_v9  ;;  %v7088_v11 = vcombine.high %v25_v9, %v25_v9  ;;  %v8762_v18 = vld [vmem:[%s11511_s1 + $0x208] sm:$0xff]   ;;  %v8765_v21 = vld [vmem:[%s11511_s1 + $0x2d0] sm:$0xff]   ;;  %v8768_v24 = vld [vmem:[%s11511_s1 + $0x258] sm:$0xff]  }
  0x1b   :  { %v8763_v19 = vld [vmem:[%s11511_s1 + $0x288] sm:$0xff]   ;;  %v8766_v22 = vld [vmem:[%s11511_s1 + $0x210] sm:$0xff]   ;;  %v8769_v25 = vld [vmem:[%s11511_s1 + $0x2d8] sm:$0xff]  }
  0x1c   :  { %7814 = vmatpush3.bf16.msra.mxu0 %v8710_v26  ;;  %v8767_v23 = vld [vmem:[%s11511_s1 + $0x290] sm:$0xff]   ;;  %v8770_v26 = vld [vmem:[%s11511_s1 + $0x218] sm:$0xff]   ;;  %v8776_v32 = vld [vmem:[%s11511_s1 + $0x268] sm:$0xff]  }
  0x1d   :  { %7836 = vmatpush3.bf16.msra.mxu1 %v8711_v27  ;;  %7815 = vmatprep.subr.bf16.mxu0 %v8712_v28  ;;  %v8771_v27 = vld [vmem:[%s11511_s1 + $0x298] sm:$0xff]   ;;  %v8772_v28 = vld [vmem:[%s11511_s1 + $0x260] sm:$0xff]   ;;  %v8777_v33 = vld [vmem:[%s11511_s1 + $0x2e8] sm:$0xff]  }
  0x1e   :  { %7837 = vmatprep.subr.bf16.mxu1 %v8713_v29  ;;  %v8773_v29 = vld [vmem:[%s11511_s1 + $0x2e0] sm:$0xff]   ;;  %v8779_v35 = vld [vmem:[%s11511_s1 + $0x2a8] sm:$0xff]   ;;  %v8781_v37 = vld [vmem:[%s11511_s1 + $0x2f0] sm:$0xff]  }
  0x1f   :  { %v8812_v6 = vld [vmem:[%s11511_s1 + $0x368] sm:$0xff]  }
  0x20   :  { %7816 = vmatpush3.bf16.msra.mxu0 %v8714_v30  ;;  %v8774_v30 = vld [vmem:[%s11511_s1 + $0x220] sm:$0xff]   ;;  %v8815_v9 = vld [vmem:[%s11511_s1 + $0x3a8] sm:$0xff]  }
  0x21   :  { %7838 = vmatpush3.bf16.msra.mxu1 %v8715_v31  ;;  %7845 = vmatprep.subr.bf16.mxu0 %v8720_v38  ;;  %v8775_v31 = vld [vmem:[%s11511_s1 + $0x2a0] sm:$0xff]   ;;  %v8782_v38 = vld [vmem:[%s11511_s1 + $0x230] sm:$0xff]  }
  0x22   :  { %7867 = vmatprep.subr.bf16.mxu1 %v8721_v39  ;;  %v8783_v39 = vld [vmem:[%s11511_s1 + $0x2b0] sm:$0xff]  }
  0x23   :  { %5495 = vmatmul.mubr.bf16.vlgmr.msra.gmra.mrb[0].mxu0 %v7081_v34  ;;  %v8778_v34 = vld [vmem:[%s11511_s1 + $0x228] sm:$0xff]  }
  0x24   :  { %5535 = vmatmul.mubr.bf16.vlgmr.msra.gmra.mrb[0].mxu1 %v7083_v36  ;;  %7846 = vmatpush3.bf16.msra.mxu0 %v8722_v40  ;;  %v8780_v36 = vld [vmem:[%s11511_s1 + $0x270] sm:$0xff]   ;;  %v8784_v40 = vld [vmem:[%s11511_s1 + $0x278] sm:$0xff]  }
  0x25   :  { %7868 = vmatpush3.bf16.msra.mxu1 %v8723_v41  ;;  %7847 = vmatprep.subr.bf16.mxu0 %v8724_v42  ;;  %v8785_v41 = vld [vmem:[%s11511_s1 + $0x2f8] sm:$0xff]  }
  0x26   :  { %7869 = vmatprep.subr.bf16.mxu1 %v8725_v43  ;;  %5574 = vmatprep.mubr.bf16.mxu0 %v7086_v8  ;;  %v8786_v42 = vld [vmem:[%s11511_s1 + $0x238] sm:$0xff]   ;;  %v8814_v8 = vld [vmem:[%s11511_s1 + $0x328] sm:$0xff]  }
  0x27   :  { %5614 = vmatprep.mubr.bf16.mxu1 %v7088_v11  ;;  %v8787_v43 = vld [vmem:[%s11511_s1 + $0x2b8] sm:$0xff]   ;;  %v8817_v11 = vld [vmem:[%s11511_s1 + $0x3f0] sm:$0xff]  }
  0x28   :  { %7848 = vmatpush3.bf16.msra.mxu0 %v8726_v44  ;;  %v26_v44 = vld [vmem:[%s11512_s0 + $0x20] sm:$0x77] }
  0x29   :  { %7870 = vmatpush3.bf16.msra.mxu1 %v8727_v45  ;;  %7849 = vmatprep.subr.bf16.mxu0 %v8728_v46  ;;  %v27_v45 = vld [vmem:[%s11512_s0 + $0x28] sm:$0x77]  ;;  %v7089_v46 = vcombine.low %v26_v44, %v26_v44 }
  0x2a   :  { %7871 = vmatprep.subr.bf16.mxu1 %v8729_v47  ;;  %v7090_v47 = vcombine.high %v26_v44, %v26_v44  ;;  %v8848_v44 = vld [vmem:[%s11511_s1 + $0x468] sm:$0xff]  }
  0x2c   :  { %7850 = vmatpush3.bf16.msra.mxu0 %v8730_v48  ;;  %v7091_v48 = vcombine.low %v27_v45, %v27_v45 }
  0x2d   :  { %7872 = vmatpush3.bf16.msra.mxu1 %v8731_v49  ;;  %7851 = vmatprep.subr.bf16.mxu0 %v8732_v50  ;;  %v7092_v49 = vcombine.high %v27_v45, %v27_v45  ;;  %v8792_v50 = vld [vmem:[%s11511_s1 + $0x340] sm:$0xff]   ;;  %v8849_v45 = vld [vmem:[%s11511_s1 + $0x4e8] sm:$0xff]  }
  0x2e   :  { %7873 = vmatprep.subr.bf16.mxu1 %v8733_v51  ;;  %v8793_v51 = vld [vmem:[%s11511_s1 + $0x3c0] sm:$0xff]  }
  0x30   :  { %7852 = vmatpush3.bf16.msra.mxu0 %v8734_v52  ;;  %v8794_v52 = vld [vmem:[%s11511_s1 + $0x300] sm:$0xff]  }
  0x31   :  { %7874 = vmatpush3.bf16.msra.mxu1 %v8735_v53  ;;  %7853 = vmatprep.subr.bf16.mxu0 %v8736_v54  ;;  %v8795_v53 = vld [vmem:[%s11511_s1 + $0x380] sm:$0xff]   ;;  %v8796_v54 = vld [vmem:[%s11511_s1 + $0x348] sm:$0xff]  }
  0x32   :  { %7875 = vmatprep.subr.bf16.mxu1 %v8737_v55  ;;  %v8797_v55 = vld [vmem:[%s11511_s1 + $0x3c8] sm:$0xff]  }
  0x34   :  { %7854 = vmatpush3.bf16.msra.mxu0 %v8738_v56  ;;  %v8798_v56 = vld [vmem:[%s11511_s1 + $0x308] sm:$0xff]  }
  0x35   :  { %7876 = vmatpush3.bf16.msra.mxu1 %v8739_v57  ;;  %7855 = vmatprep.subr.bf16.mxu0 %v8740_v58  ;;  %v8799_v57 = vld [vmem:[%s11511_s1 + $0x388] sm:$0xff]   ;;  %v8800_v58 = vld [vmem:[%s11511_s1 + $0x350] sm:$0xff]  }
  0x36   :  { %7877 = vmatprep.subr.bf16.mxu1 %v8741_v59  ;;  %v8801_v59 = vld [vmem:[%s11511_s1 + $0x3d0] sm:$0xff]  }
  0x38   :  { %7856 = vmatpush3.bf16.msra.mxu0 %v8742_v60  ;;  %v8802_v60 = vld [vmem:[%s11511_s1 + $0x310] sm:$0xff]  }
  0x39   :  { %7878 = vmatpush3.bf16.msra.mxu1 %v8743_v61  ;;  %7857 = vmatprep.subr.bf16.mxu0 %v8744_v62  ;;  %v8803_v61 = vld [vmem:[%s11511_s1 + $0x390] sm:$0xff]   ;;  %v8804_v62 = vld [vmem:[%s11511_s1 + $0x358] sm:$0xff]  }
  0x3a   :  { %7879 = vmatprep.subr.bf16.mxu1 %v8745_v63  ;;  %v8805_v63 = vld [vmem:[%s11511_s1 + $0x3d8] sm:$0xff]  }
  0x3c   :  { %7858 = vmatpush3.bf16.msra.mxu0 %v8746_v0  ;;  %v8806_v0 = vld [vmem:[%s11511_s1 + $0x318] sm:$0xff]  }
  0x3d   :  { %7880 = vmatpush3.bf16.msra.mxu1 %v8747_v1  ;;  %7859 = vmatprep.subr.bf16.mxu0 %v8748_v2  ;;  %v8807_v1 = vld [vmem:[%s11511_s1 + $0x398] sm:$0xff]   ;;  %v8808_v2 = vld [vmem:[%s11511_s1 + $0x360] sm:$0xff]  }
  0x3e   :  { %7881 = vmatprep.subr.bf16.mxu1 %v8749_v3  ;;  %v8809_v3 = vld [vmem:[%s11511_s1 + $0x3e0] sm:$0xff]  }
  0x40   :  { %7860 = vmatpush3.bf16.msra.mxu0 %v8750_v4  ;;  %v8810_v4 = vld [vmem:[%s11511_s1 + $0x320] sm:$0xff]  }
  0x41   :  { %7882 = vmatpush3.bf16.msra.mxu1 %v8751_v5  ;;  %7889 = vmatprep.subr.bf16.mxu0 %v8756_v12  ;;  %v8811_v5 = vld [vmem:[%s11511_s1 + $0x3a0] sm:$0xff]   ;;  %v8818_v12 = vld [vmem:[%s11511_s1 + $0x330] sm:$0xff]  }
  0x42   :  { %7911 = vmatprep.subr.bf16.mxu1 %v8757_v13  ;;  %v8819_v13 = vld [vmem:[%s11511_s1 + $0x3b0] sm:$0xff]  }
  0x43   :  { %5575 = vmatmul.mubr.bf16.vlgmr.msra.gmra.mrb[4].mxu0 %v7085_v7  ;;  %v8813_v7 = vld [vmem:[%s11511_s1 + $0x3e8] sm:$0xff]  }
  0x44   :  { %5615 = vmatmul.mubr.bf16.vlgmr.msra.gmra.mrb[4].mxu1 %v7087_v10  ;;  %7890 = vmatpush3.bf16.msra.mxu0 %v8758_v14  ;;  %v8816_v10 = vld [vmem:[%s11511_s1 + $0x370] sm:$0xff]   ;;  %v8820_v14 = vld [vmem:[%s11511_s1 + $0x378] sm:$0xff]  }
  0x45   :  { %7912 = vmatpush3.bf16.msra.mxu1 %v8759_v15  ;;  %7891 = vmatprep.subr.bf16.mxu0 %v8760_v16  ;;  %v8821_v15 = vld [vmem:[%s11511_s1 + $0x3f8] sm:$0xff]  }
  0x46   :  { %7913 = vmatprep.subr.bf16.mxu1 %v8761_v17  ;;  %5654 = vmatprep.mubr.bf16.mxu0 %v7090_v47  ;;  %v8822_v16 = vld [vmem:[%s11511_s1 + $0x338] sm:$0xff]   ;;  %v8851_v47 = vld [vmem:[%s11511_s1 + $0x4a8] sm:$0xff]  }
  0x47   :  { %5694 = vmatprep.mubr.bf16.mxu1 %v7092_v49  ;;  %v8823_v17 = vld [vmem:[%s11511_s1 + $0x3b8] sm:$0xff]   ;;  %v8853_v49 = vld [vmem:[%s11511_s1 + $0x4f0] sm:$0xff]  }
  0x48   :  { %7892 = vmatpush3.bf16.msra.mxu0 %v8762_v18  ;;  %v28_v18 = vld [vmem:[%s11512_s0 + $0x30] sm:$0x77] }
  0x49   :  { %7914 = vmatpush3.bf16.msra.mxu1 %v8763_v19  ;;  %7893 = vmatprep.subr.bf16.mxu0 %v8764_v20  ;;  %v29_v19 = vld [vmem:[%s11512_s0 + $0x38] sm:$0x77]  ;;  %v7093_v20 = vcombine.low %v28_v18, %v28_v18 }
  0x4a   :  { %7915 = vmatprep.subr.bf16.mxu1 %v8765_v21  ;;  %v7094_v21 = vcombine.high %v28_v18, %v28_v18  ;;  %v8884_v18 = vld [vmem:[%s11511_s1 + $0x568] sm:$0xff]  }
  0x4c   :  { %7894 = vmatpush3.bf16.msra.mxu0 %v8766_v22  ;;  %v7095_v22 = vcombine.low %v29_v19, %v29_v19 }
  0x4d   :  { %7916 = vmatpush3.bf16.msra.mxu1 %v8767_v23  ;;  %7895 = vmatprep.subr.bf16.mxu0 %v8768_v24  ;;  %v8828_v23 = vld [vmem:[%s11511_s1 + $0x440] sm:$0xff]   ;;  %v7096_v24 = vcombine.high %v29_v19, %v29_v19  ;;  %v8885_v19 = vld [vmem:[%s11511_s1 + $0x5e8] sm:$0xff]  }
  0x4e   :  { %7917 = vmatprep.subr.bf16.mxu1 %v8769_v25  ;;  %v8829_v25 = vld [vmem:[%s11511_s1 + $0x4c0] sm:$0xff]  }
  0x50   :  { %7896 = vmatpush3.bf16.msra.mxu0 %v8770_v26  ;;  %v8830_v26 = vld [vmem:[%s11511_s1 + $0x400] sm:$0xff]  }
  0x51   :  { %7918 = vmatpush3.bf16.msra.mxu1 %v8771_v27  ;;  %7897 = vmatprep.subr.bf16.mxu0 %v8772_v28  ;;  %v8831_v27 = vld [vmem:[%s11511_s1 + $0x480] sm:$0xff]   ;;  %v8832_v28 = vld [vmem:[%s11511_s1 + $0x448] sm:$0xff]  }
  0x52   :  { %7919 = vmatprep.subr.bf16.mxu1 %v8773_v29  ;;  %v8833_v29 = vld [vmem:[%s11511_s1 + $0x4c8] sm:$0xff]  }
  0x54   :  { %7898 = vmatpush3.bf16.msra.mxu0 %v8774_v30  ;;  %v8834_v30 = vld [vmem:[%s11511_s1 + $0x408] sm:$0xff]  }
  0x55   :  { %7920 = vmatpush3.bf16.msra.mxu1 %v8775_v31  ;;  %7899 = vmatprep.subr.bf16.mxu0 %v8776_v32  ;;  %v8835_v31 = vld [vmem:[%s11511_s1 + $0x488] sm:$0xff]   ;;  %v8836_v32 = vld [vmem:[%s11511_s1 + $0x450] sm:$0xff]  }
  0x56   :  { %7921 = vmatprep.subr.bf16.mxu1 %v8777_v33  ;;  %v8837_v33 = vld [vmem:[%s11511_s1 + $0x4d0] sm:$0xff]  }
  0x58   :  { %7900 = vmatpush3.bf16.msra.mxu0 %v8778_v34  ;;  %v8838_v34 = vld [vmem:[%s11511_s1 + $0x410] sm:$0xff]  }
  0x59   :  { %7922 = vmatpush3.bf16.msra.mxu1 %v8779_v35  ;;  %7901 = vmatprep.subr.bf16.mxu0 %v8780_v36  ;;  %v8839_v35 = vld [vmem:[%s11511_s1 + $0x490] sm:$0xff]   ;;  %v8840_v36 = vld [vmem:[%s11511_s1 + $0x458] sm:$0xff]  }
  0x5a   :  { %7923 = vmatprep.subr.bf16.mxu1 %v8781_v37  ;;  %v8841_v37 = vld [vmem:[%s11511_s1 + $0x4d8] sm:$0xff]  }
  0x5c   :  { %7902 = vmatpush3.bf16.msra.mxu0 %v8782_v38  ;;  %v8842_v38 = vld [vmem:[%s11511_s1 + $0x418] sm:$0xff]  }
  0x5d   :  { %7924 = vmatpush3.bf16.msra.mxu1 %v8783_v39  ;;  %7903 = vmatprep.subr.bf16.mxu0 %v8784_v40  ;;  %v8843_v39 = vld [vmem:[%s11511_s1 + $0x498] sm:$0xff]   ;;  %v8844_v40 = vld [vmem:[%s11511_s1 + $0x460] sm:$0xff]  }
  0x5e   :  { %7925 = vmatprep.subr.bf16.mxu1 %v8785_v41  ;;  %v8845_v41 = vld [vmem:[%s11511_s1 + $0x4e0] sm:$0xff]  }
  0x60   :  { %7904 = vmatpush3.bf16.msra.mxu0 %v8786_v42  ;;  %v8846_v42 = vld [vmem:[%s11511_s1 + $0x420] sm:$0xff]  }
  0x61   :  { %7926 = vmatpush3.bf16.msra.mxu1 %v8787_v43  ;;  %7933 = vmatprep.subr.bf16.mxu0 %v8792_v50  ;;  %v8847_v43 = vld [vmem:[%s11511_s1 + $0x4a0] sm:$0xff]   ;;  %v8854_v50 = vld [vmem:[%s11511_s1 + $0x430] sm:$0xff]  }
  0x62   :  { %7955 = vmatprep.subr.bf16.mxu1 %v8793_v51  ;;  %v8855_v51 = vld [vmem:[%s11511_s1 + $0x4b0] sm:$0xff]  }
  0x63   :  { %5655 = vmatmul.mubr.bf16.vlgmr.msra.gmra.mrb[8].mxu0 %v7089_v46  ;;  %v8850_v46 = vld [vmem:[%s11511_s1 + $0x428] sm:$0xff]  }
  0x64   :  { %5695 = vmatmul.mubr.bf16.vlgmr.msra.gmra.mrb[8].mxu1 %v7091_v48  ;;  %7934 = vmatpush3.bf16.msra.mxu0 %v8794_v52  ;;  %v8852_v48 = vld [vmem:[%s11511_s1 + $0x470] sm:$0xff]   ;;  %v8856_v52 = vld [vmem:[%s11511_s1 + $0x478] sm:$0xff]  }
  0x65   :  { %7956 = vmatpush3.bf16.msra.mxu1 %v8795_v53  ;;  %7935 = vmatprep.subr.bf16.mxu0 %v8796_v54  ;;  %v8857_v53 = vld [vmem:[%s11511_s1 + $0x4f8] sm:$0xff]  }
  0x66   :  { %7957 = vmatprep.subr.bf16.mxu1 %v8797_v55  ;;  %5734 = vmatprep.mubr.bf16.mxu0 %v7094_v21  ;;  %v8858_v54 = vld [vmem:[%s11511_s1 + $0x438] sm:$0xff]   ;;  %v8887_v21 = vld [vmem:[%s11511_s1 + $0x5a8] sm:$0xff]  }
  0x67   :  { %5774 = vmatprep.mubr.bf16.mxu1 %v7096_v24  ;;  %v8859_v55 = vld [vmem:[%s11511_s1 + $0x4b8] sm:$0xff]   ;;  %v8890_v24 = vld [vmem:[%s11511_s1 + $0x530] sm:$0xff]  }
  0x68   :  { %7936 = vmatpush3.bf16.msra.mxu0 %v8798_v56  ;;  %v30_v56 = vld [vmem:[%s11512_s0 + $0x40] sm:$0x77] }
  0x69   :  { %7958 = vmatpush3.bf16.msra.mxu1 %v8799_v57  ;;  %7937 = vmatprep.subr.bf16.mxu0 %v8800_v58  ;;  %v7097_v57 = vcombine.low %v30_v56, %v30_v56  ;;  %v7098_v58 = vcombine.high %v30_v56, %v30_v56  ;;  %v8920_v56 = vld [vmem:[%s11511_s1 + $0x668] sm:$0xff]  }
  0x6a   :  { %7959 = vmatprep.subr.bf16.mxu1 %v8801_v59  ;;  %v31_v59 = vld [vmem:[%s11512_s0 + $0x48] sm:$0x77] }
  0x6c   :  { %7938 = vmatpush3.bf16.msra.mxu0 %v8802_v60  ;;  %v7099_v60 = vcombine.low %v31_v59, %v31_v59 }
  0x6d   :  { %7960 = vmatpush3.bf16.msra.mxu1 %v8803_v61  ;;  %7939 = vmatprep.subr.bf16.mxu0 %v8804_v62  ;;  %v7100_v61 = vcombine.high %v31_v59, %v31_v59  ;;  %v8864_v62 = vld [vmem:[%s11511_s1 + $0x540] sm:$0xff]   ;;  %v8923_v59 = vld [vmem:[%s11511_s1 + $0x6a8] sm:$0xff]  }
  0x6e   :  { %7961 = vmatprep.subr.bf16.mxu1 %v8805_v63  ;;  %v8865_v63 = vld [vmem:[%s11511_s1 + $0x5c0] sm:$0xff]  }
  0x70   :  { %7940 = vmatpush3.bf16.msra.mxu0 %v8806_v0  ;;  %v8866_v0 = vld [vmem:[%s11511_s1 + $0x500] sm:$0xff]  }
  0x71   :  { %7962 = vmatpush3.bf16.msra.mxu1 %v8807_v1  ;;  %7941 = vmatprep.subr.bf16.mxu0 %v8808_v2  ;;  %v8867_v1 = vld [vmem:[%s11511_s1 + $0x580] sm:$0xff]   ;;  %v8868_v2 = vld [vmem:[%s11511_s1 + $0x548] sm:$0xff]  }
  0x72   :  { %7963 = vmatprep.subr.bf16.mxu1 %v8809_v3  ;;  %v8869_v3 = vld [vmem:[%s11511_s1 + $0x5c8] sm:$0xff]  }
  0x74   :  { %7942 = vmatpush3.bf16.msra.mxu0 %v8810_v4  ;;  %v8870_v4 = vld [vmem:[%s11511_s1 + $0x508] sm:$0xff]  }
  0x75   :  { %7964 = vmatpush3.bf16.msra.mxu1 %v8811_v5  ;;  %7943 = vmatprep.subr.bf16.mxu0 %v8812_v6  ;;  %v8871_v5 = vld [vmem:[%s11511_s1 + $0x588] sm:$0xff]   ;;  %v8872_v6 = vld [vmem:[%s11511_s1 + $0x550] sm:$0xff]  }
  0x76   :  { %7965 = vmatprep.subr.bf16.mxu1 %v8813_v7  ;;  %v8873_v7 = vld [vmem:[%s11511_s1 + $0x5d0] sm:$0xff]  }
  0x78   :  { %7944 = vmatpush3.bf16.msra.mxu0 %v8814_v8  ;;  %v8874_v8 = vld [vmem:[%s11511_s1 + $0x510] sm:$0xff]  }
  0x79   :  { %7966 = vmatpush3.bf16.msra.mxu1 %v8815_v9  ;;  %7945 = vmatprep.subr.bf16.mxu0 %v8816_v10  ;;  %v8875_v9 = vld [vmem:[%s11511_s1 + $0x590] sm:$0xff]   ;;  %v8876_v10 = vld [vmem:[%s11511_s1 + $0x558] sm:$0xff]  }
  0x7a   :  { %7967 = vmatprep.subr.bf16.mxu1 %v8817_v11  ;;  %v8877_v11 = vld [vmem:[%s11511_s1 + $0x5d8] sm:$0xff]  }
  0x7c   :  { %7946 = vmatpush3.bf16.msra.mxu0 %v8818_v12  ;;  %v8878_v12 = vld [vmem:[%s11511_s1 + $0x518] sm:$0xff]  }
  0x7d   :  { %7968 = vmatpush3.bf16.msra.mxu1 %v8819_v13  ;;  %7947 = vmatprep.subr.bf16.mxu0 %v8820_v14  ;;  %v8879_v13 = vld [vmem:[%s11511_s1 + $0x598] sm:$0xff]   ;;  %v8880_v14 = vld [vmem:[%s11511_s1 + $0x560] sm:$0xff]  }
  0x7e   :  { %7969 = vmatprep.subr.bf16.mxu1 %v8821_v15  ;;  %v8881_v15 = vld [vmem:[%s11511_s1 + $0x5e0] sm:$0xff]  }
  0x80   :  { %7948 = vmatpush3.bf16.msra.mxu0 %v8822_v16  ;;  %v8882_v16 = vld [vmem:[%s11511_s1 + $0x520] sm:$0xff]  }
  0x81   :  { %7970 = vmatpush3.bf16.msra.mxu1 %v8823_v17  ;;  %7977 = vmatprep.subr.bf16.mxu0 %v8828_v23  ;;  %v8883_v17 = vld [vmem:[%s11511_s1 + $0x5a0] sm:$0xff]   ;;  %v8889_v23 = vld [vmem:[%s11511_s1 + $0x5f0] sm:$0xff]  }
  0x82   :  { %7999 = vmatprep.subr.bf16.mxu1 %v8829_v25  ;;  %v8891_v25 = vld [vmem:[%s11511_s1 + $0x5b0] sm:$0xff]  }
  0x83   :  { %5735 = vmatmul.mubr.bf16.vlgmr.msra.gmra.mrb[12].mxu0 %v7093_v20  ;;  %v8886_v20 = vld [vmem:[%s11511_s1 + $0x528] sm:$0xff]  }
  0x84   :  { %5775 = vmatmul.mubr.bf16.vlgmr.msra.gmra.mrb[12].mxu1 %v7095_v22  ;;  %7978 = vmatpush3.bf16.msra.mxu0 %v8830_v26  ;;  %v8888_v22 = vld [vmem:[%s11511_s1 + $0x570] sm:$0xff]   ;;  %v8892_v26 = vld [vmem:[%s11511_s1 + $0x578] sm:$0xff]  }
  0x85   :  { %8000 = vmatpush3.bf16.msra.mxu1 %v8831_v27  ;;  %7979 = vmatprep.subr.bf16.mxu0 %v8832_v28  ;;  %v8893_v27 = vld [vmem:[%s11511_s1 + $0x5f8] sm:$0xff]  }
  0x86   :  { %8001 = vmatprep.subr.bf16.mxu1 %v8833_v29  ;;  %5814 = vmatprep.mubr.bf16.mxu0 %v7098_v58  ;;  %v8894_v28 = vld [vmem:[%s11511_s1 + $0x538] sm:$0xff]   ;;  %v8922_v58 = vld [vmem:[%s11511_s1 + $0x628] sm:$0xff]  }
  0x87   :  { %5854 = vmatprep.mubr.bf16.mxu1 %v7100_v61  ;;  %v8895_v29 = vld [vmem:[%s11511_s1 + $0x5b8] sm:$0xff]   ;;  %v8925_v61 = vld [vmem:[%s11511_s1 + $0x6f0] sm:$0xff]  }
  0x88   :  { %7980 = vmatpush3.bf16.msra.mxu0 %v8834_v30  ;;  %v32_v30 = vld [vmem:[%s11512_s0 + $0x50] sm:$0x77] }
  0x89   :  { %8002 = vmatpush3.bf16.msra.mxu1 %v8835_v31  ;;  %7981 = vmatprep.subr.bf16.mxu0 %v8836_v32  ;;  %v33_v31 = vld [vmem:[%s11512_s0 + $0x58] sm:$0x77]  ;;  %v7101_v32 = vcombine.low %v32_v30, %v32_v30 }
  0x8a   :  { %8003 = vmatprep.subr.bf16.mxu1 %v8837_v33  ;;  %v7102_v33 = vcombine.high %v32_v30, %v32_v30  ;;  %v8955_v30 = vld [vmem:[%s11511_s1 + $0x7a0] sm:$0xff]  }
  0x8c   :  { %7982 = vmatpush3.bf16.msra.mxu0 %v8838_v34  ;;  %v7103_v34 = vcombine.low %v33_v31, %v33_v31 }
  0x8d   :  { %8004 = vmatpush3.bf16.msra.mxu1 %v8839_v35  ;;  %7983 = vmatprep.subr.bf16.mxu0 %v8840_v36  ;;  %v7104_v35 = vcombine.high %v33_v31, %v33_v31  ;;  %v8900_v36 = vld [vmem:[%s11511_s1 + $0x640] sm:$0xff]  }
  0x8e   :  { %8005 = vmatprep.subr.bf16.mxu1 %v8841_v37  ;;  %v8901_v37 = vld [vmem:[%s11511_s1 + $0x6c0] sm:$0xff]  }
  0x90   :  { %7984 = vmatpush3.bf16.msra.mxu0 %v8842_v38  ;;  %v8902_v38 = vld [vmem:[%s11511_s1 + $0x600] sm:$0xff]  }
  0x91   :  { %8006 = vmatpush3.bf16.msra.mxu1 %v8843_v39  ;;  %7985 = vmatprep.subr.bf16.mxu0 %v8844_v40  ;;  %v8903_v39 = vld [vmem:[%s11511_s1 + $0x680] sm:$0xff]   ;;  %v8904_v40 = vld [vmem:[%s11511_s1 + $0x648] sm:$0xff]  }
  0x92   :  { %8007 = vmatprep.subr.bf16.mxu1 %v8845_v41  ;;  %v8905_v41 = vld [vmem:[%s11511_s1 + $0x6c8] sm:$0xff]  }
  0x94   :  { %7986 = vmatpush3.bf16.msra.mxu0 %v8846_v42  ;;  %v8906_v42 = vld [vmem:[%s11511_s1 + $0x608] sm:$0xff]  }
  0x95   :  { %8008 = vmatpush3.bf16.msra.mxu1 %v8847_v43  ;;  %7987 = vmatprep.subr.bf16.mxu0 %v8848_v44  ;;  %v8907_v43 = vld [vmem:[%s11511_s1 + $0x688] sm:$0xff]   ;;  %v8908_v44 = vld [vmem:[%s11511_s1 + $0x650] sm:$0xff]  }
  0x96   :  { %8009 = vmatprep.subr.bf16.mxu1 %v8849_v45  ;;  %v8909_v45 = vld [vmem:[%s11511_s1 + $0x6d0] sm:$0xff]  }
  0x98   :  { %7988 = vmatpush3.bf16.msra.mxu0 %v8850_v46  ;;  %v8910_v46 = vld [vmem:[%s11511_s1 + $0x610] sm:$0xff]  }
  0x99   :  { %8010 = vmatpush3.bf16.msra.mxu1 %v8851_v47  ;;  %7989 = vmatprep.subr.bf16.mxu0 %v8852_v48  ;;  %v8911_v47 = vld [vmem:[%s11511_s1 + $0x690] sm:$0xff]   ;;  %v8912_v48 = vld [vmem:[%s11511_s1 + $0x658] sm:$0xff]  }
  0x9a   :  { %8011 = vmatprep.subr.bf16.mxu1 %v8853_v49  ;;  %v8913_v49 = vld [vmem:[%s11511_s1 + $0x6d8] sm:$0xff]  }
  0x9c   :  { %7990 = vmatpush3.bf16.msra.mxu0 %v8854_v50  ;;  %v8914_v50 = vld [vmem:[%s11511_s1 + $0x618] sm:$0xff]  }
  0x9d   :  { %8012 = vmatpush3.bf16.msra.mxu1 %v8855_v51  ;;  %7991 = vmatprep.subr.bf16.mxu0 %v8856_v52  ;;  %v8915_v51 = vld [vmem:[%s11511_s1 + $0x698] sm:$0xff]   ;;  %v8916_v52 = vld [vmem:[%s11511_s1 + $0x660] sm:$0xff]  }
  0x9e   :  { %8013 = vmatprep.subr.bf16.mxu1 %v8857_v53  ;;  %v8917_v53 = vld [vmem:[%s11511_s1 + $0x6e0] sm:$0xff]  }
  0xa0   :  { %7992 = vmatpush3.bf16.msra.mxu0 %v8858_v54  ;;  %v8918_v54 = vld [vmem:[%s11511_s1 + $0x620] sm:$0xff]  }
  0xa1   :  { %8014 = vmatpush3.bf16.msra.mxu1 %v8859_v55  ;;  %8021 = vmatprep.subr.bf16.mxu0 %v8864_v62  ;;  %v8919_v55 = vld [vmem:[%s11511_s1 + $0x6a0] sm:$0xff]   ;;  %v8926_v62 = vld [vmem:[%s11511_s1 + $0x630] sm:$0xff]  }
  0xa2   :  { %8043 = vmatprep.subr.bf16.mxu1 %v8865_v63  ;;  %v8927_v63 = vld [vmem:[%s11511_s1 + $0x6b0] sm:$0xff]  }
  0xa3   :  { %5815 = vmatmul.mubr.bf16.vlgmr.msra.gmra.mrb[16].mxu0 %v7097_v57  ;;  %v8921_v57 = vld [vmem:[%s11511_s1 + $0x6e8] sm:$0xff]  }
  0xa4   :  { %5855 = vmatmul.mubr.bf16.vlgmr.msra.gmra.mrb[16].mxu1 %v7099_v60  ;;  %8022 = vmatpush3.bf16.msra.mxu0 %v8866_v0  ;;  %v8924_v60 = vld [vmem:[%s11511_s1 + $0x670] sm:$0xff]   ;;  %v8928_v0 = vld [vmem:[%s11511_s1 + $0x678] sm:$0xff]  }
  0xa5   :  { %8044 = vmatpush3.bf16.msra.mxu1 %v8867_v1  ;;  %8023 = vmatprep.subr.bf16.mxu0 %v8868_v2  ;;  %v8929_v1 = vld [vmem:[%s11511_s1 + $0x6f8] sm:$0xff]  }
  0xa6   :  { %8045 = vmatprep.subr.bf16.mxu1 %v8869_v3  ;;  %5894 = vmatprep.mubr.bf16.mxu0 %v7102_v33  ;;  %v8930_v2 = vld [vmem:[%s11511_s1 + $0x638] sm:$0xff]   ;;  %v8956_v33 = vld [vmem:[%s11511_s1 + $0x768] sm:$0xff]  }
  0xa7   :  { %5934 = vmatprep.mubr.bf16.mxu1 %v7104_v35  ;;  %v8931_v3 = vld [vmem:[%s11511_s1 + $0x6b8] sm:$0xff]  }
  0xa8   :  { %8024 = vmatpush3.bf16.msra.mxu0 %v8870_v4  ;;  %v34_v4 = vld [vmem:[%s11512_s0 + $0x60] sm:$0x77] }
  0xa9   :  { %8046 = vmatpush3.bf16.msra.mxu1 %v8871_v5  ;;  %8025 = vmatprep.subr.bf16.mxu0 %v8872_v6  ;;  %v35_v5 = vld [vmem:[%s11512_s0 + $0x68] sm:$0x77]  ;;  %v7105_v6 = vcombine.low %v34_v4, %v34_v4 }
  0xaa   :  { %8047 = vmatprep.subr.bf16.mxu1 %v8873_v7  ;;  %v7106_v7 = vcombine.high %v34_v4, %v34_v4  ;;  %v8981_v4 = vld [vmem:[%s11511_s1 + $0x8d0] sm:$0xff]  }
  0xac   :  { %8026 = vmatpush3.bf16.msra.mxu0 %v8874_v8  ;;  %v7107_v8 = vcombine.low %v35_v5, %v35_v5 }
  0xad   :  { %8048 = vmatpush3.bf16.msra.mxu1 %v8875_v9  ;;  %8027 = vmatprep.subr.bf16.mxu0 %v8876_v10  ;;  %v8936_v9 = vld [vmem:[%s11511_s1 + $0x740] sm:$0xff]   ;;  %v7108_v10 = vcombine.high %v35_v5, %v35_v5  ;;  %v8982_v5 = vld [vmem:[%s11511_s1 + $0x810] sm:$0xff]  }
  0xae   :  { %8049 = vmatprep.subr.bf16.mxu1 %v8877_v11  ;;  %v8937_v11 = vld [vmem:[%s11511_s1 + $0x7c0] sm:$0xff]  }
  0xb0   :  { %8028 = vmatpush3.bf16.msra.mxu0 %v8878_v12  ;;  %v8938_v12 = vld [vmem:[%s11511_s1 + $0x700] sm:$0xff]  }
  0xb1   :  { %8050 = vmatpush3.bf16.msra.mxu1 %v8879_v13  ;;  %8029 = vmatprep.subr.bf16.mxu0 %v8880_v14  ;;  %v8939_v13 = vld [vmem:[%s11511_s1 + $0x780] sm:$0xff]   ;;  %v8940_v14 = vld [vmem:[%s11511_s1 + $0x748] sm:$0xff]  }
  0xb2   :  { %8051 = vmatprep.subr.bf16.mxu1 %v8881_v15  ;;  %v8941_v15 = vld [vmem:[%s11511_s1 + $0x7c8] sm:$0xff]  }
  0xb4   :  { %8030 = vmatpush3.bf16.msra.mxu0 %v8882_v16  ;;  %v8942_v16 = vld [vmem:[%s11511_s1 + $0x708] sm:$0xff]  }
  0xb5   :  { %8052 = vmatpush3.bf16.msra.mxu1 %v8883_v17  ;;  %8031 = vmatprep.subr.bf16.mxu0 %v8884_v18  ;;  %v8943_v17 = vld [vmem:[%s11511_s1 + $0x788] sm:$0xff]   ;;  %v8944_v18 = vld [vmem:[%s11511_s1 + $0x750] sm:$0xff]  }
  0xb6   :  { %8053 = vmatprep.subr.bf16.mxu1 %v8885_v19  ;;  %v8945_v19 = vld [vmem:[%s11511_s1 + $0x7d0] sm:$0xff]  }
  0xb8   :  { %8032 = vmatpush3.bf16.msra.mxu0 %v8886_v20  ;;  %v8946_v20 = vld [vmem:[%s11511_s1 + $0x710] sm:$0xff]  }
  0xb9   :  { %8054 = vmatpush3.bf16.msra.mxu1 %v8887_v21  ;;  %8033 = vmatprep.subr.bf16.mxu0 %v8888_v22  ;;  %v8947_v21 = vld [vmem:[%s11511_s1 + $0x790] sm:$0xff]   ;;  %v8948_v22 = vld [vmem:[%s11511_s1 + $0x758] sm:$0xff]  }
  0xba   :  { %8055 = vmatprep.subr.bf16.mxu1 %v8889_v23  ;;  %v8949_v23 = vld [vmem:[%s11511_s1 + $0x7d8] sm:$0xff]  }
  0xbc   :  { %8034 = vmatpush3.bf16.msra.mxu0 %v8890_v24  ;;  %v8950_v24 = vld [vmem:[%s11511_s1 + $0x718] sm:$0xff]  }
  0xbd   :  { %8056 = vmatpush3.bf16.msra.mxu1 %v8891_v25  ;;  %8035 = vmatprep.subr.bf16.mxu0 %v8892_v26  ;;  %v8951_v25 = vld [vmem:[%s11511_s1 + $0x798] sm:$0xff]   ;;  %v8952_v26 = vld [vmem:[%s11511_s1 + $0x760] sm:$0xff]  }
  0xbe   :  { %8057 = vmatprep.subr.bf16.mxu1 %v8893_v27  ;;  %v8953_v27 = vld [vmem:[%s11511_s1 + $0x7e0] sm:$0xff]  }
  0xc0   :  { %8036 = vmatpush3.bf16.msra.mxu0 %v8894_v28  ;;  %v8954_v28 = vld [vmem:[%s11511_s1 + $0x720] sm:$0xff]  }
  0xc1   :  { %8058 = vmatpush3.bf16.msra.mxu1 %v8895_v29  ;;  %8065 = vmatprep.subr.bf16.mxu0 %v8900_v36  ;;  %v8957_v36 = vld [vmem:[%s11511_s1 + $0x7e8] sm:$0xff]  }
  0xc2   :  { %8087 = vmatprep.subr.bf16.mxu1 %v8901_v37 }
  0xc3   :  { %5895 = vmatmul.mubr.bf16.vlgmr.msra.gmra.mrb[20].mxu0 %v7101_v32 }
  0xc4   :  { %5935 = vmatmul.mubr.bf16.vlgmr.msra.gmra.mrb[20].mxu1 %v7103_v34  ;;  %8066 = vmatpush3.bf16.msra.mxu0 %v8902_v38 }
  0xc5   :  { %8088 = vmatpush3.bf16.msra.mxu1 %v8903_v39  ;;  %8067 = vmatprep.subr.bf16.mxu0 %v8904_v40  ;;  %v8958_v40 = vld [vmem:[%s11511_s1 + $0x728] sm:$0xff]  }
  0xc6   :  { %8089 = vmatprep.subr.bf16.mxu1 %v8905_v41  ;;  %5974 = vmatprep.mubr.bf16.mxu0 %v7106_v7  ;;  %v8984_v7 = vld [vmem:[%s11511_s1 + $0x858] sm:$0xff]  }
  0xc7   :  { %6014 = vmatprep.mubr.bf16.mxu1 %v7108_v10  ;;  %v8987_v10 = vld [vmem:[%s11511_s1 + $0x898] sm:$0xff]  }
  0xc8   :  { %8068 = vmatpush3.bf16.msra.mxu0 %v8906_v42 }
  0xc9   :  { %8090 = vmatpush3.bf16.msra.mxu1 %v8907_v43  ;;  %8069 = vmatprep.subr.bf16.mxu0 %v8908_v44  ;;  %v8959_v43 = vld [vmem:[%s11511_s1 + $0x7a8] sm:$0xff]  }
  0xca   :  { %8091 = vmatprep.subr.bf16.mxu1 %v8909_v45  ;;  %v8960_v45 = vld [vmem:[%s11511_s1 + $0x770] sm:$0xff]  }
  0xcc   :  { %8070 = vmatpush3.bf16.msra.mxu0 %v8910_v46  ;;  %v8961_v46 = vld [vmem:[%s11511_s1 + $0x7f0] sm:$0xff]  }
  0xcd   :  { %8092 = vmatpush3.bf16.msra.mxu1 %v8911_v47  ;;  %8071 = vmatprep.subr.bf16.mxu0 %v8912_v48  ;;  %v8962_v47 = vld [vmem:[%s11511_s1 + $0x730] sm:$0xff]  }
  0xce   :  { %8093 = vmatprep.subr.bf16.mxu1 %v8913_v49  ;;  %v8963_v48 = vld [vmem:[%s11511_s1 + $0x7b0] sm:$0xff]   ;;  %v8964_v49 = vld [vmem:[%s11511_s1 + $0x778] sm:$0xff]  }
  0xd0   :  { %8072 = vmatpush3.bf16.msra.mxu0 %v8914_v50  ;;  %v8965_v50 = vld [vmem:[%s11511_s1 + $0x7f8] sm:$0xff]  }
  0xd1   :  { %8094 = vmatpush3.bf16.msra.mxu1 %v8915_v51  ;;  %8073 = vmatprep.subr.bf16.mxu0 %v8916_v52  ;;  %v8966_v51 = vld [vmem:[%s11511_s1 + $0x738] sm:$0xff]  }
  0xd2   :  { %8095 = vmatprep.subr.bf16.mxu1 %v8917_v53  ;;  %v8967_v52 = vld [vmem:[%s11511_s1 + $0x7b8] sm:$0xff]   ;;  %v36_v53 = vld [vmem:[%s11512_s0 + $0x70] sm:$0x77] }
  0xd4   :  { %8074 = vmatpush3.bf16.msra.mxu0 %v8918_v54  ;;  %v37_v54 = vld [vmem:[%s11512_s0 + $0x78] sm:$0x77] }
  0xd5   :  { %8096 = vmatpush3.bf16.msra.mxu1 %v8919_v55  ;;  %8075 = vmatprep.subr.bf16.mxu0 %v8920_v56  ;;  %v7109_v55 = vcombine.low %v36_v53, %v36_v53  ;;  %v7110_v56 = vcombine.high %v36_v53, %v36_v53  ;;  %v9016_v53 = vld [vmem:[%s11511_s1 + $0x950] sm:$0xff]  }
  0xd6   :  { %8097 = vmatprep.subr.bf16.mxu1 %v8921_v57  ;;  %v7111_v57 = vcombine.low %v37_v54, %v37_v54 }
  0xd8   :  { %8076 = vmatpush3.bf16.msra.mxu0 %v8922_v58  ;;  %v8972_v58 = vld [vmem:[%s11511_s1 + $0x840] sm:$0xff]  }
  0xd9   :  { %8098 = vmatpush3.bf16.msra.mxu1 %v8923_v59  ;;  %8077 = vmatprep.subr.bf16.mxu0 %v8924_v60  ;;  %v7112_v59 = vcombine.high %v37_v54, %v37_v54  ;;  %v8973_v60 = vld [vmem:[%s11511_s1 + $0x8c0] sm:$0xff]   ;;  %v9017_v54 = vld [vmem:[%s11511_s1 + $0x9d0] sm:$0xff]  }
  0xda   :  { %8099 = vmatprep.subr.bf16.mxu1 %v8925_v61  ;;  %v8974_v61 = vld [vmem:[%s11511_s1 + $0x800] sm:$0xff]  }
  0xdc   :  { %8078 = vmatpush3.bf16.msra.mxu0 %v8926_v62  ;;  %v8975_v62 = vld [vmem:[%s11511_s1 + $0x880] sm:$0xff]  }
  0xdd   :  { %8100 = vmatpush3.bf16.msra.mxu1 %v8927_v63  ;;  %8079 = vmatprep.subr.bf16.mxu0 %v8928_v0  ;;  %v8976_v63 = vld [vmem:[%s11511_s1 + $0x848] sm:$0xff]  }
  0xde   :  { %8101 = vmatprep.subr.bf16.mxu1 %v8929_v1  ;;  %v8977_v0 = vld [vmem:[%s11511_s1 + $0x8c8] sm:$0xff]  }
  0xdf   :  { %v8978_v1 = vld [vmem:[%s11511_s1 + $0x808] sm:$0xff]  }
  0xe0   :  { %8080 = vmatpush3.bf16.msra.mxu0 %v8930_v2  ;;  %v8979_v2 = vld [vmem:[%s11511_s1 + $0x888] sm:$0xff]  }
  0xe1   :  { %8102 = vmatpush3.bf16.msra.mxu1 %v8931_v3  ;;  %8109 = vmatprep.subr.bf16.mxu0 %v8936_v9  ;;  %v8980_v3 = vld [vmem:[%s11511_s1 + $0x850] sm:$0xff]   ;;  %v8986_v9 = vld [vmem:[%s11511_s1 + $0x818] sm:$0xff]  }
  0xe2   :  { %8131 = vmatprep.subr.bf16.mxu1 %v8937_v11  ;;  %v8988_v11 = vld [vmem:[%s11511_s1 + $0x860] sm:$0xff]  }
  0xe3   :  { %5975 = vmatmul.mubr.bf16.vlgmr.msra.gmra.mrb[24].mxu0 %v7105_v6  ;;  %v8983_v6 = vld [vmem:[%s11511_s1 + $0x890] sm:$0xff]  }
  0xe4   :  { %6015 = vmatmul.mubr.bf16.vlgmr.msra.gmra.mrb[24].mxu1 %v7107_v8  ;;  %8110 = vmatpush3.bf16.msra.mxu0 %v8938_v12  ;;  %v8985_v8 = vld [vmem:[%s11511_s1 + $0x8d8] sm:$0xff]   ;;  %v8989_v12 = vld [vmem:[%s11511_s1 + $0x8e0] sm:$0xff]  }
  0xe5   :  { %8132 = vmatpush3.bf16.msra.mxu1 %v8939_v13  ;;  %8111 = vmatprep.subr.bf16.mxu0 %v8940_v14  ;;  %v8990_v13 = vld [vmem:[%s11511_s1 + $0x820] sm:$0xff]  }
  0xe6   :  { %8133 = vmatprep.subr.bf16.mxu1 %v8941_v15  ;;  %6054 = vmatprep.mubr.bf16.mxu0 %v7110_v56  ;;  %v8991_v15 = vld [vmem:[%s11511_s1 + $0x8a0] sm:$0xff]   ;;  %v9019_v56 = vld [vmem:[%s11511_s1 + $0x990] sm:$0xff]  }
  0xe7   :  { %6094 = vmatprep.mubr.bf16.mxu1 %v7112_v59  ;;  %v9022_v59 = vld [vmem:[%s11511_s1 + $0x918] sm:$0xff]  }
  0xe8   :  { %8112 = vmatpush3.bf16.msra.mxu0 %v8942_v16 }
  0xe9   :  { %8134 = vmatpush3.bf16.msra.mxu1 %v8943_v17  ;;  %8113 = vmatprep.subr.bf16.mxu0 %v8944_v18  ;;  %v8992_v18 = vld [vmem:[%s11511_s1 + $0x868] sm:$0xff]  }
  0xea   :  { %8135 = vmatprep.subr.bf16.mxu1 %v8945_v19 }
  0xec   :  { %8114 = vmatpush3.bf16.msra.mxu0 %v8946_v20 }
  0xed   :  { %8136 = vmatpush3.bf16.msra.mxu1 %v8947_v21  ;;  %8115 = vmatprep.subr.bf16.mxu0 %v8948_v22  ;;  %v8993_v21 = vld [vmem:[%s11511_s1 + $0x8e8] sm:$0xff]  }
  0xee   :  { %8137 = vmatprep.subr.bf16.mxu1 %v8949_v23 }
  0xf0   :  { %8116 = vmatpush3.bf16.msra.mxu0 %v8950_v24 }
  0xf1   :  { %8138 = vmatpush3.bf16.msra.mxu1 %v8951_v25  ;;  %8117 = vmatprep.subr.bf16.mxu0 %v8952_v26  ;;  %v8994_v26 = vld [vmem:[%s11511_s1 + $0x828] sm:$0xff]  }
  0xf2   :  { %8139 = vmatprep.subr.bf16.mxu1 %v8953_v27 }
  0xf4   :  { %8118 = vmatpush3.bf16.msra.mxu0 %v8954_v28  ;;  %v8995_v28 = vld [vmem:[%s11511_s1 + $0x8a8] sm:$0xff]  }
  0xf5   :  { %8140 = vmatpush3.bf16.msra.mxu1 %v8955_v30  ;;  %8119 = vmatprep.subr.bf16.mxu0 %v8956_v33  ;;  %v8998_v33 = vld [vmem:[%s11511_s1 + $0x830] sm:$0xff]  }
  0xf6   :  { %v7817_v29 = vpop.f32.mrb[0].mxu0  ;;  %8141 = vmatprep.subr.bf16.mxu1 %v8957_v36  ;;  %v9001_v36 = vld [vmem:[%s11511_s1 + $0x8f8] sm:$0xff]  }
  0xf7   :  { %v7839_v31 = vpop.f32.mrb[0].mxu1  ;;  %v7818_v32 = vpop.f32.mrb[1].mxu0 }
  0xf8   :  { %v7819_v34 = vadd.f32 %v7818_v32, %v7817_v29  ;;  %v7840_v35 = vpop.f32.mrb[1].mxu1  ;;  %v7820_v38 = vpop.f32.mrb[2].mxu0  ;;  %8120 = vmatpush3.bf16.msra.mxu0 %v8958_v40  ;;  %v8997_v32 = vld [vmem:[%s11511_s1 + $0x8f0] sm:$0xff]   ;;  %v39_v40 = vld [vmem:[%s11512_s0 + $0x88] sm:$0x77] }
  0xf9   :  { %v7841_v37 = vadd.f32 %v7840_v35, %v7839_v31  ;;  %v7842_v39 = vpop.f32.mrb[2].mxu1  ;;  %v7821_v41 = vpop.f32.mrb[3].mxu0  ;;  %8142 = vmatpush3.bf16.msra.mxu1 %v8959_v43  ;;  %8121 = vmatprep.subr.bf16.mxu0 %v8960_v45  ;;  %v8996_v31 = vld [vmem:[%s11511_s1 + $0x870] sm:$0xff]   ;;  %v9000_v35 = vld [vmem:[%s11511_s1 + $0x878] sm:$0xff]   ;;  %v7115_v43 = vcombine.low %v39_v40, %v39_v40  ;;  %v7116_v45 = vcombine.high %v39_v40, %v39_v40 }
  0xfa   :  { %v7843_v44 = vpop.f32.mrb[3].mxu1  ;;  %8143 = vmatprep.subr.bf16.mxu1 %v8961_v46  ;;  %v9003_v38 = vld [vmem:[%s11511_s1 + $0x8b8] sm:$0xff]   ;;  %v38_v39 = vld [vmem:[%s11512_s0 + $0x80] sm:$0x77]  ;;  %v9053_v40 = vld [vmem:[%s11511_s1 + $0xad0] sm:$0xff]  }
  0xfb   :  { %v10209_v42 = vadd.f32 %v7841_v37, %v7819_v34  ;;  %v8999_v34 = vld [vmem:[%s11511_s1 + $0x8b0] sm:$0xff]   ;;  %v9002_v37 = vld [vmem:[%s11511_s1 + $0x838] sm:$0xff]   ;;  %v7113_v41 = vcombine.low %v38_v39, %v38_v39  ;;  %v9008_v44 = vld [vmem:[%s11511_s1 + $0x940] sm:$0xff]  }
  0xfc   :  { %8122 = vmatpush3.bf16.msra.mxu0 %v8962_v47  ;;  %v9009_v46 = vld [vmem:[%s11511_s1 + $0x9c0] sm:$0xff]  }
  0xfd   :  { %8144 = vmatpush3.bf16.msra.mxu1 %v8963_v48  ;;  %8123 = vmatprep.subr.bf16.mxu0 %v8964_v49  ;;  %v9010_v47 = vld [vmem:[%s11511_s1 + $0x900] sm:$0xff]   ;;  %v9012_v49 = vld [vmem:[%s11511_s1 + $0x948] sm:$0xff]  }
  0xfe   :  { %8145 = vmatprep.subr.bf16.mxu1 %v8965_v50  ;;  %v9011_v48 = vld [vmem:[%s11511_s1 + $0x980] sm:$0xff]   ;;  %v9013_v50 = vld [vmem:[%s11511_s1 + $0x9c8] sm:$0xff]  }
 0x100   :  { %8124 = vmatpush3.bf16.msra.mxu0 %v8966_v51  ;;  %v9014_v51 = vld [vmem:[%s11511_s1 + $0x908] sm:$0xff]  }
 0x101   :  { %8146 = vmatpush3.bf16.msra.mxu1 %v8967_v52  ;;  %8153 = vmatprep.subr.bf16.mxu0 %v8972_v58  ;;  %v9015_v52 = vld [vmem:[%s11511_s1 + $0x988] sm:$0xff]   ;;  %v9021_v58 = vld [vmem:[%s11511_s1 + $0x9d8] sm:$0xff]  }
 0x102   :  { %8175 = vmatprep.subr.bf16.mxu1 %v8973_v60  ;;  %v9023_v60 = vld [vmem:[%s11511_s1 + $0x998] sm:$0xff]  }
 0x103   :  { %6055 = vmatmul.mubr.bf16.vlgmr.msra.gmra.mrb[28].mxu0 %v7109_v55  ;;  %v9018_v55 = vld [vmem:[%s11511_s1 + $0x910] sm:$0xff]  }
 0x104   :  { %6095 = vmatmul.mubr.bf16.vlgmr.msra.gmra.mrb[28].mxu1 %v7111_v57  ;;  %8154 = vmatpush3.bf16.msra.mxu0 %v8974_v61  ;;  %v9020_v57 = vld [vmem:[%s11511_s1 + $0x958] sm:$0xff]   ;;  %v9024_v61 = vld [vmem:[%s11511_s1 + $0x960] sm:$0xff]  }
 0x105   :  { %8176 = vmatpush3.bf16.msra.mxu1 %v8975_v62  ;;  %8155 = vmatprep.subr.bf16.mxu0 %v8976_v63  ;;  %v9025_v62 = vld [vmem:[%s11511_s1 + $0x9e0] sm:$0xff]  }
 0x106   :  { %8177 = vmatprep.subr.bf16.mxu1 %v8977_v0  ;;  %6174 = vmatprep.mubr.bf16.mxu1 %v7116_v45  ;;  %v9026_v0 = vld [vmem:[%s11511_s1 + $0x920] sm:$0xff]   ;;  %v9058_v45 = vld [vmem:[%s11511_s1 + $0xa18] sm:$0xff]  }
 0x108   :  { %8156 = vmatpush3.bf16.msra.mxu0 %v8978_v1 }
 0x109   :  { %8178 = vmatpush3.bf16.msra.mxu1 %v8979_v2  ;;  %8157 = vmatprep.subr.bf16.mxu0 %v8980_v3  ;;  %v9027_v2 = vld [vmem:[%s11511_s1 + $0x9a0] sm:$0xff]  }
 0x10a   :  { %8179 = vmatprep.subr.bf16.mxu1 %v8981_v4 }
 0x10c   :  { %8158 = vmatpush3.bf16.msra.mxu0 %v8982_v5  ;;  %v9028_v5 = vld [vmem:[%s11511_s1 + $0x968] sm:$0xff]  }
 0x10d   :  { %8180 = vmatpush3.bf16.msra.mxu1 %v8983_v6  ;;  %8159 = vmatprep.subr.bf16.mxu0 %v8984_v7 }
 0x10e   :  { %8181 = vmatprep.subr.bf16.mxu1 %v8985_v8  ;;  %v9029_v8 = vld [vmem:[%s11511_s1 + $0x9e8] sm:$0xff]  }
 0x110   :  { %8160 = vmatpush3.bf16.msra.mxu0 %v8986_v9 }
 0x111   :  { %8182 = vmatpush3.bf16.msra.mxu1 %v8987_v10  ;;  %8161 = vmatprep.subr.bf16.mxu0 %v8988_v11  ;;  %v9030_v11 = vld [vmem:[%s11511_s1 + $0x928] sm:$0xff]  }
 0x112   :  { %8183 = vmatprep.subr.bf16.mxu1 %v8989_v12 }
 0x114   :  { %8162 = vmatpush3.bf16.msra.mxu0 %v8990_v13  ;;  %v9031_v13 = vld [vmem:[%s11511_s1 + $0x9a8] sm:$0xff]  }
 0x115   :  { %8184 = vmatpush3.bf16.msra.mxu1 %v8991_v15  ;;  %8163 = vmatprep.subr.bf16.mxu0 %v8992_v18  ;;  %v9033_v18 = vld [vmem:[%s11511_s1 + $0x9f0] sm:$0xff]  }
 0x116   :  { %v7861_v14 = vpop.f32.mrb[4].mxu0  ;;  %8185 = vmatprep.subr.bf16.mxu1 %v8993_v21  ;;  %v9036_v21 = vld [vmem:[%s11511_s1 + $0x978] sm:$0xff]  }
 0x117   :  { %v7883_v16 = vpop.f32.mrb[4].mxu1  ;;  %v7862_v17 = vpop.f32.mrb[5].mxu0 }
 0x118   :  { %v7863_v19 = vadd.f32 %v7862_v17, %v7861_v14  ;;  %v7884_v20 = vpop.f32.mrb[5].mxu1  ;;  %v7864_v23 = vpop.f32.mrb[6].mxu0  ;;  %8164 = vmatpush3.bf16.msra.mxu0 %v8994_v26 }
 0x119   :  { %v7885_v22 = vadd.f32 %v7884_v20, %v7883_v16  ;;  %v7886_v24 = vpop.f32.mrb[6].mxu1  ;;  %v7865_v27 = vpop.f32.mrb[7].mxu0  ;;  %8186 = vmatpush3.bf16.msra.mxu1 %v8995_v28  ;;  %8165 = vmatprep.subr.bf16.mxu0 %v8996_v31  ;;  %v9032_v16 = vld [vmem:[%s11511_s1 + $0x970] sm:$0xff]   ;;  %v9038_v23 = vld [vmem:[%s11511_s1 + $0x938] sm:$0xff]   ;;  %v9044_v31 = vld [vmem:[%s11511_s1 + $0xa40] sm:$0xff]  }
 0x11a   :  { %v5577_v25 = vadd.f32 %v7863_v19, %v10209_v42  ;;  %v7887_v29 = vpop.f32.mrb[7].mxu1  ;;  %8187 = vmatprep.subr.bf16.mxu1 %v8997_v32  ;;  %v7114_v42 = vcombine.high %v38_v39, %v38_v39  ;;  %v9034_v19 = vld [vmem:[%s11511_s1 + $0x930] sm:$0xff]   ;;  %v9039_v24 = vld [vmem:[%s11511_s1 + $0x9b8] sm:$0xff]   ;;  %v9045_v32 = vld [vmem:[%s11511_s1 + $0xac0] sm:$0xff]  }
 0x11b   :  { %v9035_v20 = vld [vmem:[%s11511_s1 + $0x9b0] sm:$0xff]   ;;  %v41_v28 = vld [vmem:[%s11512_s0 + $0x98] sm:$0x77] }
 0x11c   :  { %v10317_v30 = vadd.f32 %v7885_v22, %v5577_v25  ;;  %8166 = vmatpush3.bf16.msra.mxu0 %v8998_v33  ;;  %6134 = vmatprep.mubr.bf16.mxu0 %v7114_v42  ;;  %v9037_v22 = vld [vmem:[%s11511_s1 + $0x9f8] sm:$0xff]   ;;  %v40_v25 = vld [vmem:[%s11512_s0 + $0x90] sm:$0x77]  ;;  %v7119_v29 = vcombine.low %v41_v28, %v41_v28  ;;  %v9046_v33 = vld [vmem:[%s11511_s1 + $0xa00] sm:$0xff]  }
 0x11d   :  { %8188 = vmatpush3.bf16.msra.mxu1 %v8999_v34  ;;  %8167 = vmatprep.subr.bf16.mxu0 %v9000_v35  ;;  %v7117_v26 = vcombine.low %v40_v25, %v40_v25  ;;  %v7118_v27 = vcombine.high %v40_v25, %v40_v25  ;;  %v9047_v34 = vld [vmem:[%s11511_s1 + $0xa80] sm:$0xff]   ;;  %v9048_v35 = vld [vmem:[%s11511_s1 + $0xa48] sm:$0xff]   ;;  %v9052_v39 = vld [vmem:[%s11511_s1 + $0xa50] sm:$0xff]  }
 0x11e   :  { %8189 = vmatprep.subr.bf16.mxu1 %v9001_v36  ;;  %v9049_v36 = vld [vmem:[%s11511_s1 + $0xac8] sm:$0xff]   ;;  %v9055_v42 = vld [vmem:[%s11511_s1 + $0xa90] sm:$0xff]  }
 0x11f   :  { %v9088_v25 = vld [vmem:[%s11511_s1 + $0xb50] sm:$0xff]  }
 0x120   :  { %8168 = vmatpush3.bf16.msra.mxu0 %v9002_v37  ;;  %v9050_v37 = vld [vmem:[%s11511_s1 + $0xa08] sm:$0xff]  }
 0x121   :  { %8190 = vmatpush3.bf16.msra.mxu1 %v9003_v38  ;;  %8197 = vmatprep.subr.bf16.mxu0 %v9008_v44  ;;  %v9051_v38 = vld [vmem:[%s11511_s1 + $0xa88] sm:$0xff]   ;;  %v9057_v44 = vld [vmem:[%s11511_s1 + $0xad8] sm:$0xff]  }
 0x122   :  { %8219 = vmatprep.subr.bf16.mxu1 %v9009_v46  ;;  %v9059_v46 = vld [vmem:[%s11511_s1 + $0xa98] sm:$0xff]  }
 0x123   :  { %6135 = vmatmul.mubr.bf16.vlgmr.msra.gmra.mrb[32].mxu0 %v7113_v41  ;;  %v9054_v41 = vld [vmem:[%s11511_s1 + $0xa10] sm:$0xff]  }
 0x124   :  { %6175 = vmatmul.mubr.bf16.vlgmr.msra.gmra.mrb[32].mxu1 %v7115_v43  ;;  %8198 = vmatpush3.bf16.msra.mxu0 %v9010_v47  ;;  %v9056_v43 = vld [vmem:[%s11511_s1 + $0xa58] sm:$0xff]   ;;  %v9060_v47 = vld [vmem:[%s11511_s1 + $0xa60] sm:$0xff]  }
 0x125   :  { %8220 = vmatpush3.bf16.msra.mxu1 %v9011_v48  ;;  %8199 = vmatprep.subr.bf16.mxu0 %v9012_v49  ;;  %v9061_v48 = vld [vmem:[%s11511_s1 + $0xae0] sm:$0xff]  }
 0x126   :  { %8221 = vmatprep.subr.bf16.mxu1 %v9013_v50  ;;  %6214 = vmatprep.mubr.bf16.mxu0 %v7118_v27  ;;  %v9062_v50 = vld [vmem:[%s11511_s1 + $0xa20] sm:$0xff]   ;;  %v9090_v27 = vld [vmem:[%s11511_s1 + $0xb10] sm:$0xff]  }
 0x128   :  { %8200 = vmatpush3.bf16.msra.mxu0 %v9014_v51 }
 0x129   :  { %8222 = vmatpush3.bf16.msra.mxu1 %v9015_v52  ;;  %8201 = vmatprep.subr.bf16.mxu0 %v9016_v53  ;;  %v9063_v52 = vld [vmem:[%s11511_s1 + $0xaa0] sm:$0xff]  }
 0x12a   :  { %8223 = vmatprep.subr.bf16.mxu1 %v9017_v54 }
 0x12c   :  { %8202 = vmatpush3.bf16.msra.mxu0 %v9018_v55  ;;  %v9064_v55 = vld [vmem:[%s11511_s1 + $0xa68] sm:$0xff]  }
 0x12d   :  { %8224 = vmatpush3.bf16.msra.mxu1 %v9019_v56  ;;  %8203 = vmatprep.subr.bf16.mxu0 %v9020_v57 }
 0x12e   :  { %8225 = vmatprep.subr.bf16.mxu1 %v9021_v58  ;;  %v9065_v58 = vld [vmem:[%s11511_s1 + $0xae8] sm:$0xff]  }
 0x130   :  { %8204 = vmatpush3.bf16.msra.mxu0 %v9022_v59 }
 0x131   :  { %8226 = vmatpush3.bf16.msra.mxu1 %v9023_v60  ;;  %8205 = vmatprep.subr.bf16.mxu0 %v9024_v61  ;;  %v9066_v61 = vld [vmem:[%s11511_s1 + $0xa28] sm:$0xff]  }
 0x132   :  { %8227 = vmatprep.subr.bf16.mxu1 %v9025_v62 }
 0x134   :  { %8206 = vmatpush3.bf16.msra.mxu0 %v9026_v0 }
 0x135   :  { %8228 = vmatpush3.bf16.msra.mxu1 %v9027_v2  ;;  %8207 = vmatprep.subr.bf16.mxu0 %v9028_v5  ;;  %v9068_v2 = vld [vmem:[%s11511_s1 + $0xa70] sm:$0xff]  }
 0x136   :  { %v7905_v63 = vpop.f32.mrb[8].mxu0  ;;  %8229 = vmatprep.subr.bf16.mxu1 %v9029_v8  ;;  %v9070_v5 = vld [vmem:[%s11511_s1 + $0xa30] sm:$0xff]   ;;  %v9073_v8 = vld [vmem:[%s11511_s1 + $0xaf8] sm:$0xff]  }
 0x137   :  { %v7927_v1 = vpop.f32.mrb[8].mxu1  ;;  %v7906_v3 = vpop.f32.mrb[9].mxu0 }
 0x138   :  { %v7928_v4 = vpop.f32.mrb[9].mxu1  ;;  %v7907_v6 = vadd.f32 %v7906_v3, %v7905_v63  ;;  %v7908_v9 = vpop.f32.mrb[10].mxu0  ;;  %8208 = vmatpush3.bf16.msra.mxu0 %v9030_v11  ;;  %v9067_v63 = vld [vmem:[%s11511_s1 + $0xaa8] sm:$0xff]   ;;  %v42_v11 = vld [vmem:[%s11512_s0 + $0xa0] sm:$0x77] }
 0x139   :  { %v7929_v7 = vadd.f32 %v7928_v4, %v7927_v1  ;;  %v7930_v10 = vpop.f32.mrb[10].mxu1  ;;  %v7909_v14 = vpop.f32.mrb[11].mxu0  ;;  %8230 = vmatpush3.bf16.msra.mxu1 %v9031_v13  ;;  %8209 = vmatprep.subr.bf16.mxu0 %v9032_v16  ;;  %v9069_v4 = vld [vmem:[%s11511_s1 + $0xaf0] sm:$0xff]   ;;  %v9074_v9 = vld [vmem:[%s11511_s1 + $0xa38] sm:$0xff]   ;;  %v7121_v13 = vcombine.low %v42_v11, %v42_v11 }
 0x13a   :  { %v5657_v12 = vadd.f32 %v7907_v6, %v10317_v30  ;;  %v7931_v15 = vpop.f32.mrb[11].mxu1  ;;  %8231 = vmatprep.subr.bf16.mxu1 %v9033_v18  ;;  %v7120_v30 = vcombine.high %v41_v28, %v41_v28  ;;  %v9071_v6 = vld [vmem:[%s11511_s1 + $0xab0] sm:$0xff]   ;;  %v9075_v10 = vld [vmem:[%s11511_s1 + $0xab8] sm:$0xff]   ;;  %v7122_v14 = vcombine.high %v42_v11, %v42_v11  ;;  %v9081_v18 = vld [vmem:[%s11511_s1 + $0xbc0] sm:$0xff]  }
 0x13b   :  { %v9091_v28 = vld [vmem:[%s11511_s1 + $0xb90] sm:$0xff]  }
 0x13c   :  { %v10425_v17 = vadd.f32 %v7929_v7, %v5657_v12  ;;  %8210 = vmatpush3.bf16.msra.mxu0 %v9034_v19  ;;  %6254 = vmatprep.mubr.bf16.mxu1 %v7120_v30  ;;  %v9072_v7 = vld [vmem:[%s11511_s1 + $0xa78] sm:$0xff]   ;;  %v43_v12 = vld [vmem:[%s11512_s0 + $0xa8] sm:$0x77]  ;;  %v9082_v19 = vld [vmem:[%s11511_s1 + $0xb00] sm:$0xff]  }
 0x13d   :  { %8232 = vmatpush3.bf16.msra.mxu1 %v9035_v20  ;;  %8211 = vmatprep.subr.bf16.mxu0 %v9036_v21  ;;  %v7123_v15 = vcombine.low %v43_v12, %v43_v12  ;;  %v7124_v16 = vcombine.high %v43_v12, %v43_v12  ;;  %v9083_v20 = vld [vmem:[%s11511_s1 + $0xb80] sm:$0xff]   ;;  %v9084_v21 = vld [vmem:[%s11511_s1 + $0xb48] sm:$0xff]   ;;  %v9093_v30 = vld [vmem:[%s11511_s1 + $0xbd8] sm:$0xff]  }
 0x13e   :  { %8233 = vmatprep.subr.bf16.mxu1 %v9037_v22  ;;  %v9085_v22 = vld [vmem:[%s11511_s1 + $0xbc8] sm:$0xff]   ;;  %v9124_v11 = vld [vmem:[%s11511_s1 + $0xc50] sm:$0xff]  }
 0x13f   :  { %v9125_v12 = vld [vmem:[%s11511_s1 + $0xcd0] sm:$0xff]  }
 0x140   :  { %8212 = vmatpush3.bf16.msra.mxu0 %v9038_v23  ;;  %v9086_v23 = vld [vmem:[%s11511_s1 + $0xb08] sm:$0xff]  }
 0x141   :  { %8234 = vmatpush3.bf16.msra.mxu1 %v9039_v24  ;;  %8241 = vmatprep.subr.bf16.mxu0 %v9044_v31  ;;  %v9087_v24 = vld [vmem:[%s11511_s1 + $0xb88] sm:$0xff]   ;;  %v9094_v31 = vld [vmem:[%s11511_s1 + $0xb18] sm:$0xff]  }
 0x142   :  { %8263 = vmatprep.subr.bf16.mxu1 %v9045_v32  ;;  %v9095_v32 = vld [vmem:[%s11511_s1 + $0xb98] sm:$0xff]  }
 0x143   :  { %6215 = vmatmul.mubr.bf16.vlgmr.msra.gmra.mrb[36].mxu0 %v7117_v26  ;;  %v9089_v26 = vld [vmem:[%s11511_s1 + $0xbd0] sm:$0xff]  }
 0x144   :  { %6255 = vmatmul.mubr.bf16.vlgmr.msra.gmra.mrb[36].mxu1 %v7119_v29  ;;  %8242 = vmatpush3.bf16.msra.mxu0 %v9046_v33  ;;  %v9092_v29 = vld [vmem:[%s11511_s1 + $0xb58] sm:$0xff]   ;;  %v9096_v33 = vld [vmem:[%s11511_s1 + $0xb60] sm:$0xff]  }
 0x145   :  { %8264 = vmatpush3.bf16.msra.mxu1 %v9047_v34  ;;  %8243 = vmatprep.subr.bf16.mxu0 %v9048_v35  ;;  %v9097_v34 = vld [vmem:[%s11511_s1 + $0xbe0] sm:$0xff]  }
 0x146   :  { %8265 = vmatprep.subr.bf16.mxu1 %v9049_v36  ;;  %6294 = vmatprep.mubr.bf16.mxu0 %v7122_v14  ;;  %v9098_v35 = vld [vmem:[%s11511_s1 + $0xb20] sm:$0xff]   ;;  %v9127_v14 = vld [vmem:[%s11511_s1 + $0xc90] sm:$0xff]  }
 0x147   :  { %6334 = vmatprep.mubr.bf16.mxu1 %v7124_v16  ;;  %v9129_v16 = vld [vmem:[%s11511_s1 + $0xcd8] sm:$0xff]  }
 0x148   :  { %8244 = vmatpush3.bf16.msra.mxu0 %v9050_v37  ;;  %v9099_v37 = vld [vmem:[%s11511_s1 + $0xba0] sm:$0xff]  }
 0x149   :  { %8266 = vmatpush3.bf16.msra.mxu1 %v9051_v38  ;;  %8245 = vmatprep.subr.bf16.mxu0 %v9052_v39 }
 0x14a   :  { %8267 = vmatprep.subr.bf16.mxu1 %v9053_v40 }
 0x14c   :  { %8246 = vmatpush3.bf16.msra.mxu0 %v9054_v41 }
 0x14d   :  { %8268 = vmatpush3.bf16.msra.mxu1 %v9055_v42  ;;  %8247 = vmatprep.subr.bf16.mxu0 %v9056_v43  ;;  %v9100_v43 = vld [vmem:[%s11511_s1 + $0xb68] sm:$0xff]  }
 0x14e   :  { %8269 = vmatprep.subr.bf16.mxu1 %v9057_v44 }
 0x150   :  { %8248 = vmatpush3.bf16.msra.mxu0 %v9058_v45  ;;  %v9101_v45 = vld [vmem:[%s11511_s1 + $0xbe8] sm:$0xff]  }
 0x151   :  { %8270 = vmatpush3.bf16.msra.mxu1 %v9059_v46  ;;  %8249 = vmatprep.subr.bf16.mxu0 %v9060_v47 }
 0x152   :  { %8271 = vmatprep.subr.bf16.mxu1 %v9061_v48  ;;  %v9102_v48 = vld [vmem:[%s11511_s1 + $0xb28] sm:$0xff]  }
 0x154   :  { %8250 = vmatpush3.bf16.msra.mxu0 %v9062_v50  ;;  %v9103_v50 = vld [vmem:[%s11511_s1 + $0xba8] sm:$0xff]  }
 0x155   :  { %8272 = vmatpush3.bf16.msra.mxu1 %v9063_v52  ;;  %8251 = vmatprep.subr.bf16.mxu0 %v9064_v55  ;;  %v9106_v55 = vld [vmem:[%s11511_s1 + $0xb30] sm:$0xff]  }
 0x156   :  { %v7949_v49 = vpop.f32.mrb[12].mxu0  ;;  %8273 = vmatprep.subr.bf16.mxu1 %v9065_v58  ;;  %v9109_v58 = vld [vmem:[%s11511_s1 + $0xbf8] sm:$0xff]  }
 0x157   :  { %v7971_v51 = vpop.f32.mrb[12].mxu1  ;;  %v7950_v53 = vpop.f32.mrb[13].mxu0 }
 0x158   :  { %v7972_v54 = vpop.f32.mrb[13].mxu1  ;;  %v7951_v56 = vadd.f32 %v7950_v53, %v7949_v49  ;;  %v7952_v59 = vpop.f32.mrb[14].mxu0  ;;  %8252 = vmatpush3.bf16.msra.mxu0 %v9066_v61  ;;  %v9104_v53 = vld [vmem:[%s11511_s1 + $0xb70] sm:$0xff]  }
 0x159   :  { %v7973_v57 = vadd.f32 %v7972_v54, %v7971_v51  ;;  %v7974_v60 = vpop.f32.mrb[14].mxu1  ;;  %v7953_v0 = vpop.f32.mrb[15].mxu0  ;;  %8274 = vmatpush3.bf16.msra.mxu1 %v9067_v63  ;;  %8253 = vmatprep.subr.bf16.mxu0 %v9068_v2  ;;  %v9105_v54 = vld [vmem:[%s11511_s1 + $0xbf0] sm:$0xff]   ;;  %v9110_v59 = vld [vmem:[%s11511_s1 + $0xb38] sm:$0xff]  }
 0x15a   :  { %v5737_v62 = vadd.f32 %v7951_v56, %v10425_v17  ;;  %v7975_v1 = vpop.f32.mrb[15].mxu1  ;;  %8275 = vmatprep.subr.bf16.mxu1 %v9069_v4  ;;  %v9080_v17 = vld [vmem:[%s11511_s1 + $0xb40] sm:$0xff]   ;;  %v9107_v56 = vld [vmem:[%s11511_s1 + $0xbb0] sm:$0xff]   ;;  %v9111_v60 = vld [vmem:[%s11511_s1 + $0xbb8] sm:$0xff]  }
 0x15b   :  { %v44_v61 = vld [vmem:[%s11512_s0 + $0xb0] sm:$0x77]  ;;  %v9117_v4 = vld [vmem:[%s11511_s1 + $0xcc0] sm:$0xff]  }
 0x15c   :  { %v10530_v3 = vadd.f32 %v7973_v57, %v5737_v62  ;;  %8254 = vmatpush3.bf16.msra.mxu0 %v9070_v5  ;;  %v9108_v57 = vld [vmem:[%s11511_s1 + $0xb78] sm:$0xff]   ;;  %v7125_v63 = vcombine.low %v44_v61, %v44_v61  ;;  %v7126_v0 = vcombine.high %v44_v61, %v44_v61  ;;  %v9118_v5 = vld [vmem:[%s11511_s1 + $0xc00] sm:$0xff]   ;;  %v9160_v61 = vld [vmem:[%s11511_s1 + $0xd50] sm:$0xff]  }
 0x15d   :  { %8276 = vmatpush3.bf16.msra.mxu1 %v9071_v6  ;;  %8255 = vmatprep.subr.bf16.mxu0 %v9072_v7  ;;  %v45_v62 = vld [vmem:[%s11512_s0 + $0xb8] sm:$0x77]  ;;  %v9119_v6 = vld [vmem:[%s11511_s1 + $0xc80] sm:$0xff]   ;;  %v9120_v7 = vld [vmem:[%s11511_s1 + $0xc48] sm:$0xff]  }
 0x15e   :  { %8277 = vmatprep.subr.bf16.mxu1 %v9073_v8  ;;  %v7127_v1 = vcombine.low %v45_v62, %v45_v62  ;;  %v7128_v2 = vcombine.high %v45_v62, %v45_v62  ;;  %v9121_v8 = vld [vmem:[%s11511_s1 + $0xcc8] sm:$0xff]   ;;  %v9161_v62 = vld [vmem:[%s11511_s1 + $0xdd0] sm:$0xff]  }
 0x160   :  { %8256 = vmatpush3.bf16.msra.mxu0 %v9074_v9  ;;  %v9122_v9 = vld [vmem:[%s11511_s1 + $0xc08] sm:$0xff]  }
 0x161   :  { %8278 = vmatpush3.bf16.msra.mxu1 %v9075_v10  ;;  %8285 = vmatprep.subr.bf16.mxu0 %v9080_v17  ;;  %v9123_v10 = vld [vmem:[%s11511_s1 + $0xc88] sm:$0xff]   ;;  %v9130_v17 = vld [vmem:[%s11511_s1 + $0xc18] sm:$0xff]  }
 0x162   :  { %8307 = vmatprep.subr.bf16.mxu1 %v9081_v18  ;;  %v9131_v18 = vld [vmem:[%s11511_s1 + $0xc98] sm:$0xff]  }
 0x163   :  { %6295 = vmatmul.mubr.bf16.vlgmr.msra.gmra.mrb[40].mxu0 %v7121_v13  ;;  %v9126_v13 = vld [vmem:[%s11511_s1 + $0xc10] sm:$0xff]  }
 0x164   :  { %6335 = vmatmul.mubr.bf16.vlgmr.msra.gmra.mrb[40].mxu1 %v7123_v15  ;;  %8286 = vmatpush3.bf16.msra.mxu0 %v9082_v19  ;;  %v9128_v15 = vld [vmem:[%s11511_s1 + $0xc58] sm:$0xff]   ;;  %v9132_v19 = vld [vmem:[%s11511_s1 + $0xc60] sm:$0xff]  }
 0x165   :  { %8308 = vmatpush3.bf16.msra.mxu1 %v9083_v20  ;;  %8287 = vmatprep.subr.bf16.mxu0 %v9084_v21  ;;  %v9133_v20 = vld [vmem:[%s11511_s1 + $0xce0] sm:$0xff]  }
 0x166   :  { %8309 = vmatprep.subr.bf16.mxu1 %v9085_v22  ;;  %6374 = vmatprep.mubr.bf16.mxu0 %v7126_v0  ;;  %v9134_v22 = vld [vmem:[%s11511_s1 + $0xc20] sm:$0xff]   ;;  %v9163_v0 = vld [vmem:[%s11511_s1 + $0xd90] sm:$0xff]  }
 0x167   :  { %6414 = vmatprep.mubr.bf16.mxu1 %v7128_v2  ;;  %v9165_v2 = vld [vmem:[%s11511_s1 + $0xdd8] sm:$0xff]  }
 0x168   :  { %8288 = vmatpush3.bf16.msra.mxu0 %v9086_v23 }
 0x169   :  { %8310 = vmatpush3.bf16.msra.mxu1 %v9087_v24  ;;  %8289 = vmatprep.subr.bf16.mxu0 %v9088_v25  ;;  %v9135_v24 = vld [vmem:[%s11511_s1 + $0xca0] sm:$0xff]  }
 0x16a   :  { %8311 = vmatprep.subr.bf16.mxu1 %v9089_v26 }
 0x16c   :  { %8290 = vmatpush3.bf16.msra.mxu0 %v9090_v27 }
 0x16d   :  { %8312 = vmatpush3.bf16.msra.mxu1 %v9091_v28  ;;  %8291 = vmatprep.subr.bf16.mxu0 %v9092_v29  ;;  %v9136_v28 = vld [vmem:[%s11511_s1 + $0xc68] sm:$0xff]  }
 0x16e   :  { %8313 = vmatprep.subr.bf16.mxu1 %v9093_v30  ;;  %v9137_v30 = vld [vmem:[%s11511_s1 + $0xce8] sm:$0xff]  }
 0x170   :  { %8292 = vmatpush3.bf16.msra.mxu0 %v9094_v31 }
 0x171   :  { %8314 = vmatpush3.bf16.msra.mxu1 %v9095_v32  ;;  %8293 = vmatprep.subr.bf16.mxu0 %v9096_v33 }
 0x172   :  { %8315 = vmatprep.subr.bf16.mxu1 %v9097_v34  ;;  %v9138_v34 = vld [vmem:[%s11511_s1 + $0xc28] sm:$0xff]  }
 0x174   :  { %8294 = vmatpush3.bf16.msra.mxu0 %v9098_v35  ;;  %v9139_v35 = vld [vmem:[%s11511_s1 + $0xca8] sm:$0xff]  }
 0x175   :  { %8316 = vmatpush3.bf16.msra.mxu1 %v9099_v37  ;;  %8295 = vmatprep.subr.bf16.mxu0 %v9100_v43  ;;  %v9144_v43 = vld [vmem:[%s11511_s1 + $0xc78] sm:$0xff]  }
 0x176   :  { %v7993_v36 = vpop.f32.mrb[16].mxu0  ;;  %8317 = vmatprep.subr.bf16.mxu1 %v9101_v45  ;;  %v9146_v45 = vld [vmem:[%s11511_s1 + $0xc38] sm:$0xff]  }
 0x177   :  { %v8015_v38 = vpop.f32.mrb[16].mxu1  ;;  %v7994_v39 = vpop.f32.mrb[17].mxu0 }
 0x178   :  { %v8016_v40 = vpop.f32.mrb[17].mxu1  ;;  %v7995_v41 = vadd.f32 %v7994_v39, %v7993_v36  ;;  %v7996_v44 = vpop.f32.mrb[18].mxu0  ;;  %8296 = vmatpush3.bf16.msra.mxu0 %v9102_v48  ;;  %v9140_v39 = vld [vmem:[%s11511_s1 + $0xc70] sm:$0xff]   ;;  %v47_v48 = vld [vmem:[%s11512_s0 + $0xc8] sm:$0x77] }
 0x179   :  { %v8017_v42 = vadd.f32 %v8016_v40, %v8015_v38  ;;  %v8018_v46 = vpop.f32.mrb[18].mxu1  ;;  %v7997_v49 = vpop.f32.mrb[19].mxu0  ;;  %8318 = vmatpush3.bf16.msra.mxu1 %v9103_v50  ;;  %8297 = vmatprep.subr.bf16.mxu0 %v9104_v53  ;;  %v9141_v40 = vld [vmem:[%s11511_s1 + $0xcf0] sm:$0xff]   ;;  %v9145_v44 = vld [vmem:[%s11511_s1 + $0xcf8] sm:$0xff]   ;;  %v7132_v53 = vcombine.high %v47_v48, %v47_v48 }
 0x17a   :  { %v5817_v47 = vadd.f32 %v7995_v41, %v10530_v3  ;;  %v8019_v51 = vpop.f32.mrb[19].mxu1  ;;  %8319 = vmatprep.subr.bf16.mxu1 %v9105_v54  ;;  %v9116_v3 = vld [vmem:[%s11511_s1 + $0xc40] sm:$0xff]   ;;  %v9142_v41 = vld [vmem:[%s11511_s1 + $0xc30] sm:$0xff]   ;;  %v9147_v46 = vld [vmem:[%s11511_s1 + $0xcb8] sm:$0xff]  }
 0x17b   :  { %v7131_v51 = vcombine.low %v47_v48, %v47_v48  ;;  %v9153_v54 = vld [vmem:[%s11511_s1 + $0xdc0] sm:$0xff]   ;;  %v9197_v48 = vld [vmem:[%s11511_s1 + $0xed0] sm:$0xff]  }
 0x17c   :  { %v10632_v52 = vadd.f32 %v8017_v42, %v5817_v47  ;;  %8298 = vmatpush3.bf16.msra.mxu0 %v9106_v55  ;;  %v9143_v42 = vld [vmem:[%s11511_s1 + $0xcb0] sm:$0xff]   ;;  %v46_v47 = vld [vmem:[%s11512_s0 + $0xc0] sm:$0x77] }
 0x17d   :  { %8320 = vmatpush3.bf16.msra.mxu1 %v9107_v56  ;;  %8299 = vmatprep.subr.bf16.mxu0 %v9108_v57  ;;  %v7129_v49 = vcombine.low %v46_v47, %v46_v47  ;;  %v7130_v50 = vcombine.high %v46_v47, %v46_v47  ;;  %v9154_v55 = vld [vmem:[%s11511_s1 + $0xd00] sm:$0xff]   ;;  %v9156_v57 = vld [vmem:[%s11511_s1 + $0xd48] sm:$0xff]   ;;  %v9196_v47 = vld [vmem:[%s11511_s1 + $0xe50] sm:$0xff]  }
 0x17e   :  { %8321 = vmatprep.subr.bf16.mxu1 %v9109_v58  ;;  %v9155_v56 = vld [vmem:[%s11511_s1 + $0xd80] sm:$0xff]   ;;  %v9157_v58 = vld [vmem:[%s11511_s1 + $0xdc8] sm:$0xff]  }
 0x180   :  { %8300 = vmatpush3.bf16.msra.mxu0 %v9110_v59  ;;  %v9158_v59 = vld [vmem:[%s11511_s1 + $0xd08] sm:$0xff]  }
 0x181   :  { %8322 = vmatpush3.bf16.msra.mxu1 %v9111_v60  ;;  %8329 = vmatprep.subr.bf16.mxu0 %v9116_v3  ;;  %v9159_v60 = vld [vmem:[%s11511_s1 + $0xd88] sm:$0xff]   ;;  %v9166_v3 = vld [vmem:[%s11511_s1 + $0xd18] sm:$0xff]  }
 0x182   :  { %8351 = vmatprep.subr.bf16.mxu1 %v9117_v4  ;;  %v9167_v4 = vld [vmem:[%s11511_s1 + $0xd98] sm:$0xff]  }
 0x183   :  { %6375 = vmatmul.mubr.bf16.vlgmr.msra.gmra.mrb[44].mxu0 %v7125_v63  ;;  %v9162_v63 = vld [vmem:[%s11511_s1 + $0xd10] sm:$0xff]  }
 0x184   :  { %6415 = vmatmul.mubr.bf16.vlgmr.msra.gmra.mrb[44].mxu1 %v7127_v1  ;;  %8330 = vmatpush3.bf16.msra.mxu0 %v9118_v5  ;;  %v9164_v1 = vld [vmem:[%s11511_s1 + $0xd58] sm:$0xff]   ;;  %v9168_v5 = vld [vmem:[%s11511_s1 + $0xd60] sm:$0xff]  }
 0x185   :  { %8352 = vmatpush3.bf16.msra.mxu1 %v9119_v6  ;;  %8331 = vmatprep.subr.bf16.mxu0 %v9120_v7  ;;  %v9169_v6 = vld [vmem:[%s11511_s1 + $0xde0] sm:$0xff]  }
 0x186   :  { %8353 = vmatprep.subr.bf16.mxu1 %v9121_v8  ;;  %6454 = vmatprep.mubr.bf16.mxu0 %v7130_v50  ;;  %v9170_v8 = vld [vmem:[%s11511_s1 + $0xd20] sm:$0xff]   ;;  %v9199_v50 = vld [vmem:[%s11511_s1 + $0xe90] sm:$0xff]  }
 0x187   :  { %6494 = vmatprep.mubr.bf16.mxu1 %v7132_v53  ;;  %v9202_v53 = vld [vmem:[%s11511_s1 + $0xe18] sm:$0xff]  }
 0x188   :  { %8332 = vmatpush3.bf16.msra.mxu0 %v9122_v9 }
 0x189   :  { %8354 = vmatpush3.bf16.msra.mxu1 %v9123_v10  ;;  %8333 = vmatprep.subr.bf16.mxu0 %v9124_v11  ;;  %v9171_v10 = vld [vmem:[%s11511_s1 + $0xda0] sm:$0xff]  }
 0x18a   :  { %8355 = vmatprep.subr.bf16.mxu1 %v9125_v12 }
 0x18c   :  { %8334 = vmatpush3.bf16.msra.mxu0 %v9126_v13  ;;  %v9172_v13 = vld [vmem:[%s11511_s1 + $0xd68] sm:$0xff]  }
 0x18d   :  { %8356 = vmatpush3.bf16.msra.mxu1 %v9127_v14  ;;  %8335 = vmatprep.subr.bf16.mxu0 %v9128_v15 }
 0x18e   :  { %8357 = vmatprep.subr.bf16.mxu1 %v9129_v16  ;;  %v9173_v16 = vld [vmem:[%s11511_s1 + $0xde8] sm:$0xff]  }
 0x190   :  { %8336 = vmatpush3.bf16.msra.mxu0 %v9130_v17 }
 0x191   :  { %8358 = vmatpush3.bf16.msra.mxu1 %v9131_v18  ;;  %8337 = vmatprep.subr.bf16.mxu0 %v9132_v19  ;;  %v9174_v19 = vld [vmem:[%s11511_s1 + $0xd28] sm:$0xff]  }
 0x192   :  { %8359 = vmatprep.subr.bf16.mxu1 %v9133_v20 }
 0x194   :  { %8338 = vmatpush3.bf16.msra.mxu0 %v9134_v22 }
 0x195   :  { %8360 = vmatpush3.bf16.msra.mxu1 %v9135_v24  ;;  %8339 = vmatprep.subr.bf16.mxu0 %v9136_v28  ;;  %v9176_v24 = vld [vmem:[%s11511_s1 + $0xd70] sm:$0xff]  }
 0x196   :  { %v8037_v21 = vpop.f32.mrb[20].mxu0  ;;  %8361 = vmatprep.subr.bf16.mxu1 %v9137_v30  ;;  %v9179_v28 = vld [vmem:[%s11511_s1 + $0xdb0] sm:$0xff]   ;;  %v9181_v30 = vld [vmem:[%s11511_s1 + $0xdf8] sm:$0xff]  }
 0x197   :  { %v8059_v23 = vpop.f32.mrb[20].mxu1  ;;  %v8038_v25 = vpop.f32.mrb[21].mxu0 }
 0x198   :  { %v8039_v26 = vadd.f32 %v8038_v25, %v8037_v21  ;;  %v8060_v27 = vpop.f32.mrb[21].mxu1  ;;  %v8040_v31 = vpop.f32.mrb[22].mxu0  ;;  %8340 = vmatpush3.bf16.msra.mxu0 %v9138_v34  ;;  %v9175_v21 = vld [vmem:[%s11511_s1 + $0xda8] sm:$0xff]  }
 0x199   :  { %v8061_v29 = vadd.f32 %v8060_v27, %v8059_v23  ;;  %v8062_v33 = vpop.f32.mrb[22].mxu1  ;;  %v8041_v36 = vpop.f32.mrb[23].mxu0  ;;  %8362 = vmatpush3.bf16.msra.mxu1 %v9139_v35  ;;  %8341 = vmatprep.subr.bf16.mxu0 %v9140_v39  ;;  %v9178_v27 = vld [vmem:[%s11511_s1 + $0xd30] sm:$0xff]   ;;  %v9182_v31 = vld [vmem:[%s11511_s1 + $0xd38] sm:$0xff]   ;;  %v9188_v39 = vld [vmem:[%s11511_s1 + $0xe40] sm:$0xff]  }
 0x19a   :  { %v5897_v32 = vadd.f32 %v8039_v26, %v10632_v52  ;;  %v8063_v38 = vpop.f32.mrb[23].mxu1  ;;  %8363 = vmatprep.subr.bf16.mxu1 %v9141_v40  ;;  %v9152_v52 = vld [vmem:[%s11511_s1 + $0xd40] sm:$0xff]   ;;  %v9177_v26 = vld [vmem:[%s11511_s1 + $0xdf0] sm:$0xff]   ;;  %v49_v36 = vld [vmem:[%s11512_s0 + $0xd8] sm:$0x77] }
 0x19b   :  { %v48_v33 = vld [vmem:[%s11512_s0 + $0xd0] sm:$0x77]  ;;  %v7136_v38 = vcombine.high %v49_v36, %v49_v36  ;;  %v9189_v40 = vld [vmem:[%s11511_s1 + $0xec0] sm:$0xff]  }
 0x19c   :  { %v10737_v37 = vadd.f32 %v8061_v29, %v5897_v32  ;;  %8342 = vmatpush3.bf16.msra.mxu0 %v9142_v41  ;;  %v9180_v29 = vld [vmem:[%s11511_s1 + $0xd78] sm:$0xff]   ;;  %v7133_v34 = vcombine.low %v48_v33, %v48_v33  ;;  %v7134_v35 = vcombine.high %v48_v33, %v48_v33  ;;  %v9190_v41 = vld [vmem:[%s11511_s1 + $0xe00] sm:$0xff]   ;;  %v9232_v33 = vld [vmem:[%s11511_s1 + $0xf50] sm:$0xff]  }
 0x19d   :  { %8364 = vmatpush3.bf16.msra.mxu1 %v9143_v42  ;;  %8343 = vmatprep.subr.bf16.mxu0 %v9144_v43  ;;  %v9183_v32 = vld [vmem:[%s11511_s1 + $0xdb8] sm:$0xff]   ;;  %v9191_v42 = vld [vmem:[%s11511_s1 + $0xe80] sm:$0xff]   ;;  %v9192_v43 = vld [vmem:[%s11511_s1 + $0xe48] sm:$0xff]  }
 0x19e   :  { %8365 = vmatprep.subr.bf16.mxu1 %v9145_v44  ;;  %v9193_v44 = vld [vmem:[%s11511_s1 + $0xec8] sm:$0xff]  }
 0x1a0   :  { %8344 = vmatpush3.bf16.msra.mxu0 %v9146_v45  ;;  %v9194_v45 = vld [vmem:[%s11511_s1 + $0xe08] sm:$0xff]  }
 0x1a1   :  { %8366 = vmatpush3.bf16.msra.mxu1 %v9147_v46  ;;  %8373 = vmatprep.subr.bf16.mxu0 %v9152_v52  ;;  %v9195_v46 = vld [vmem:[%s11511_s1 + $0xe88] sm:$0xff]   ;;  %v9201_v52 = vld [vmem:[%s11511_s1 + $0xed8] sm:$0xff]  }
 0x1a2   :  { %8395 = vmatprep.subr.bf16.mxu1 %v9153_v54  ;;  %v9203_v54 = vld [vmem:[%s11511_s1 + $0xe98] sm:$0xff]  }
 0x1a3   :  { %6455 = vmatmul.mubr.bf16.vlgmr.msra.gmra.mrb[48].mxu0 %v7129_v49  ;;  %v9198_v49 = vld [vmem:[%s11511_s1 + $0xe10] sm:$0xff]  }
 0x1a4   :  { %6495 = vmatmul.mubr.bf16.vlgmr.msra.gmra.mrb[48].mxu1 %v7131_v51  ;;  %8374 = vmatpush3.bf16.msra.mxu0 %v9154_v55  ;;  %v9200_v51 = vld [vmem:[%s11511_s1 + $0xe58] sm:$0xff]   ;;  %v9204_v55 = vld [vmem:[%s11511_s1 + $0xe60] sm:$0xff]  }
 0x1a5   :  { %8396 = vmatpush3.bf16.msra.mxu1 %v9155_v56  ;;  %8375 = vmatprep.subr.bf16.mxu0 %v9156_v57  ;;  %v9205_v56 = vld [vmem:[%s11511_s1 + $0xee0] sm:$0xff]  }
 0x1a6   :  { %8397 = vmatprep.subr.bf16.mxu1 %v9157_v58  ;;  %6534 = vmatprep.mubr.bf16.mxu0 %v7134_v35  ;;  %v9206_v58 = vld [vmem:[%s11511_s1 + $0xe20] sm:$0xff]   ;;  %v9234_v35 = vld [vmem:[%s11511_s1 + $0xf10] sm:$0xff]  }
 0x1a7   :  { %6574 = vmatprep.mubr.bf16.mxu1 %v7136_v38  ;;  %v9237_v38 = vld [vmem:[%s11511_s1 + $0xfd8] sm:$0xff]  }
 0x1a8   :  { %8376 = vmatpush3.bf16.msra.mxu0 %v9158_v59 }
 0x1a9   :  { %8398 = vmatpush3.bf16.msra.mxu1 %v9159_v60  ;;  %8377 = vmatprep.subr.bf16.mxu0 %v9160_v61  ;;  %v9207_v60 = vld [vmem:[%s11511_s1 + $0xea0] sm:$0xff]  }
 0x1aa   :  { %8399 = vmatprep.subr.bf16.mxu1 %v9161_v62 }
 0x1ac   :  { %8378 = vmatpush3.bf16.msra.mxu0 %v9162_v63  ;;  %v9208_v63 = vld [vmem:[%s11511_s1 + $0xe68] sm:$0xff]  }
 0x1ad   :  { %8400 = vmatpush3.bf16.msra.mxu1 %v9163_v0  ;;  %8379 = vmatprep.subr.bf16.mxu0 %v9164_v1 }
 0x1ae   :  { %8401 = vmatprep.subr.bf16.mxu1 %v9165_v2  ;;  %v9209_v2 = vld [vmem:[%s11511_s1 + $0xee8] sm:$0xff]  }
 0x1b0   :  { %8380 = vmatpush3.bf16.msra.mxu0 %v9166_v3 }
 0x1b1   :  { %8402 = vmatpush3.bf16.msra.mxu1 %v9167_v4  ;;  %8381 = vmatprep.subr.bf16.mxu0 %v9168_v5  ;;  %v9210_v5 = vld [vmem:[%s11511_s1 + $0xe28] sm:$0xff]  }
 0x1b2   :  { %8403 = vmatprep.subr.bf16.mxu1 %v9169_v6 }
 0x1b4   :  { %8382 = vmatpush3.bf16.msra.mxu0 %v9170_v8 }
 0x1b5   :  { %8404 = vmatpush3.bf16.msra.mxu1 %v9171_v10  ;;  %8383 = vmatprep.subr.bf16.mxu0 %v9172_v13  ;;  %v9212_v10 = vld [vmem:[%s11511_s1 + $0xe70] sm:$0xff]  }
 0x1b6   :  { %v8081_v7 = vpop.f32.mrb[24].mxu0  ;;  %8405 = vmatprep.subr.bf16.mxu1 %v9173_v16  ;;  %v9214_v13 = vld [vmem:[%s11511_s1 + $0xe30] sm:$0xff]   ;;  %v9217_v16 = vld [vmem:[%s11511_s1 + $0xef8] sm:$0xff]  }
 0x1b7   :  { %v8103_v9 = vpop.f32.mrb[24].mxu1  ;;  %v8082_v11 = vpop.f32.mrb[25].mxu0 }
 0x1b8   :  { %v8104_v12 = vpop.f32.mrb[25].mxu1  ;;  %v8083_v14 = vadd.f32 %v8082_v11, %v8081_v7  ;;  %v8084_v17 = vpop.f32.mrb[26].mxu0  ;;  %8384 = vmatpush3.bf16.msra.mxu0 %v9174_v19  ;;  %v9211_v7 = vld [vmem:[%s11511_s1 + $0xea8] sm:$0xff]   ;;  %v50_v19 = vld [vmem:[%s11512_s0 + $0xe0] sm:$0x77] }
 0x1b9   :  { %v8105_v15 = vadd.f32 %v8104_v12, %v8103_v9  ;;  %v8106_v18 = vpop.f32.mrb[26].mxu1  ;;  %v8085_v22 = vpop.f32.mrb[27].mxu0  ;;  %8406 = vmatpush3.bf16.msra.mxu1 %v9175_v21  ;;  %8385 = vmatprep.subr.bf16.mxu0 %v9176_v24  ;;  %v9213_v12 = vld [vmem:[%s11511_s1 + $0xef0] sm:$0xff]   ;;  %v9218_v17 = vld [vmem:[%s11511_s1 + $0xe38] sm:$0xff]   ;;  %v7137_v21 = vcombine.low %v50_v19, %v50_v19 }
 0x1ba   :  { %v5977_v20 = vadd.f32 %v8083_v14, %v10737_v37  ;;  %v8107_v23 = vpop.f32.mrb[27].mxu1  ;;  %8407 = vmatprep.subr.bf16.mxu1 %v9177_v26  ;;  %v7135_v37 = vcombine.low %v49_v36, %v49_v36  ;;  %v9215_v14 = vld [vmem:[%s11511_s1 + $0xeb0] sm:$0xff]   ;;  %v9219_v18 = vld [vmem:[%s11511_s1 + $0xeb8] sm:$0xff]   ;;  %v7138_v22 = vcombine.high %v50_v19, %v50_v19  ;;  %v9225_v26 = vld [vmem:[%s11511_s1 + $0xfc0] sm:$0xff]  }
 0x1bb   :  { %v9235_v36 = vld [vmem:[%s11511_s1 + $0xf90] sm:$0xff]  }
 0x1bc   :  { %v10845_v25 = vadd.f32 %v8105_v15, %v5977_v20  ;;  %8386 = vmatpush3.bf16.msra.mxu0 %v9178_v27  ;;  %v9216_v15 = vld [vmem:[%s11511_s1 + $0xe78] sm:$0xff]   ;;  %v51_v20 = vld [vmem:[%s11512_s0 + $0xe8] sm:$0x77]  ;;  %v9226_v27 = vld [vmem:[%s11511_s1 + $0xf00] sm:$0xff]  }
 0x1bd   :  { %8408 = vmatpush3.bf16.msra.mxu1 %v9179_v28  ;;  %8387 = vmatprep.subr.bf16.mxu0 %v9180_v29  ;;  %v7139_v23 = vcombine.low %v51_v20, %v51_v20  ;;  %v7140_v24 = vcombine.high %v51_v20, %v51_v20  ;;  %v9227_v28 = vld [vmem:[%s11511_s1 + $0xf80] sm:$0xff]   ;;  %v9228_v29 = vld [vmem:[%s11511_s1 + $0xf48] sm:$0xff]   ;;  %v9268_v19 = vld [vmem:[%s11511_s1 + $0x1050] sm:$0xff]  }
 0x1be   :  { %8409 = vmatprep.subr.bf16.mxu1 %v9181_v30  ;;  %v9229_v30 = vld [vmem:[%s11511_s1 + $0xfc8] sm:$0xff]   ;;  %v9269_v20 = vld [vmem:[%s11511_s1 + $0x10d0] sm:$0xff]  }
 0x1c0   :  { %8388 = vmatpush3.bf16.msra.mxu0 %v9182_v31  ;;  %v9230_v31 = vld [vmem:[%s11511_s1 + $0xf08] sm:$0xff]  }
 0x1c1   :  { %8410 = vmatpush3.bf16.msra.mxu1 %v9183_v32  ;;  %8417 = vmatprep.subr.bf16.mxu0 %v9188_v39  ;;  %v9231_v32 = vld [vmem:[%s11511_s1 + $0xf88] sm:$0xff]   ;;  %v9238_v39 = vld [vmem:[%s11511_s1 + $0xf18] sm:$0xff]  }
 0x1c2   :  { %8439 = vmatprep.subr.bf16.mxu1 %v9189_v40  ;;  %v9239_v40 = vld [vmem:[%s11511_s1 + $0xf98] sm:$0xff]  }
 0x1c3   :  { %6535 = vmatmul.mubr.bf16.vlgmr.msra.gmra.mrb[52].mxu0 %v7133_v34  ;;  %v9233_v34 = vld [vmem:[%s11511_s1 + $0xfd0] sm:$0xff]  }
 0x1c4   :  { %6575 = vmatmul.mubr.bf16.vlgmr.msra.gmra.mrb[52].mxu1 %v7135_v37  ;;  %8418 = vmatpush3.bf16.msra.mxu0 %v9190_v41  ;;  %v9236_v37 = vld [vmem:[%s11511_s1 + $0xf58] sm:$0xff]   ;;  %v9240_v41 = vld [vmem:[%s11511_s1 + $0xf60] sm:$0xff]  }
 0x1c5   :  { %8440 = vmatpush3.bf16.msra.mxu1 %v9191_v42  ;;  %8419 = vmatprep.subr.bf16.mxu0 %v9192_v43  ;;  %v9241_v42 = vld [vmem:[%s11511_s1 + $0xfe0] sm:$0xff]  }
 0x1c6   :  { %8441 = vmatprep.subr.bf16.mxu1 %v9193_v44  ;;  %6614 = vmatprep.mubr.bf16.mxu0 %v7138_v22  ;;  %v9242_v43 = vld [vmem:[%s11511_s1 + $0xf20] sm:$0xff]   ;;  %v9271_v22 = vld [vmem:[%s11511_s1 + $0x1090] sm:$0xff]  }
 0x1c7   :  { %6654 = vmatprep.mubr.bf16.mxu1 %v7140_v24  ;;  %v9273_v24 = vld [vmem:[%s11511_s1 + $0x10d8] sm:$0xff]  }
 0x1c8   :  { %8420 = vmatpush3.bf16.msra.mxu0 %v9194_v45  ;;  %v9243_v45 = vld [vmem:[%s11511_s1 + $0xfa0] sm:$0xff]  }
 0x1c9   :  { %8442 = vmatpush3.bf16.msra.mxu1 %v9195_v46  ;;  %8421 = vmatprep.subr.bf16.mxu0 %v9196_v47 }
 0x1ca   :  { %8443 = vmatprep.subr.bf16.mxu1 %v9197_v48 }
 0x1cc   :  { %8422 = vmatpush3.bf16.msra.mxu0 %v9198_v49 }
 0x1cd   :  { %8444 = vmatpush3.bf16.msra.mxu1 %v9199_v50  ;;  %8423 = vmatprep.subr.bf16.mxu0 %v9200_v51  ;;  %v9244_v51 = vld [vmem:[%s11511_s1 + $0xf68] sm:$0xff]  }
 0x1ce   :  { %8445 = vmatprep.subr.bf16.mxu1 %v9201_v52 }
 0x1d0   :  { %8424 = vmatpush3.bf16.msra.mxu0 %v9202_v53  ;;  %v9245_v53 = vld [vmem:[%s11511_s1 + $0xfe8] sm:$0xff]  }
 0x1d1   :  { %8446 = vmatpush3.bf16.msra.mxu1 %v9203_v54  ;;  %8425 = vmatprep.subr.bf16.mxu0 %v9204_v55 }
 0x1d2   :  { %8447 = vmatprep.subr.bf16.mxu1 %v9205_v56  ;;  %v9246_v56 = vld [vmem:[%s11511_s1 + $0xf28] sm:$0xff]  }
 0x1d4   :  { %8426 = vmatpush3.bf16.msra.mxu0 %v9206_v58  ;;  %v9247_v58 = vld [vmem:[%s11511_s1 + $0xfa8] sm:$0xff]  }
 0x1d5   :  { %8448 = vmatpush3.bf16.msra.mxu1 %v9207_v60  ;;  %8427 = vmatprep.subr.bf16.mxu0 %v9208_v63  ;;  %v9250_v63 = vld [vmem:[%s11511_s1 + $0xf30] sm:$0xff]  }
 0x1d6   :  { %v8125_v57 = vpop.f32.mrb[28].mxu0  ;;  %8449 = vmatprep.subr.bf16.mxu1 %v9209_v2  ;;  %v9253_v2 = vld [vmem:[%s11511_s1 + $0xff8] sm:$0xff]  }
 0x1d7   :  { %v8147_v59 = vpop.f32.mrb[28].mxu1  ;;  %v8126_v61 = vpop.f32.mrb[29].mxu0 }
 0x1d8   :  { %v8148_v62 = vpop.f32.mrb[29].mxu1  ;;  %v8127_v0 = vadd.f32 %v8126_v61, %v8125_v57  ;;  %v8128_v3 = vpop.f32.mrb[30].mxu0  ;;  %8428 = vmatpush3.bf16.msra.mxu0 %v9210_v5  ;;  %v9248_v61 = vld [vmem:[%s11511_s1 + $0xf70] sm:$0xff]  }
 0x1d9   :  { %v8149_v1 = vadd.f32 %v8148_v62, %v8147_v59  ;;  %v8150_v4 = vpop.f32.mrb[30].mxu1  ;;  %v8129_v8 = vpop.f32.mrb[31].mxu0  ;;  %8450 = vmatpush3.bf16.msra.mxu1 %v9211_v7  ;;  %8429 = vmatprep.subr.bf16.mxu0 %v9212_v10  ;;  %v9249_v62 = vld [vmem:[%s11511_s1 + $0xff0] sm:$0xff]   ;;  %v9254_v3 = vld [vmem:[%s11511_s1 + $0xf38] sm:$0xff]  }
 0x1da   :  { %v6057_v6 = vadd.f32 %v8127_v0, %v10845_v25  ;;  %v8151_v9 = vpop.f32.mrb[31].mxu1  ;;  %8451 = vmatprep.subr.bf16.mxu1 %v9213_v12  ;;  %v9224_v25 = vld [vmem:[%s11511_s1 + $0xf40] sm:$0xff]   ;;  %v9251_v0 = vld [vmem:[%s11511_s1 + $0xfb0] sm:$0xff]   ;;  %v9255_v4 = vld [vmem:[%s11511_s1 + $0xfb8] sm:$0xff]  }
 0x1db   :  { %v52_v5 = vld [vmem:[%s11512_s0 + $0xf0] sm:$0x77]  ;;  %v9261_v12 = vld [vmem:[%s11511_s1 + $0x10c0] sm:$0xff]  }
 0x1dc   :  { %v10950_v11 = vadd.f32 %v8149_v1, %v6057_v6  ;;  %8430 = vmatpush3.bf16.msra.mxu0 %v9214_v13  ;;  %v9252_v1 = vld [vmem:[%s11511_s1 + $0xf78] sm:$0xff]   ;;  %v7141_v7 = vcombine.low %v52_v5, %v52_v5  ;;  %v7142_v8 = vcombine.high %v52_v5, %v52_v5  ;;  %v9262_v13 = vld [vmem:[%s11511_s1 + $0x1000] sm:$0xff]   ;;  %v9304_v5 = vld [vmem:[%s11511_s1 + $0x1150] sm:$0xff]  }
 0x1dd   :  { %8452 = vmatpush3.bf16.msra.mxu1 %v9215_v14  ;;  %8431 = vmatprep.subr.bf16.mxu0 %v9216_v15  ;;  %v53_v6 = vld [vmem:[%s11512_s0 + $0xf8] sm:$0x77]  ;;  %v9263_v14 = vld [vmem:[%s11511_s1 + $0x1080] sm:$0xff]   ;;  %v9264_v15 = vld [vmem:[%s11511_s1 + $0x1048] sm:$0xff]  }
 0x1de   :  { %8453 = vmatprep.subr.bf16.mxu1 %v9217_v16  ;;  %v7143_v9 = vcombine.low %v53_v6, %v53_v6  ;;  %v7144_v10 = vcombine.high %v53_v6, %v53_v6  ;;  %v9265_v16 = vld [vmem:[%s11511_s1 + $0x10c8] sm:$0xff]   ;;  %v9305_v6 = vld [vmem:[%s11511_s1 + $0x11d0] sm:$0xff]  }
 0x1e0   :  { %8432 = vmatpush3.bf16.msra.mxu0 %v9218_v17  ;;  %v9266_v17 = vld [vmem:[%s11511_s1 + $0x1008] sm:$0xff]  }
 0x1e1   :  { %8454 = vmatpush3.bf16.msra.mxu1 %v9219_v18  ;;  %8461 = vmatprep.subr.bf16.mxu0 %v9224_v25  ;;  %v9267_v18 = vld [vmem:[%s11511_s1 + $0x1088] sm:$0xff]   ;;  %v9274_v25 = vld [vmem:[%s11511_s1 + $0x1018] sm:$0xff]  }
 0x1e2   :  { %8483 = vmatprep.subr.bf16.mxu1 %v9225_v26  ;;  %v9275_v26 = vld [vmem:[%s11511_s1 + $0x1098] sm:$0xff]  }
 0x1e3   :  { %6615 = vmatmul.mubr.bf16.vlgmr.msra.gmra.mrb[56].mxu0 %v7137_v21  ;;  %v9270_v21 = vld [vmem:[%s11511_s1 + $0x1010] sm:$0xff]  }
 0x1e4   :  { %6655 = vmatmul.mubr.bf16.vlgmr.msra.gmra.mrb[56].mxu1 %v7139_v23  ;;  %8462 = vmatpush3.bf16.msra.mxu0 %v9226_v27  ;;  %v9272_v23 = vld [vmem:[%s11511_s1 + $0x1058] sm:$0xff]   ;;  %v9276_v27 = vld [vmem:[%s11511_s1 + $0x1060] sm:$0xff]  }
 0x1e5   :  { %8484 = vmatpush3.bf16.msra.mxu1 %v9227_v28  ;;  %8463 = vmatprep.subr.bf16.mxu0 %v9228_v29  ;;  %v9277_v28 = vld [vmem:[%s11511_s1 + $0x10e0] sm:$0xff]  }
 0x1e6   :  { %8485 = vmatprep.subr.bf16.mxu1 %v9229_v30  ;;  %6694 = vmatprep.mubr.bf16.mxu0 %v7142_v8  ;;  %v9278_v29 = vld [vmem:[%s11511_s1 + $0x1020] sm:$0xff]   ;;  %v9307_v8 = vld [vmem:[%s11511_s1 + $0x1190] sm:$0xff]  }
 0x1e7   :  { %6734 = vmatprep.mubr.bf16.mxu1 %v7144_v10  ;;  %v9309_v10 = vld [vmem:[%s11511_s1 + $0x11d8] sm:$0xff]  }
 0x1e8   :  { %8464 = vmatpush3.bf16.msra.mxu0 %v9230_v31  ;;  %v9279_v31 = vld [vmem:[%s11511_s1 + $0x10a0] sm:$0xff]  }
 0x1e9   :  { %8486 = vmatpush3.bf16.msra.mxu1 %v9231_v32  ;;  %8465 = vmatprep.subr.bf16.mxu0 %v9232_v33 }
 0x1ea   :  { %8487 = vmatprep.subr.bf16.mxu1 %v9233_v34 }
 0x1ec   :  { %8466 = vmatpush3.bf16.msra.mxu0 %v9234_v35 }
 0x1ed   :  { %8488 = vmatpush3.bf16.msra.mxu1 %v9235_v36  ;;  %8467 = vmatprep.subr.bf16.mxu0 %v9236_v37  ;;  %v9280_v37 = vld [vmem:[%s11511_s1 + $0x1068] sm:$0xff]  }
 0x1ee   :  { %8489 = vmatprep.subr.bf16.mxu1 %v9237_v38 }
 0x1f0   :  { %8468 = vmatpush3.bf16.msra.mxu0 %v9238_v39  ;;  %v9281_v39 = vld [vmem:[%s11511_s1 + $0x10e8] sm:$0xff]  }
 0x1f1   :  { %8490 = vmatpush3.bf16.msra.mxu1 %v9239_v40  ;;  %8469 = vmatprep.subr.bf16.mxu0 %v9240_v41 }
 0x1f2   :  { %8491 = vmatprep.subr.bf16.mxu1 %v9241_v42  ;;  %v9282_v42 = vld [vmem:[%s11511_s1 + $0x1028] sm:$0xff]  }
 0x1f4   :  { %8470 = vmatpush3.bf16.msra.mxu0 %v9242_v43 }
 0x1f5   :  { %8492 = vmatpush3.bf16.msra.mxu1 %v9243_v45  ;;  %8471 = vmatprep.subr.bf16.mxu0 %v9244_v51  ;;  %v9288_v51 = vld [vmem:[%s11511_s1 + $0x1078] sm:$0xff]  }
 0x1f6   :  { %v8169_v44 = vpop.f32.mrb[32].mxu0  ;;  %8493 = vmatprep.subr.bf16.mxu1 %v9245_v53  ;;  %v9290_v53 = vld [vmem:[%s11511_s1 + $0x1038] sm:$0xff]  }
 0x1f7   :  { %v8191_v46 = vpop.f32.mrb[32].mxu1  ;;  %v8170_v47 = vpop.f32.mrb[33].mxu0 }
 0x1f8   :  { %v8192_v48 = vpop.f32.mrb[33].mxu1  ;;  %v8171_v49 = vadd.f32 %v8170_v47, %v8169_v44  ;;  %v8172_v52 = vpop.f32.mrb[34].mxu0  ;;  %8472 = vmatpush3.bf16.msra.mxu0 %v9246_v56  ;;  %v9283_v44 = vld [vmem:[%s11511_s1 + $0x10a8] sm:$0xff]   ;;  %v9284_v47 = vld [vmem:[%s11511_s1 + $0x1070] sm:$0xff]  }
 0x1f9   :  { %v8193_v50 = vadd.f32 %v8192_v48, %v8191_v46  ;;  %v8194_v54 = vpop.f32.mrb[34].mxu1  ;;  %v8173_v57 = vpop.f32.mrb[35].mxu0  ;;  %8494 = vmatpush3.bf16.msra.mxu1 %v9247_v58  ;;  %8473 = vmatprep.subr.bf16.mxu0 %v9248_v61  ;;  %v9285_v48 = vld [vmem:[%s11511_s1 + $0x10f0] sm:$0xff]   ;;  %v9289_v52 = vld [vmem:[%s11511_s1 + $0x10f8] sm:$0xff]   ;;  %v55_v56 = vld [vmem:[%s11512_s0 + $0x108] sm:$0x77] }
 0x1fa   :  { %v6137_v55 = vadd.f32 %v8171_v49, %v10950_v11  ;;  %v8195_v59 = vpop.f32.mrb[35].mxu1  ;;  %8495 = vmatprep.subr.bf16.mxu1 %v9249_v62  ;;  %v9260_v11 = vld [vmem:[%s11511_s1 + $0x1040] sm:$0xff]   ;;  %v9286_v49 = vld [vmem:[%s11511_s1 + $0x1030] sm:$0xff]   ;;  %v9291_v54 = vld [vmem:[%s11511_s1 + $0x10b8] sm:$0xff]  }
 0x1fb   :  { %v7147_v59 = vcombine.low %v55_v56, %v55_v56  ;;  %v9296_v61 = vld [vmem:[%s11511_s1 + $0x1140] sm:$0xff]  }
 0x1fc   :  { %v11052_v60 = vadd.f32 %v8193_v50, %v6137_v55  ;;  %8474 = vmatpush3.bf16.msra.mxu0 %v9250_v63  ;;  %v9287_v50 = vld [vmem:[%s11511_s1 + $0x10b0] sm:$0xff]   ;;  %v54_v55 = vld [vmem:[%s11512_s0 + $0x100] sm:$0x77] }
 0x1fd   :  { %8496 = vmatpush3.bf16.msra.mxu1 %v9251_v0  ;;  %8475 = vmatprep.subr.bf16.mxu0 %v9252_v1  ;;  %v7145_v57 = vcombine.low %v54_v55, %v54_v55  ;;  %v7146_v58 = vcombine.high %v54_v55, %v54_v55  ;;  %v9297_v62 = vld [vmem:[%s11511_s1 + $0x11c0] sm:$0xff]   ;;  %v9300_v1 = vld [vmem:[%s11511_s1 + $0x1148] sm:$0xff]   ;;  %v9340_v55 = vld [vmem:[%s11511_s1 + $0x1250] sm:$0xff]  }
 0x1fe   :  { %8497 = vmatprep.subr.bf16.mxu1 %v9253_v2  ;;  %v9298_v63 = vld [vmem:[%s11511_s1 + $0x1100] sm:$0xff]   ;;  %v9301_v2 = vld [vmem:[%s11511_s1 + $0x11c8] sm:$0xff]  }
 0x1ff   :  { %v9299_v0 = vld [vmem:[%s11511_s1 + $0x1180] sm:$0xff]  }
 0x200   :  { %8476 = vmatpush3.bf16.msra.mxu0 %v9254_v3  ;;  %v9302_v3 = vld [vmem:[%s11511_s1 + $0x1108] sm:$0xff]  }
 0x201   :  { %8498 = vmatpush3.bf16.msra.mxu1 %v9255_v4  ;;  %8505 = vmatprep.subr.bf16.mxu0 %v9260_v11  ;;  %v9303_v4 = vld [vmem:[%s11511_s1 + $0x1188] sm:$0xff]   ;;  %v9310_v11 = vld [vmem:[%s11511_s1 + $0x1118] sm:$0xff]  }
 0x202   :  { %8527 = vmatprep.subr.bf16.mxu1 %v9261_v12  ;;  %v9311_v12 = vld [vmem:[%s11511_s1 + $0x1198] sm:$0xff]  }
 0x203   :  { %6695 = vmatmul.mubr.bf16.vlgmr.msra.gmra.mrb[60].mxu0 %v7141_v7  ;;  %v9306_v7 = vld [vmem:[%s11511_s1 + $0x1110] sm:$0xff]  }
 0x204   :  { %6735 = vmatmul.mubr.bf16.vlgmr.msra.gmra.mrb[60].mxu1 %v7143_v9  ;;  %8506 = vmatpush3.bf16.msra.mxu0 %v9262_v13  ;;  %v9308_v9 = vld [vmem:[%s11511_s1 + $0x1158] sm:$0xff]   ;;  %v9312_v13 = vld [vmem:[%s11511_s1 + $0x1160] sm:$0xff]  }
 0x205   :  { %8528 = vmatpush3.bf16.msra.mxu1 %v9263_v14  ;;  %8507 = vmatprep.subr.bf16.mxu0 %v9264_v15  ;;  %v9313_v14 = vld [vmem:[%s11511_s1 + $0x11e0] sm:$0xff]  }
 0x206   :  { %8529 = vmatprep.subr.bf16.mxu1 %v9265_v16  ;;  %6774 = vmatprep.mubr.bf16.mxu0 %v7146_v58  ;;  %v9314_v16 = vld [vmem:[%s11511_s1 + $0x1120] sm:$0xff]   ;;  %v9343_v58 = vld [vmem:[%s11511_s1 + $0x1290] sm:$0xff]  }
 0x208   :  { %8508 = vmatpush3.bf16.msra.mxu0 %v9266_v17 }
 0x209   :  { %8530 = vmatpush3.bf16.msra.mxu1 %v9267_v18  ;;  %8509 = vmatprep.subr.bf16.mxu0 %v9268_v19  ;;  %v9315_v18 = vld [vmem:[%s11511_s1 + $0x11a0] sm:$0xff]  }
 0x20a   :  { %8531 = vmatprep.subr.bf16.mxu1 %v9269_v20 }
 0x20c   :  { %8510 = vmatpush3.bf16.msra.mxu0 %v9270_v21 }
 0x20d   :  { %8532 = vmatpush3.bf16.msra.mxu1 %v9271_v22  ;;  %8511 = vmatprep.subr.bf16.mxu0 %v9272_v23  ;;  %v9316_v22 = vld [vmem:[%s11511_s1 + $0x1168] sm:$0xff]  }
 0x20e   :  { %8533 = vmatprep.subr.bf16.mxu1 %v9273_v24  ;;  %v9317_v24 = vld [vmem:[%s11511_s1 + $0x11e8] sm:$0xff]  }
 0x210   :  { %8512 = vmatpush3.bf16.msra.mxu0 %v9274_v25 }
 0x211   :  { %8534 = vmatpush3.bf16.msra.mxu1 %v9275_v26  ;;  %8513 = vmatprep.subr.bf16.mxu0 %v9276_v27 }
 0x212   :  { %8535 = vmatprep.subr.bf16.mxu1 %v9277_v28  ;;  %v9318_v28 = vld [vmem:[%s11511_s1 + $0x1128] sm:$0xff]  }
 0x214   :  { %8514 = vmatpush3.bf16.msra.mxu0 %v9278_v29  ;;  %v9319_v29 = vld [vmem:[%s11511_s1 + $0x11a8] sm:$0xff]  }
 0x215   :  { %8536 = vmatpush3.bf16.msra.mxu1 %v9279_v31  ;;  %8515 = vmatprep.subr.bf16.mxu0 %v9280_v37  ;;  %v9324_v37 = vld [vmem:[%s11511_s1 + $0x1178] sm:$0xff]  }
 0x216   :  { %v8213_v30 = vpop.f32.mrb[36].mxu0  ;;  %8537 = vmatprep.subr.bf16.mxu1 %v9281_v39  ;;  %v9326_v39 = vld [vmem:[%s11511_s1 + $0x1138] sm:$0xff]  }
 0x217   :  { %v8235_v32 = vpop.f32.mrb[36].mxu1  ;;  %v8214_v33 = vpop.f32.mrb[37].mxu0 }
 0x218   :  { %v8236_v34 = vpop.f32.mrb[37].mxu1  ;;  %v8215_v35 = vadd.f32 %v8214_v33, %v8213_v30  ;;  %v8216_v38 = vpop.f32.mrb[38].mxu0  ;;  %8516 = vmatpush3.bf16.msra.mxu0 %v9282_v42  ;;  %v9320_v33 = vld [vmem:[%s11511_s1 + $0x1170] sm:$0xff]   ;;  %v57_v42 = vld [vmem:[%s11512_s0 + $0x118] sm:$0x77] }
 0x219   :  { %v8237_v36 = vadd.f32 %v8236_v34, %v8235_v32  ;;  %v8238_v40 = vpop.f32.mrb[38].mxu1  ;;  %v8217_v43 = vpop.f32.mrb[39].mxu0  ;;  %8538 = vmatpush3.bf16.msra.mxu1 %v9283_v44  ;;  %8517 = vmatprep.subr.bf16.mxu0 %v9284_v47  ;;  %v9321_v34 = vld [vmem:[%s11511_s1 + $0x11f0] sm:$0xff]   ;;  %v9325_v38 = vld [vmem:[%s11511_s1 + $0x11f8] sm:$0xff]   ;;  %v7152_v47 = vcombine.high %v57_v42, %v57_v42 }
 0x21a   :  { %v6217_v41 = vadd.f32 %v8215_v35, %v11052_v60  ;;  %v8239_v45 = vpop.f32.mrb[39].mxu1  ;;  %8539 = vmatprep.subr.bf16.mxu1 %v9285_v48  ;;  %v7148_v60 = vcombine.high %v55_v56, %v55_v56  ;;  %v9322_v35 = vld [vmem:[%s11511_s1 + $0x1130] sm:$0xff]   ;;  %v9327_v40 = vld [vmem:[%s11511_s1 + $0x11b8] sm:$0xff]   ;;  %v9333_v48 = vld [vmem:[%s11511_s1 + $0x12c0] sm:$0xff]  }
 0x21b   :  { %v7151_v45 = vcombine.low %v57_v42, %v57_v42  ;;  %v9341_v56 = vld [vmem:[%s11511_s1 + $0x12d0] sm:$0xff]  }
 0x21c   :  { %v11157_v46 = vadd.f32 %v8237_v36, %v6217_v41  ;;  %8518 = vmatpush3.bf16.msra.mxu0 %v9286_v49  ;;  %6814 = vmatprep.mubr.bf16.mxu1 %v7148_v60  ;;  %v9323_v36 = vld [vmem:[%s11511_s1 + $0x11b0] sm:$0xff]   ;;  %v9334_v49 = vld [vmem:[%s11511_s1 + $0x1200] sm:$0xff]   ;;  %v9345_v60 = vld [vmem:[%s11511_s1 + $0x12d8] sm:$0xff]  }
 0x21d   :  { %8540 = vmatpush3.bf16.msra.mxu1 %v9287_v50  ;;  %8519 = vmatprep.subr.bf16.mxu0 %v9288_v51  ;;  %v56_v41 = vld [vmem:[%s11512_s0 + $0x110] sm:$0x77]  ;;  %v9335_v50 = vld [vmem:[%s11511_s1 + $0x1280] sm:$0xff]   ;;  %v9336_v51 = vld [vmem:[%s11511_s1 + $0x1248] sm:$0xff]  }
 0x21e   :  { %8541 = vmatprep.subr.bf16.mxu1 %v9289_v52  ;;  %v7149_v43 = vcombine.low %v56_v41, %v56_v41  ;;  %v7150_v44 = vcombine.high %v56_v41, %v56_v41  ;;  %v9337_v52 = vld [vmem:[%s11511_s1 + $0x12c8] sm:$0xff]   ;;  %v9376_v42 = vld [vmem:[%s11511_s1 + $0x1350] sm:$0xff]  }
 0x21f   :  { %v9375_v41 = vld [vmem:[%s11511_s1 + $0x1388] sm:$0xff]  }
 0x220   :  { %8520 = vmatpush3.bf16.msra.mxu0 %v9290_v53  ;;  %v9338_v53 = vld [vmem:[%s11511_s1 + $0x1208] sm:$0xff]  }
 0x221   :  { %8542 = vmatpush3.bf16.msra.mxu1 %v9291_v54  ;;  %8549 = vmatprep.subr.bf16.mxu0 %v9296_v61  ;;  %v9339_v54 = vld [vmem:[%s11511_s1 + $0x1288] sm:$0xff]   ;;  %v9346_v61 = vld [vmem:[%s11511_s1 + $0x1218] sm:$0xff]  }
 0x222   :  { %8571 = vmatprep.subr.bf16.mxu1 %v9297_v62  ;;  %v9347_v62 = vld [vmem:[%s11511_s1 + $0x1298] sm:$0xff]  }
 0x223   :  { %6775 = vmatmul.mubr.bf16.vlgmr.msra.gmra.mrb[64].mxu0 %v7145_v57  ;;  %v9342_v57 = vld [vmem:[%s11511_s1 + $0x1210] sm:$0xff]  }
 0x224   :  { %6815 = vmatmul.mubr.bf16.vlgmr.msra.gmra.mrb[64].mxu1 %v7147_v59  ;;  %8550 = vmatpush3.bf16.msra.mxu0 %v9298_v63  ;;  %v9344_v59 = vld [vmem:[%s11511_s1 + $0x1258] sm:$0xff]   ;;  %v9348_v63 = vld [vmem:[%s11511_s1 + $0x1260] sm:$0xff]  }
 0x225   :  { %8572 = vmatpush3.bf16.msra.mxu1 %v9299_v0  ;;  %8551 = vmatprep.subr.bf16.mxu0 %v9300_v1  ;;  %v9349_v0 = vld [vmem:[%s11511_s1 + $0x12e0] sm:$0xff]  }
 0x226   :  { %8573 = vmatprep.subr.bf16.mxu1 %v9301_v2  ;;  %6854 = vmatprep.mubr.bf16.mxu0 %v7150_v44  ;;  %v9350_v2 = vld [vmem:[%s11511_s1 + $0x1220] sm:$0xff]   ;;  %v9378_v44 = vld [vmem:[%s11511_s1 + $0x1310] sm:$0xff]  }
 0x227   :  { %6894 = vmatprep.mubr.bf16.mxu1 %v7152_v47  ;;  %v9381_v47 = vld [vmem:[%s11511_s1 + $0x13d8] sm:$0xff]  }
 0x228   :  { %8552 = vmatpush3.bf16.msra.mxu0 %v9302_v3 }
 0x229   :  { %8574 = vmatpush3.bf16.msra.mxu1 %v9303_v4  ;;  %8553 = vmatprep.subr.bf16.mxu0 %v9304_v5  ;;  %v9351_v4 = vld [vmem:[%s11511_s1 + $0x12a0] sm:$0xff]  }
 0x22a   :  { %8575 = vmatprep.subr.bf16.mxu1 %v9305_v6 }
 0x22c   :  { %8554 = vmatpush3.bf16.msra.mxu0 %v9306_v7  ;;  %v9352_v7 = vld [vmem:[%s11511_s1 + $0x1268] sm:$0xff]  }
 0x22d   :  { %8576 = vmatpush3.bf16.msra.mxu1 %v9307_v8  ;;  %8555 = vmatprep.subr.bf16.mxu0 %v9308_v9 }
 0x22e   :  { %8577 = vmatprep.subr.bf16.mxu1 %v9309_v10  ;;  %v9353_v10 = vld [vmem:[%s11511_s1 + $0x12e8] sm:$0xff]  }
 0x230   :  { %8556 = vmatpush3.bf16.msra.mxu0 %v9310_v11 }
 0x231   :  { %8578 = vmatpush3.bf16.msra.mxu1 %v9311_v12  ;;  %8557 = vmatprep.subr.bf16.mxu0 %v9312_v13  ;;  %v9354_v13 = vld [vmem:[%s11511_s1 + $0x1228] sm:$0xff]  }
 0x232   :  { %8579 = vmatprep.subr.bf16.mxu1 %v9313_v14 }
 0x234   :  { %8558 = vmatpush3.bf16.msra.mxu0 %v9314_v16 }
 0x235   :  { %8580 = vmatpush3.bf16.msra.mxu1 %v9315_v18  ;;  %8559 = vmatprep.subr.bf16.mxu0 %v9316_v22  ;;  %v9356_v18 = vld [vmem:[%s11511_s1 + $0x1270] sm:$0xff]  }
 0x236   :  { %v8257_v15 = vpop.f32.mrb[40].mxu0  ;;  %8581 = vmatprep.subr.bf16.mxu1 %v9317_v24  ;;  %v9359_v22 = vld [vmem:[%s11511_s1 + $0x12b0] sm:$0xff]   ;;  %v9360_v24 = vld [vmem:[%s11511_s1 + $0x1278] sm:$0xff]  }
 0x237   :  { %v8279_v17 = vpop.f32.mrb[40].mxu1  ;;  %v8258_v19 = vpop.f32.mrb[41].mxu0 }
 0x238   :  { %v8259_v20 = vadd.f32 %v8258_v19, %v8257_v15  ;;  %v8280_v21 = vpop.f32.mrb[41].mxu1  ;;  %v8260_v25 = vpop.f32.mrb[42].mxu0  ;;  %8560 = vmatpush3.bf16.msra.mxu0 %v9318_v28  ;;  %v9355_v15 = vld [vmem:[%s11511_s1 + $0x12a8] sm:$0xff]   ;;  %v58_v28 = vld [vmem:[%s11512_s0 + $0x120] sm:$0x77] }
 0x239   :  { %v8281_v23 = vadd.f32 %v8280_v21, %v8279_v17  ;;  %v8282_v27 = vpop.f32.mrb[42].mxu1  ;;  %v8261_v30 = vpop.f32.mrb[43].mxu0  ;;  %8582 = vmatpush3.bf16.msra.mxu1 %v9319_v29  ;;  %8561 = vmatprep.subr.bf16.mxu0 %v9320_v33  ;;  %v9358_v21 = vld [vmem:[%s11511_s1 + $0x1230] sm:$0xff]   ;;  %v9361_v25 = vld [vmem:[%s11511_s1 + $0x12f8] sm:$0xff]   ;;  %v7153_v29 = vcombine.low %v58_v28, %v58_v28 }
 0x23a   :  { %v6297_v26 = vadd.f32 %v8259_v20, %v11157_v46  ;;  %v8283_v32 = vpop.f32.mrb[43].mxu1  ;;  %8583 = vmatprep.subr.bf16.mxu1 %v9321_v34  ;;  %v9332_v46 = vld [vmem:[%s11511_s1 + $0x1240] sm:$0xff]   ;;  %v9357_v20 = vld [vmem:[%s11511_s1 + $0x12f0] sm:$0xff]   ;;  %v9363_v27 = vld [vmem:[%s11511_s1 + $0x12b8] sm:$0xff]   ;;  %v7154_v30 = vcombine.high %v58_v28, %v58_v28 }
 0x23b   :  { %v9368_v34 = vld [vmem:[%s11511_s1 + $0x1340] sm:$0xff]  }
 0x23c   :  { %v11262_v31 = vadd.f32 %v8281_v23, %v6297_v26  ;;  %8562 = vmatpush3.bf16.msra.mxu0 %v9322_v35  ;;  %v9404_v23 = vmov 0   ;;  %v9362_v26 = vld [vmem:[%s11511_s1 + $0x1238] sm:$0xff]   ;;  %v9369_v35 = vld [vmem:[%s11511_s1 + $0x13c0] sm:$0xff]  }
 0x23d   :  { %8584 = vmatpush3.bf16.msra.mxu1 %v9323_v36  ;;  %8563 = vmatprep.subr.bf16.mxu0 %v9324_v37  ;;  %v9370_v36 = vld [vmem:[%s11511_s1 + $0x1300] sm:$0xff]  }
 0x23e   :  { %8585 = vmatprep.subr.bf16.mxu1 %v9325_v38  ;;  %8683 = vset.pattern.permute.xlu0 %v9404_v23  ;;  %v9371_v37 = vld [vmem:[%s11511_s1 + $0x1380] sm:$0xff]   ;;  %v9372_v38 = vld [vmem:[%s11511_s1 + $0x1348] sm:$0xff]  }
 0x240   :  { %8564 = vmatpush3.bf16.msra.mxu0 %v9326_v39  ;;  %v9373_v39 = vld [vmem:[%s11511_s1 + $0x13c8] sm:$0xff]  }
 0x241   :  { %8586 = vmatpush3.bf16.msra.mxu1 %v9327_v40  ;;  %8593 = vmatprep.subr.bf16.mxu0 %v9332_v46  ;;  %v9374_v40 = vld [vmem:[%s11511_s1 + $0x1308] sm:$0xff]   ;;  %v9380_v46 = vld [vmem:[%s11511_s1 + $0x1358] sm:$0xff]  }
 0x242   :  { %8615 = vmatprep.subr.bf16.mxu1 %v9333_v48  ;;  %v9382_v48 = vld [vmem:[%s11511_s1 + $0x1318] sm:$0xff]  }
 0x243   :  { %6855 = vmatmul.mubr.bf16.vlgmr.msra.gmra.mrb[68].mxu0 %v7149_v43  ;;  %v9377_v43 = vld [vmem:[%s11511_s1 + $0x13d0] sm:$0xff]  }
 0x244   :  { %6895 = vmatmul.mubr.bf16.vlgmr.msra.gmra.mrb[68].mxu1 %v7151_v45  ;;  %8594 = vmatpush3.bf16.msra.mxu0 %v9334_v49  ;;  %v9379_v45 = vld [vmem:[%s11511_s1 + $0x1390] sm:$0xff]   ;;  %v9383_v49 = vld [vmem:[%s11511_s1 + $0x1398] sm:$0xff]  }
 0x245   :  { %8616 = vmatpush3.bf16.msra.mxu1 %v9335_v50  ;;  %8595 = vmatprep.subr.bf16.mxu0 %v9336_v51  ;;  %v9384_v50 = vld [vmem:[%s11511_s1 + $0x1360] sm:$0xff]  }
 0x246   :  { %8617 = vmatprep.subr.bf16.mxu1 %v9337_v52  ;;  %6934 = vmatprep.mubr.bf16.mxu0 %v7154_v30  ;;  %v9385_v51 = vld [vmem:[%s11511_s1 + $0x13e0] sm:$0xff]  }
 0x248   :  { %8596 = vmatpush3.bf16.msra.mxu0 %v9338_v53  ;;  %v9386_v53 = vld [vmem:[%s11511_s1 + $0x1320] sm:$0xff]  }
 0x249   :  { %8618 = vmatpush3.bf16.msra.mxu1 %v9339_v54  ;;  %8597 = vmatprep.subr.bf16.mxu0 %v9340_v55  ;;  %v9387_v55 = vld [vmem:[%s11511_s1 + $0x13a0] sm:$0xff]  }
 0x24a   :  { %8619 = vmatprep.subr.bf16.mxu1 %v9341_v56 }
 0x24c   :  { %8598 = vmatpush3.bf16.msra.mxu0 %v9342_v57 }
 0x24d   :  { %8620 = vmatpush3.bf16.msra.mxu1 %v9343_v58  ;;  %8599 = vmatprep.subr.bf16.mxu0 %v9344_v59  ;;  %v9388_v58 = vld [vmem:[%s11511_s1 + $0x1368] sm:$0xff]  }
 0x24e   :  { %8621 = vmatprep.subr.bf16.mxu1 %v9345_v60 }
 0x250   :  { %8600 = vmatpush3.bf16.msra.mxu0 %v9346_v61  ;;  %v9389_v61 = vld [vmem:[%s11511_s1 + $0x13e8] sm:$0xff]  }
 0x251   :  { %8622 = vmatpush3.bf16.msra.mxu1 %v9347_v62  ;;  %8601 = vmatprep.subr.bf16.mxu0 %v9348_v63 }
 0x252   :  { %8623 = vmatprep.subr.bf16.mxu1 %v9349_v0  ;;  %v9390_v0 = vld [vmem:[%s11511_s1 + $0x1328] sm:$0xff]  }
 0x254   :  { %8602 = vmatpush3.bf16.msra.mxu0 %v9350_v2  ;;  %v9391_v2 = vld [vmem:[%s11511_s1 + $0x13a8] sm:$0xff]  }
 0x255   :  { %8624 = vmatpush3.bf16.msra.mxu1 %v9351_v4  ;;  %8603 = vmatprep.subr.bf16.mxu0 %v9352_v7  ;;  %v9393_v7 = vld [vmem:[%s11511_s1 + $0x13f0] sm:$0xff]  }
 0x256   :  { %v8301_v1 = vpop.f32.mrb[44].mxu0  ;;  %8625 = vmatprep.subr.bf16.mxu1 %v9353_v10  ;;  %v9396_v10 = vld [vmem:[%s11511_s1 + $0x1378] sm:$0xff]  }
 0x257   :  { %v8323_v3 = vpop.f32.mrb[44].mxu1  ;;  %v8302_v5 = vpop.f32.mrb[45].mxu0 }
 0x258   :  { %v8324_v6 = vpop.f32.mrb[45].mxu1  ;;  %v8303_v8 = vadd.f32 %v8302_v5, %v8301_v1  ;;  %v8304_v11 = vpop.f32.mrb[46].mxu0  ;;  %8604 = vmatpush3.bf16.msra.mxu0 %v9354_v13  ;;  %v9392_v5 = vld [vmem:[%s11511_s1 + $0x1370] sm:$0xff]   ;;  %v9399_v13 = vld [vmem:[%s11511_s1 + $0x13b8] sm:$0xff]  }
 0x259   :  { %v8325_v9 = vadd.f32 %v8324_v6, %v8323_v3  ;;  %v8326_v12 = vpop.f32.mrb[46].mxu1  ;;  %v8305_v16 = vpop.f32.mrb[47].mxu0  ;;  %8626 = vmatpush3.bf16.msra.mxu1 %v9355_v15  ;;  %8605 = vmatprep.subr.bf16.mxu0 %v9356_v18  ;;  %v9397_v11 = vld [vmem:[%s11511_s1 + $0x13f8] sm:$0xff]  }
 0x25a   :  { %v6377_v14 = vadd.f32 %v8303_v8, %v11262_v31  ;;  %v8327_v17 = vpop.f32.mrb[47].mxu1  ;;  %8627 = vmatprep.subr.bf16.mxu1 %v9357_v20  ;;  %v59_v31 = vld [vmem:[%s11512_s0 + $0x128] sm:$0x77]  ;;  %v9394_v8 = vld [vmem:[%s11511_s1 + $0x1330] sm:$0xff]   ;;  %v9398_v12 = vld [vmem:[%s11511_s1 + $0x1338] sm:$0xff]  }
 0x25b   :  { %v7155_v32 = vcombine.low %v59_v31, %v59_v31  ;;  %v7156_v33 = vcombine.high %v59_v31, %v59_v31  ;;  %v61_v15 = vld [vmem:[%s11512_s0 + $0x138] sm:$0x77]  ;;  %v7069_v20 = vld [vmem:[%s11513_s2] sm:$0x3f] }
 0x25c   :  { %v11370_v19 = vadd.f32 %v8325_v9, %v6377_v14  ;;  %8606 = vmatpush3.bf16.msra.mxu0 %v9358_v21  ;;  %v9395_v9 = vld [vmem:[%s11511_s1 + $0x13b0] sm:$0xff]   ;;  %v7159_v18 = vcombine.low %v61_v15, %v61_v15  ;;  %7072 = vperm.xlu0 %8683, %v7069_v20  }
 0x25d   :  { %8628 = vmatpush3.bf16.msra.mxu1 %v9359_v22  ;;  %8607 = vmatprep.subr.bf16.mxu0 %v9360_v24  ;;  %v60_v14 = vld [vmem:[%s11512_s0 + $0x130] sm:$0x77] }
 0x25e   :  { %8629 = vmatprep.subr.bf16.mxu1 %v9361_v25  ;;  %6974 = vmatprep.mubr.bf16.mxu1 %v7156_v33  ;;  %v7157_v16 = vcombine.low %v60_v14, %v60_v14  ;;  %v7158_v17 = vcombine.high %v60_v14, %v60_v14 }
 0x260   :  { %8608 = vmatpush3.bf16.msra.mxu0 %v9362_v26 }
 0x261   :  { %8630 = vmatpush3.bf16.msra.mxu1 %v9363_v27  ;;  %8637 = vmatprep.subr.bf16.mxu0 %v9368_v34 }
 0x262   :  { %8659 = vmatprep.subr.bf16.mxu1 %v9369_v35 }
 0x263   :  { %6935 = vmatmul.mubr.bf16.vlgmr.msra.gmra.mrb[72].mxu0 %v7153_v29 }
 0x264   :  { %6975 = vmatmul.mubr.bf16.vlgmr.msra.gmra.mrb[72].mxu1 %v7155_v32  ;;  %8638 = vmatpush3.bf16.msra.mxu0 %v9370_v36 }
 0x265   :  { %8660 = vmatpush3.bf16.msra.mxu1 %v9371_v37  ;;  %8639 = vmatprep.subr.bf16.mxu0 %v9372_v38 }
 0x266   :  { %8661 = vmatprep.subr.bf16.mxu1 %v9373_v39  ;;  %7014 = vmatprep.mubr.bf16.mxu0 %v7158_v17 }
 0x268   :  { %8640 = vmatpush3.bf16.msra.mxu0 %v9374_v40 }
 0x269   :  { %8662 = vmatpush3.bf16.msra.mxu1 %v9375_v41  ;;  %8641 = vmatprep.subr.bf16.mxu0 %v9376_v42 }
 0x26a   :  { %8663 = vmatprep.subr.bf16.mxu1 %v9377_v43 }
 0x26c   :  { %8642 = vmatpush3.bf16.msra.mxu0 %v9378_v44 }
 0x26d   :  { %8664 = vmatpush3.bf16.msra.mxu1 %v9379_v45  ;;  %8643 = vmatprep.subr.bf16.mxu0 %v9380_v46 }
 0x26e   :  { %8665 = vmatprep.subr.bf16.mxu1 %v9381_v47 }
 0x270   :  { %8644 = vmatpush3.bf16.msra.mxu0 %v9382_v48 }
 0x271   :  { %8666 = vmatpush3.bf16.msra.mxu1 %v9383_v49  ;;  %8645 = vmatprep.subr.bf16.mxu0 %v9384_v50 }
 0x272   :  { %8667 = vmatprep.subr.bf16.mxu1 %v9385_v51 }
 0x274   :  { %8646 = vmatpush3.bf16.msra.mxu0 %v9386_v53 }
 0x275   :  { %8668 = vmatpush3.bf16.msra.mxu1 %v9387_v55  ;;  %8647 = vmatprep.subr.bf16.mxu0 %v9388_v58 }
 0x276   :  { %v8345_v52 = vpop.f32.mrb[48].mxu0  ;;  %8669 = vmatprep.subr.bf16.mxu1 %v9389_v61 }
 0x277   :  { %v8367_v54 = vpop.f32.mrb[48].mxu1  ;;  %v8346_v56 = vpop.f32.mrb[49].mxu0 }
 0x278   :  { %v8368_v57 = vpop.f32.mrb[49].mxu1  ;;  %v8347_v59 = vadd.f32 %v8346_v56, %v8345_v52  ;;  %v8348_v62 = vpop.f32.mrb[50].mxu0  ;;  %8648 = vmatpush3.bf16.msra.mxu0 %v9390_v0  ;;  %v9405_v56 = vmov 0.0  }
 0x279   :  { %v8369_v60 = vadd.f32 %v8368_v57, %v8367_v54  ;;  %v8370_v63 = vpop.f32.mrb[50].mxu1  ;;  %v8349_v3 = vpop.f32.mrb[51].mxu0  ;;  %8670 = vmatpush3.bf16.msra.mxu1 %v9391_v2  ;;  %8649 = vmatprep.subr.bf16.mxu0 %v9392_v5  ;;  %20 = vst.msk [vmem:[#allocation2] sm:$0x3f] %vm19_vm0, %v9405_v56 }
 0x27a   :  { %v6457_v1 = vadd.f32 %v8347_v59, %v11370_v19  ;;  %v8371_v4 = vpop.f32.mrb[51].mxu1  ;;  %8671 = vmatprep.subr.bf16.mxu1 %v9393_v7  ;;  %v7160_v19 = vcombine.high %v61_v15, %v61_v15 }
 0x27c   :  { %v6497_v6 = vadd.f32 %v8369_v60, %v6457_v1  ;;  %8650 = vmatpush3.bf16.msra.mxu0 %v9394_v8  ;;  %7054 = vmatprep.mubr.bf16.mxu1 %v7160_v19 }
 0x27d   :  { %8672 = vmatpush3.bf16.msra.mxu1 %v9395_v9  ;;  %8651 = vmatprep.subr.bf16.mxu0 %v9396_v10 }
 0x27e   :  { %8673 = vmatprep.subr.bf16.mxu1 %v9397_v11 }
 0x280   :  { %8652 = vmatpush3.bf16.msra.mxu0 %v9398_v12 }
 0x281   :  { %8674 = vmatpush3.bf16.msra.mxu1 %v9399_v13 }
 0x283   :  { %7015 = vmatmul.mubr.bf16.vlgmr.msra.gmra.mrb[76].mxu0 %v7157_v16 }
 0x284   :  { %7055 = vmatmul.mubr.bf16.vlgmr.msra.gmra.mrb[76].mxu1 %v7159_v18 }
 0x296   :  { %v8389_v21 = vpop.f32.mrb[52].mxu0 }
 0x297   :  { %v8411_v22 = vpop.f32.mrb[52].mxu1  ;;  %v8390_v23 = vpop.f32.mrb[53].mxu0 }
 0x298   :  { %v8412_v24 = vpop.f32.mrb[53].mxu1  ;;  %v8391_v25 = vadd.f32 %v8390_v23, %v8389_v21  ;;  %v8392_v27 = vpop.f32.mrb[54].mxu0 }
 0x299   :  { %v8413_v26 = vadd.f32 %v8412_v24, %v8411_v22  ;;  %v8414_v28 = vpop.f32.mrb[54].mxu1  ;;  %v8393_v29 = vpop.f32.mrb[55].mxu0 }
 0x29a   :  { %v8415_v30 = vpop.f32.mrb[55].mxu1  ;;  %v6537_v31 = vadd.f32 %v8391_v25, %v6497_v6 }
 0x29c   :  { %v6577_v32 = vadd.f32 %v8413_v26, %v6537_v31 }
 0x2b6   :  { %v8433_v33 = vpop.f32.mrb[56].mxu0 }
 0x2b7   :  { %v8455_v34 = vpop.f32.mrb[56].mxu1  ;;  %v8434_v35 = vpop.f32.mrb[57].mxu0 }
 0x2b8   :  { %v8435_v36 = vadd.f32 %v8434_v35, %v8433_v33  ;;  %v8456_v37 = vpop.f32.mrb[57].mxu1  ;;  %v8436_v38 = vpop.f32.mrb[58].mxu0 }
 0x2b9   :  { %v8457_v39 = vadd.f32 %v8456_v37, %v8455_v34  ;;  %v8458_v40 = vpop.f32.mrb[58].mxu1  ;;  %v8437_v41 = vpop.f32.mrb[59].mxu0 }
 0x2ba   :  { %v6617_v42 = vadd.f32 %v8435_v36, %v6577_v32  ;;  %v8459_v43 = vpop.f32.mrb[59].mxu1  ;;  %v21_v41 = vld [vmem:[#allocation2] sm:$0x3f] }
 0x2bc   :  { %v6657_v44 = vadd.f32 %v8457_v39, %v6617_v42 }
 0x2d6   :  { %v8477_v45 = vpop.f32.mrb[60].mxu0 }
 0x2d7   :  { %v8499_v46 = vpop.f32.mrb[60].mxu1  ;;  %v8478_v47 = vpop.f32.mrb[61].mxu0 }
 0x2d8   :  { %v8479_v48 = vadd.f32 %v8478_v47, %v8477_v45  ;;  %v8500_v49 = vpop.f32.mrb[61].mxu1  ;;  %v8480_v50 = vpop.f32.mrb[62].mxu0 }
 0x2d9   :  { %v8501_v51 = vadd.f32 %v8500_v49, %v8499_v46  ;;  %v8502_v52 = vpop.f32.mrb[62].mxu1  ;;  %v8481_v53 = vpop.f32.mrb[63].mxu0 }
 0x2da   :  { %v6697_v54 = vadd.f32 %v8479_v48, %v6657_v44  ;;  %v8503_v55 = vpop.f32.mrb[63].mxu1 }
 0x2db   :  { %v7073_v44 = vpop.permute.xlu0 %7072 }
 0x2dc   :  { %v6737_v57 = vadd.f32 %v8501_v51, %v6697_v54 }
 0x2f6   :  { %v8521_v58 = vpop.f32.mrb[64].mxu0 }
 0x2f7   :  { %v8543_v59 = vpop.f32.mrb[64].mxu1  ;;  %v8522_v60 = vpop.f32.mrb[65].mxu0 }
 0x2f8   :  { %v8523_v61 = vadd.f32 %v8522_v60, %v8521_v58  ;;  %v8544_v62 = vpop.f32.mrb[65].mxu1  ;;  %v8524_v63 = vpop.f32.mrb[66].mxu0 }
 0x2f9   :  { %v8545_v0 = vadd.f32 %v8544_v62, %v8543_v59  ;;  %v8546_v1 = vpop.f32.mrb[66].mxu1  ;;  %v8525_v2 = vpop.f32.mrb[67].mxu0 }
 0x2fa   :  { %v6777_v3 = vadd.f32 %v8523_v61, %v6737_v57  ;;  %v8547_v4 = vpop.f32.mrb[67].mxu1 }
 0x2fc   :  { %v6817_v5 = vadd.f32 %v8545_v0, %v6777_v3 }
 0x316   :  { %v8565_v6 = vpop.f32.mrb[68].mxu0 }
 0x317   :  { %v8587_v7 = vpop.f32.mrb[68].mxu1  ;;  %v8566_v8 = vpop.f32.mrb[69].mxu0 }
 0x318   :  { %v8567_v9 = vadd.f32 %v8566_v8, %v8565_v6  ;;  %v8588_v10 = vpop.f32.mrb[69].mxu1  ;;  %v8568_v11 = vpop.f32.mrb[70].mxu0 }
 0x319   :  { %v8589_v12 = vadd.f32 %v8588_v10, %v8587_v7  ;;  %v8590_v13 = vpop.f32.mrb[70].mxu1  ;;  %v8569_v14 = vpop.f32.mrb[71].mxu0 }
 0x31a   :  { %v6857_v15 = vadd.f32 %v8567_v9, %v6817_v5  ;;  %v8591_v16 = vpop.f32.mrb[71].mxu1 }
 0x31c   :  { %v6897_v17 = vadd.f32 %v8589_v12, %v6857_v15 }
 0x336   :  { %v8609_v18 = vpop.f32.mrb[72].mxu0 }
 0x337   :  { %v8631_v19 = vpop.f32.mrb[72].mxu1  ;;  %v8610_v20 = vpop.f32.mrb[73].mxu0 }
 0x338   :  { %v8632_v21 = vpop.f32.mrb[73].mxu1  ;;  %v8611_v22 = vadd.f32 %v8610_v20, %v8609_v18  ;;  %v8612_v24 = vpop.f32.mrb[74].mxu0 }
 0x339   :  { %v8633_v23 = vadd.f32 %v8632_v21, %v8631_v19  ;;  %v8634_v25 = vpop.f32.mrb[74].mxu1  ;;  %v8613_v26 = vpop.f32.mrb[75].mxu0 }
 0x33a   :  { %v8635_v27 = vpop.f32.mrb[75].mxu1  ;;  %v6937_v28 = vadd.f32 %v8611_v22, %v6897_v17 }
 0x33c   :  { %v6977_v29 = vadd.f32 %v8633_v23, %v6937_v28 }
 0x356   :  { %v8653_v30 = vpop.f32.mrb[76].mxu0 }
 0x357   :  { %v8675_v31 = vpop.f32.mrb[76].mxu1  ;;  %v8654_v32 = vpop.f32.mrb[77].mxu0 }
 0x358   :  { %v8655_v33 = vadd.f32 %v8654_v32, %v8653_v30  ;;  %v8676_v34 = vpop.f32.mrb[77].mxu1  ;;  %v8656_v35 = vpop.f32.mrb[78].mxu0 }
 0x359   :  { %v8677_v36 = vadd.f32 %v8676_v34, %v8675_v31  ;;  %v8678_v37 = vpop.f32.mrb[78].mxu1  ;;  %v8657_v38 = vpop.f32.mrb[79].mxu0 }
 0x35a   :  { %v7017_v39 = vadd.f32 %v8655_v33, %v6977_v29  ;;  %v8679_v40 = vpop.f32.mrb[79].mxu1 }
 0x35c   :  { %v7057_v42 = vadd.f32 %v8677_v36, %v7017_v39 }
 0x35e   :  { %v7062_v43 = vadd.f32 %v7057_v42, %v21_v41 }
 0x360   :  { %7064 = vst.msk [vmem:[#allocation2] sm:$0x3f] %vm19_vm0, %v7062_v43 }
 0x367   :  { %v7068_v45 = vld [vmem:[#allocation2] sm:$0x3f] }
 0x368   :  { %v7075_v46 = vadd.f32 %v7073_v44, %v7068_v45 }
 0x36a   :  { %7076 = vst.msk [vmem:[%s11514_s3] sm:$0x3f] %vm19_vm0, %v7075_v46 }

</bundles_post_ra>
